<compile_context>
chip_gen: v5e
topology: v5e:2x2
jax: 0.10.0
libtpu: 0.0.40
codegen_flags: <defaults>
</compile_context>

<pallas_src>
import math
from functools import partial

import jax
import jax.numpy as jnp
from jax.experimental import pallas as pl
from jax.experimental.pallas import tpu as pltpu


# ----------------------------- per-generation configuration -----------------------------

def _chip_config():
    kind = ""
    try:
        kind = jax.devices()[0].device_kind.lower()
    except Exception:
        pass
    vmem_phys = 128 * 1024 * 1024
    try:
        info = pltpu.get_tpu_info()
        vmem_phys = int(getattr(info, "vmem_capacity_bytes", vmem_phys))
    except Exception:
        if "v7" in kind:
            vmem_phys = 64 * 1024 * 1024
    # v5e's 128-wide MXU gains nothing from 256-row tiles; v6e/v7x want >=256.
    row_target = 128 if "v5" in kind else 256
    # leave ~25% headroom for compiler scratch / double buffers.
    vmem_limit = min((vmem_phys * 3) // 4, 112 * 1024 * 1024)
    return row_target, vmem_limit


ROW_TARGET, VMEM_LIMIT = _chip_config()


# ----------------------------- tile-size helpers -----------------------------

def _divisor_tile(n, candidates):
    for t in candidates:
        if n % t == 0:
            return t
    return n


def _seq_tile(t):
    """Query-tile size for attention: full extent if small, else a divisor <= target."""
    if t <= ROW_TARGET:
        return t
    return _divisor_tile(t, (ROW_TARGET, 128, 64, 32, 16, 8))


def _row_tile_and_pad(m, target=None):
    """Row tile + padded row count (rows padded with zeros, sliced off afterwards)."""
    target = ROW_TARGET if target is None else target
    if m <= target:
        return m, m
    tm = target
    return tm, -(-m // tm) * tm


def _col_tile(n, target=512):
    if n <= target:
        return n
    return _divisor_tile(n, (512, 256, 128))


def _resident(shape):
    """BlockSpec for a grid-invariant operand: constant index map, single-buffered."""
    zeros = (0,) * len(shape)
    return pl.BlockSpec(shape, lambda *_: zeros, pipeline_mode=pl.Buffered(1))


# ----------------------------- in-kernel helpers -----------------------------

def _ln(r, gamma, beta):
    mu = jnp.mean(r, axis=-1, keepdims=True)
    var = jnp.mean((r - mu) ** 2, axis=-1, keepdims=True)
    return (r - mu) * jax.lax.rsqrt(var + 1e-5) * gamma + beta


def _attn_body(xq, src, wq_ref, bq_ref, wkv_ref, bkv_ref, wo_ref, bo_ref,
               g_ref, beta_ref, o_ref, attn_ref, *, num_heads, causal, scale):
    """Q/K/V projections + per-head softmax(QK^T)V + out proj + residual + LayerNorm.

    xq : (TQ, E) bf16 query tile (also the residual); src : (S, E) bf16 K/V source.
    Per-head p@v results land in the VMEM f32 scratch attn_ref slice by slice.
    """
    TQ, E = xq.shape
    S = src.shape[0]
    Dh = E // num_heads

    q = jnp.dot(xq, wq_ref[...], preferred_element_type=jnp.float32) + bq_ref[...]
    kv = jnp.dot(src, wkv_ref[...], preferred_element_type=jnp.float32) + bkv_ref[...]
    qb = q.astype(jnp.bfloat16)
    kb = kv[:, :E].astype(jnp.bfloat16)
    vb = kv[:, E:].astype(jnp.bfloat16)

    if causal:
        q0 = pl.program_id(1) * TQ                      # global row of this query tile
        rows = q0 + jax.lax.broadcasted_iota(jnp.int32, (TQ, S), 0)
        cols = jax.lax.broadcasted_iota(jnp.int32, (TQ, S), 1)
        allow = cols <= rows                            # == PyTorch -inf triu mask

    # TODO(synk): for S or T beyond ~1K (or ~512 on v7x), switch to an online-softmax
    # (flash) accumulation over KV tiles instead of materializing (TQ, S) per head.
    # TODO(synk): for E/num_heads < 128, a head-major padded-Dh layout would avoid
    # sub-128 lane slices and better fill the 256-wide MXU on v6e/v7x.
    for h in range(num_heads):                          # static unrolled loop over heads
        qh = qb[:, h * Dh:(h + 1) * Dh]                 # (TQ, Dh)
        kh = kb[:, h * Dh:(h + 1) * Dh]                 # (S, Dh)
        vh = vb[:, h * Dh:(h + 1) * Dh]                 # (S, Dh)
        s = jax.lax.dot_general(qh, kh, (((1,), (1,)), ((), ())),
                                preferred_element_type=jnp.float32) * scale
        if causal:
            s = jnp.where(allow, s, jnp.float32(-1e30))
        s = s - jnp.max(s, axis=-1, keepdims=True)
        p = jnp.exp(s)
        # approx reciprocal (EUP slot): ~1e-3 relative error vs exact divide; fine for
        # inference but loosen tolerances when comparing against the f32 reference.
        p = p * pl.reciprocal(jnp.sum(p, axis=-1, keepdims=True), approx=True)
        attn_ref[:, h * Dh:(h + 1) * Dh] = jnp.dot(
            p.astype(jnp.bfloat16), vh, preferred_element_type=jnp.float32)

    y = jnp.dot(attn_ref[...].astype(jnp.bfloat16), wo_ref[...],
                preferred_element_type=jnp.float32) + bo_ref[...]

    r = xq.astype(jnp.float32) + y                      # residual + LN in f32
    o_ref[0] = _ln(r, g_ref[...], beta_ref[...]).astype(o_ref.dtype)


# ----------------------------- Pallas kernels -----------------------------

def _self_attn_kernel(x_ref, wq_ref, bq_ref, wkv_ref, bkv_ref, wo_ref, bo_ref,
                      g_ref, beta_ref, o_ref, attn_ref, *, num_heads, scale):
    """Self-attention with a single input ref (x DMA'd once, used as Q and K/V source)."""
    x = x_ref[0]
    _attn_body(x, x, wq_ref, bq_ref, wkv_ref, bkv_ref, wo_ref, bo_ref,
               g_ref, beta_ref, o_ref, attn_ref,
               num_heads=num_heads, causal=True, scale=scale)


def _attn_kernel(xq_ref, xkv_ref, wq_ref, bq_ref, wkv_ref, bkv_ref, wo_ref, bo_ref,
                 g_ref, beta_ref, o_ref, attn_ref, *, num_heads, causal, scale):
    """Cross-attention / query-tiled attention (separate query tile and K/V source)."""
    _attn_body(xq_ref[0], xkv_ref[0], wq_ref, bq_ref, wkv_ref, bkv_ref, wo_ref, bo_ref,
               g_ref, beta_ref, o_ref, attn_ref,
               num_heads=num_heads, causal=causal, scale=scale)


def _ffn_ln_kernel(x_ref, w1_ref, b1_ref, w2_ref, b2_ref, g_ref, beta_ref,
                   o_ref, acc_ref):
    """FFN with the hidden dim tiled: acc += relu(x@W1_f+b1_f)@W2_f; finalize with
    bias + residual + LayerNorm on the last F-tile."""
    f = pl.program_id(1)

    @pl.when(f == 0)
    def _():
        acc_ref[...] = jnp.zeros_like(acc_ref)

    x = x_ref[...]                                       # (TM, E) bf16
    h = jnp.dot(x, w1_ref[...], preferred_element_type=jnp.float32) + b1_ref[...]
    h = jnp.maximum(h, 0.0)                              # ReLU per F-tile is exact
    acc_ref[...] += jnp.dot(h.astype(jnp.bfloat16), w2_ref[...],
                            preferred_element_type=jnp.float32)

    @pl.when(f == pl.num_programs(1) - 1)
    def _():
        y = acc_ref[...] + b2_ref[...]
        r = x.astype(jnp.float32) + y
        o_ref[...] = _ln(r, g_ref[...], beta_ref[...]).astype(o_ref.dtype)


def _layernorm_kernel(x_ref, g_ref, b_ref, o_ref):
    x = x_ref[...].astype(jnp.float32)
    o_ref[...] = _ln(x, g_ref[...], b_ref[...]).astype(o_ref.dtype)


def _linear_kernel(x_ref, w_ref, b_ref, o_ref):
    o_ref[...] = jnp.dot(x_ref[...], w_ref[...],
                         preferred_element_type=jnp.float32) + b_ref[...]


# ----------------------------- kernel wrappers -----------------------------

def attention_block(xq, xkv, p, num_heads, causal, gamma, beta, *, shared_input=False):
    """Fused attention sub-layer.  xq: (B, T, E) bf16, xkv: (B, S, E) bf16."""
    B, T, E = xq.shape
    S = xkv.shape[1]
    TQ = _seq_tile(T)
    nq = T // TQ
    scale = 1.0 / math.sqrt(E // num_heads)

    wspecs = [
        _resident((E, E)),        # Wq      (bf16)
        _resident((1, E)),        # bq
        _resident((E, 2 * E)),    # W(k|v)  (bf16, fused)
        _resident((1, 2 * E)),    # b(k|v)
        _resident((E, E)),        # Wo      (bf16)
        _resident((1, E)),        # bo
        _resident((1, E)),        # LN gamma
        _resident((1, E)),        # LN beta
    ]
    weights = (p["wq"], p["bq"], p["wkv"], p["bkv"], p["wo"], p["bo"], gamma, beta)

    if shared_input and nq == 1:
        kernel = partial(_self_attn_kernel, num_heads=num_heads, scale=scale)
        in_specs = [pl.BlockSpec((1, T, E), lambda b, q: (b, 0, 0))] + wspecs
        operands = (xq,) + weights
    else:
        kernel = partial(_attn_kernel, num_heads=num_heads, causal=causal, scale=scale)
        in_specs = [pl.BlockSpec((1, TQ, E), lambda b, q: (b, q, 0)),
                    pl.BlockSpec((1, S, E), lambda b, q: (b, 0, 0))] + wspecs
        operands = (xq, xkv) + weights

    return pl.pallas_call(
        kernel,
        out_shape=jax.ShapeDtypeStruct((B, T, E), jnp.bfloat16),
        grid=(B, nq),
        in_specs=in_specs,
        out_specs=pl.BlockSpec((1, TQ, E), lambda b, q: (b, q, 0)),
        scratch_shapes=[pltpu.VMEM((TQ, E), jnp.float32)],
        compiler_params=pltpu.CompilerParams(
            dimension_semantics=("parallel", "parallel"),
            vmem_limit_bytes=VMEM_LIMIT),
    )(*operands)


def ffn_block(x, lp):
    """Fused FFN + residual + LayerNorm over rows of (B*T, E), hidden dim tiled."""
    B, T, E = x.shape
    M = B * T
    F = lp["w1"].shape[1]
    x2d = x.reshape(M, E)
    TM, MP = _row_tile_and_pad(M)
    if MP != M:
        x2d = jnp.pad(x2d, ((0, MP - M), (0, 0)))
    TF = _col_tile(F, 512)

    out = pl.pallas_call(
        _ffn_ln_kernel,
        out_shape=jax.ShapeDtypeStruct((MP, E), jnp.bfloat16),
        grid=(MP // TM, F // TF),
        in_specs=[
            pl.BlockSpec((TM, E), lambda i, f: (i, 0)),      # activation tile
            pl.BlockSpec((E, TF), lambda i, f: (0, f)),      # W1 tile (bf16)
            pl.BlockSpec((1, TF), lambda i, f: (0, f)),      # b1 tile
            pl.BlockSpec((TF, E), lambda i, f: (f, 0)),      # W2 tile (bf16)
            _resident((1, E)),                               # b2
            _resident((1, E)),                               # LN gamma
            _resident((1, E)),                               # LN beta
        ],
        out_specs=pl.BlockSpec((TM, E), lambda i, f: (i, 0)),
        scratch_shapes=[pltpu.VMEM((TM, E), jnp.float32)],   # second-matmul accumulator
        compiler_params=pltpu.CompilerParams(
            dimension_semantics=("parallel", "arbitrary"),
            vmem_limit_bytes=VMEM_LIMIT),
    )(x2d, lp["w1"], lp["b1"], lp["w2"], lp["b2"], lp["ln3_g"], lp["ln3_b"])
    if MP != M:
        out = out[:M]
    return out.reshape(B, T, E)


def layernorm(x2d, gamma, beta):
    M, E = x2d.shape
    TM, MP = _row_tile_and_pad(M)
    xp = jnp.pad(x2d, ((0, MP - M), (0, 0))) if MP != M else x2d
    out = pl.pallas_call(
        _layernorm_kernel,
        out_shape=jax.ShapeDtypeStruct((MP, E), jnp.bfloat16),
        grid=(MP // TM,),
        in_specs=[pl.BlockSpec((TM, E), lambda i: (i, 0)),
                  _resident((1, E)), _resident((1, E))],
        out_specs=pl.BlockSpec((TM, E), lambda i: (i, 0)),
        compiler_params=pltpu.CompilerParams(
            dimension_semantics=("parallel",), vmem_limit_bytes=VMEM_LIMIT),
    )(xp, gamma, beta)
    return out[:M] if MP != M else out


def linear(x2d, w, b):
    """fc_out: y = x @ w + b.  Vocab tile is the OUTER grid axis so the large (E, V)
    weight streams from HBM exactly once; the small activation tile is re-fetched."""
    # TODO(synk): on v7x an fp8-quantized fc_out weight would halve HBM traffic further.
    M, K = x2d.shape
    N = w.shape[1]
    TM, MP = _row_tile_and_pad(M, max(ROW_TARGET, 512))
    xp = jnp.pad(x2d, ((0, MP - M), (0, 0))) if MP != M else x2d
    TN = _col_tile(N, 512)

    cost = pl.CostEstimate(
        flops=2 * MP * K * N, transcendentals=0,
        bytes_accessed=MP * K * 2 + K * N * 2 + N * 4 + MP * N * 4)

    out = pl.pallas_call(
        _linear_kernel,
        out_shape=jax.ShapeDtypeStruct((MP, N), jnp.float32),
        grid=(N // TN, MP // TM),                            # vocab tile outer
        in_specs=[
            pl.BlockSpec((TM, K), lambda j, i: (i, 0)),      # activation tile (bf16)
            pl.BlockSpec((K, TN), lambda j, i: (0, j)),      # weight tile (bf16)
            pl.BlockSpec((1, TN), lambda j, i: (0, j)),      # bias tile
        ],
        out_specs=pl.BlockSpec((TM, TN), lambda j, i: (i, j)),
        compiler_params=pltpu.CompilerParams(
            dimension_semantics=("parallel", "parallel"),
            vmem_limit_bytes=VMEM_LIMIT),
        cost_estimate=cost,
    )(xp, w, b)
    return out[:M] if MP != M else out


# ----------------------------- model glue (plain JAX, fused under jit) -----------------------------

def sinusoidal_pe(maxlen, E):
    pos = jnp.arange(maxlen, dtype=jnp.float32)[:, None]
    den = jnp.exp(-jnp.arange(0, E, 2, dtype=jnp.float32) * math.log(10000.0) / E)
    pe = jnp.zeros((maxlen, E), jnp.float32)
    pe = pe.at[:, 0::2].set(jnp.sin(pos * den))
    pe = pe.at[:, 1::2].set(jnp.cos(pos * den))
    return pe


def transformer_decoder_forward(input_ids, encoder_out, params, num_heads):
    B, T = input_ids.shape
    E = params["emb"].shape[1]
    assert T <= params["pe"].shape[0], "sequence longer than positional table"

    # TokenEmbedding: embedding(ids) * sqrt(E); PositionalEmbedding (sinusoidal);
    # dropout modules are identity in eval mode.  Activations carried in bf16.
    tok = params["emb"][input_ids] * math.sqrt(E)
    x = (tok + params["pe"][:T][None, :, :]).astype(jnp.bfloat16)   # (B, T, E)
    mem = encoder_out.astype(jnp.bfloat16)                          # (B, S, E)

    for lp in params["layers"]:
        # self-attention (causal mask generated in-kernel) + residual + LN1
        x = attention_block(x, x, lp["self_attn"], num_heads, True,
                            lp["ln1_g"], lp["ln1_b"], shared_input=True)
        # cross-attention over encoder memory + residual + LN2
        x = attention_block(x, mem, lp["cross_attn"], num_heads, False,
                            lp["ln2_g"], lp["ln2_b"])
        # feed-forward + residual + LN3
        x = ffn_block(x, lp)

    # final decoder LayerNorm, then fc_out (f32 logits)
    x2d = layernorm(x.reshape(B * T, E), params["norm_g"], params["norm_b"])
    logits = linear(x2d, params["fc_w"], params["fc_b"])
    return logits.reshape(B, T, -1)


# ----------------------------- deterministic parameter init -----------------------------

def init_params(key, vocab_size, E, num_layers, ffnn_size):
    keys = iter(jax.random.split(key, 16 + 16 * num_layers))

    def w(shape, scale=0.02):
        return jax.random.normal(next(keys), shape, jnp.float32) * scale

    def bf(a):   # matmul weights cast to bf16 ONCE here (f32 accumulation in-kernel)
        return a.astype(jnp.bfloat16)

    def attn_params():
        wk, wv = w((E, E)), w((E, E))
        return dict(
            wq=bf(w((E, E))), bq=jnp.zeros((1, E), jnp.float32),
            wkv=bf(jnp.concatenate([wk, wv], axis=1)),          # fused K|V projection
            bkv=jnp.zeros((1, 2 * E), jnp.float32),
            wo=bf(w((E, E))), bo=jnp.zeros((1, E), jnp.float32),
        )

    layers = []
    for _ in range(num_layers):
        layers.append(dict(
            self_attn=attn_params(),
            cross_attn=attn_params(),
            ln1_g=jnp.ones((1, E), jnp.float32), ln1_b=jnp.zeros((1, E), jnp.float32),
            ln2_g=jnp.ones((1, E), jnp.float32), ln2_b=jnp.zeros((1, E), jnp.float32),
            ln3_g=jnp.ones((1, E), jnp.float32), ln3_b=jnp.zeros((1, E), jnp.float32),
            w1=bf(w((E, ffnn_size))), b1=jnp.zeros((1, ffnn_size), jnp.float32),
            w2=bf(w((ffnn_size, E))), b2=jnp.zeros((1, E), jnp.float32),
        ))

    return dict(
        emb=w((vocab_size, E), 0.1),                 # embedding table stays f32 (gather)
        pe=sinusoidal_pe(512, E),
        layers=layers,
        norm_g=jnp.ones((1, E), jnp.float32), norm_b=jnp.zeros((1, E), jnp.float32),
        fc_w=bf(w((E, vocab_size))), fc_b=jnp.zeros((1, vocab_size), jnp.float32),
    )


# ----------------------------- demo -----------------------------

if __name__ == "__main__":
    VOCAB, E, HEADS, LAYERS, FFN = 96, 32, 4, 2, 64
    B, T, S = 2, 8, 8

    root = jax.random.PRNGKey(0)
    k_par, k_ids, k_mem = jax.random.split(root, 3)

    params = init_params(k_par, VOCAB, E, LAYERS, FFN)
    input_ids = jax.random.randint(k_ids, (B, T), 0, VOCAB, dtype=jnp.int32)
    encoder_out = jax.random.normal(k_mem, (B, S, E), jnp.float32)  # encoder_out[0] analog

    fwd = jax.jit(partial(transformer_decoder_forward, num_heads=HEADS))
    logits = fwd(input_ids, encoder_out, params)
    logits = jax.block_until_ready(logits)

    assert logits.shape == (B, T, VOCAB), logits.shape
    assert bool(jnp.all(jnp.isfinite(logits)))
    print("KERNEL_OK")
</pallas_src>

<mosaic_0001>
module attributes {stable_mosaic.version = 11 : i64} {
  func.func @_ffn_ln_kernel(%arg0: i32, %arg1: i32, %arg2: memref<16x32xbf16, #tpu.memory_space<vmem>>, %arg3: memref<32x64xbf16, #tpu.memory_space<vmem>>, %arg4: memref<1x64xf32, #tpu.memory_space<vmem>>, %arg5: memref<64x32xbf16, #tpu.memory_space<vmem>>, %arg6: memref<1x32xf32, #tpu.memory_space<vmem>>, %arg7: memref<1x32xf32, #tpu.memory_space<vmem>>, %arg8: memref<1x32xf32, #tpu.memory_space<vmem>>, %arg9: memref<16x32xbf16, #tpu.memory_space<vmem>>, %arg10: memref<16x32xf32, #tpu.memory_space<vmem>>) attributes {dimension_semantics = [#tpu.dimension_semantics<parallel>, #tpu.dimension_semantics<arbitrary>], iteration_bounds = array<i64: 1, 1>, scalar_prefetch = 0 : i64, scratch_operands = 1 : i64, tpu.core_type = #tpu.core_type<tc>, window_params = [{transform_indices = @transform_0, window_bounds = array<i64: 16, 32>}, {transform_indices = @transform_1, window_bounds = array<i64: 32, 64>}, {transform_indices = @transform_2, window_bounds = array<i64: 1, 64>}, {transform_indices = @transform_3, window_bounds = array<i64: 64, 32>}, {pipeline_mode = #tpu.pipeline_mode<synchronous>, transform_indices = @transform_4, window_bounds = array<i64: 1, 32>}, {pipeline_mode = #tpu.pipeline_mode<synchronous>, transform_indices = @transform_5, window_bounds = array<i64: 1, 32>}, {pipeline_mode = #tpu.pipeline_mode<synchronous>, transform_indices = @transform_6, window_bounds = array<i64: 1, 32>}, {transform_indices = @transform_7, window_bounds = array<i64: 16, 32>}]} {
    %c0_i32 = arith.constant 0 : i32
    %0 = arith.cmpi eq, %arg1, %c0_i32 : i32
    %1 = arith.extui %0 : i1 to i32
    %c0_i32_0 = arith.constant 0 : i32
    %2 = arith.cmpi ne, %1, %c0_i32_0 : i32
    scf.if %2 {
      %cst_16 = arith.constant 0.000000e+00 : f32
      %20 = vector.broadcast %cst_16 : f32 to vector<16x32xf32>
      %c0_17 = arith.constant 0 : index
      %c0_18 = arith.constant 0 : index
      %21 = vector.load %arg10[%c0_17, %c0_18] : memref<16x32xf32, #tpu.memory_space<vmem>>, vector<16x32xf32>
      tpu.vector_store %arg10[%c0_17, %c0_18], %20 {strides = array<i32>} : memref<16x32xf32, #tpu.memory_space<vmem>>, vector<16x32xf32>,
    } else {
    }
    %c0 = arith.constant 0 : index
    %c0_1 = arith.constant 0 : index
    %3 = vector.load %arg2[%c0, %c0_1] : memref<16x32xbf16, #tpu.memory_space<vmem>>, vector<16x32xbf16>
    %c0_2 = arith.constant 0 : index
    %c0_3 = arith.constant 0 : index
    %4 = vector.load %arg3[%c0_2, %c0_3] : memref<32x64xbf16, #tpu.memory_space<vmem>>, vector<32x64xbf16>
    %cst = arith.constant dense<0.000000e+00> : vector<16x64xf32>
    %5 = tpu.matmul %3, %4, %cst {dimension_numbers = #tpu.dot_dimension_numbers<[1], [0], [0], [1], [0, 0, 1, 1], [], []>} : vector<16x32xbf16>, vector<32x64xbf16>, vector<16x64xf32> -> vector<16x64xf32>
    %c0_4 = arith.constant 0 : index
    %c0_5 = arith.constant 0 : index
    %6 = vector.load %arg4[%c0_4, %c0_5] : memref<1x64xf32, #tpu.memory_space<vmem>>, vector<1x64xf32>
    %7 = vector.broadcast %6 : vector<1x64xf32> to vector<16x64xf32>
    %8 = arith.addf %5, %7 : vector<16x64xf32>
    %cst_6 = arith.constant 0.000000e+00 : f32
    %9 = vector.broadcast %cst_6 : f32 to vector<16x64xf32>
    %10 = arith.maximumf %8, %9 : vector<16x64xf32>
    %c0_7 = arith.constant 0 : index
    %c0_8 = arith.constant 0 : index
    %11 = vector.load %arg10[%c0_7, %c0_8] : memref<16x32xf32, #tpu.memory_space<vmem>>, vector<16x32xf32>
    %12 = arith.truncf %10 : vector<16x64xf32> to vector<16x64xbf16>
    %c0_9 = arith.constant 0 : index
    %c0_10 = arith.constant 0 : index
    %13 = vector.load %arg5[%c0_9, %c0_10] : memref<64x32xbf16, #tpu.memory_space<vmem>>, vector<64x32xbf16>
    %cst_11 = arith.constant dense<0.000000e+00> : vector<16x32xf32>
    %14 = tpu.matmul %12, %13, %cst_11 {dimension_numbers = #tpu.dot_dimension_numbers<[1], [0], [0], [1], [0, 0, 1, 1], [], []>} : vector<16x64xbf16>, vector<64x32xbf16>, vector<16x32xf32> -> vector<16x32xf32>
    %15 = arith.addf %11, %14 : vector<16x32xf32>
    %c0_12 = arith.constant 0 : index
    %c0_13 = arith.constant 0 : index
    %16 = vector.load %arg10[%c0_12, %c0_13] : memref<16x32xf32, #tpu.memory_space<vmem>>, vector<16x32xf32>
    tpu.vector_store %arg10[%c0_12, %c0_13], %15 {strides = array<i32>} : memref<16x32xf32, #tpu.memory_space<vmem>>, vector<16x32xf32>,
    %c0_i32_14 = arith.constant 0 : i32
    %17 = arith.cmpi eq, %arg1, %c0_i32_14 : i32
    %18 = arith.extui %17 : i1 to i32
    %c0_i32_15 = arith.constant 0 : i32
    %19 = arith.cmpi ne, %18, %c0_i32_15 : i32
    scf.if %19 {
      %c0_16 = arith.constant 0 : index
      %c0_17 = arith.constant 0 : index
      %20 = vector.load %arg10[%c0_16, %c0_17] : memref<16x32xf32, #tpu.memory_space<vmem>>, vector<16x32xf32>
      %c0_18 = arith.constant 0 : index
      %c0_19 = arith.constant 0 : index
      %21 = vector.load %arg6[%c0_18, %c0_19] : memref<1x32xf32, #tpu.memory_space<vmem>>, vector<1x32xf32>
      %22 = vector.broadcast %21 : vector<1x32xf32> to vector<16x32xf32>
      %23 = arith.addf %20, %22 : vector<16x32xf32>
      %24 = arith.extf %3 : vector<16x32xbf16> to vector<16x32xf32>
      %25 = arith.addf %24, %23 : vector<16x32xf32>
      %c0_20 = arith.constant 0 : index
      %c0_21 = arith.constant 0 : index
      %26 = vector.load %arg7[%c0_20, %c0_21] : memref<1x32xf32, #tpu.memory_space<vmem>>, vector<1x32xf32>
      %c0_22 = arith.constant 0 : index
      %c0_23 = arith.constant 0 : index
      %27 = vector.load %arg8[%c0_22, %c0_23] : memref<1x32xf32, #tpu.memory_space<vmem>>, vector<1x32xf32>
      %cst_24 = arith.constant dense<0.000000e+00> : vector<16xf32>
      %28 = vector.multi_reduction <add>, %25, %cst_24 [1] : vector<16x32xf32> to vector<16xf32>
      %29 = vector.shape_cast %28 : vector<16xf32> to vector<16x1xf32>
      %cst_25 = arith.constant 3.200000e+01 : f32
      %30 = vector.broadcast %cst_25 : f32 to vector<16x1xf32>
      %31 = arith.divf %29, %30 : vector<16x1xf32>
      %32 = vector.broadcast %31 : vector<16x1xf32> to vector<16x32xf32>
      %33 = arith.subf %25, %32 : vector<16x32xf32>
      %34 = arith.mulf %33, %33 : vector<16x32xf32>
      %cst_26 = arith.constant dense<0.000000e+00> : vector<16xf32>
      %35 = vector.multi_reduction <add>, %34, %cst_26 [1] : vector<16x32xf32> to vector<16xf32>
      %36 = vector.shape_cast %35 : vector<16xf32> to vector<16x1xf32>
      %cst_27 = arith.constant 3.200000e+01 : f32
      %37 = vector.broadcast %cst_27 : f32 to vector<16x1xf32>
      %38 = arith.divf %36, %37 : vector<16x1xf32>
      %39 = vector.broadcast %31 : vector<16x1xf32> to vector<16x32xf32>
      %40 = arith.subf %25, %39 : vector<16x32xf32>
      %cst_28 = arith.constant 9.99999974E-6 : f32
      %41 = vector.broadcast %cst_28 : f32 to vector<16x1xf32>
      %42 = arith.addf %38, %41 : vector<16x1xf32>
      %43 = math.rsqrt %42 : vector<16x1xf32>
      %44 = vector.broadcast %43 : vector<16x1xf32> to vector<16x32xf32>
      %45 = arith.mulf %40, %44 : vector<16x32xf32>
      %46 = vector.broadcast %26 : vector<1x32xf32> to vector<16x32xf32>
      %47 = arith.mulf %45, %46 : vector<16x32xf32>
      %48 = vector.broadcast %27 : vector<1x32xf32> to vector<16x32xf32>
      %49 = arith.addf %47, %48 : vector<16x32xf32>
      %50 = arith.truncf %49 : vector<16x32xf32> to vector<16x32xbf16>
      %c0_29 = arith.constant 0 : index
      %c0_30 = arith.constant 0 : index
      %51 = vector.load %arg9[%c0_29, %c0_30] : memref<16x32xbf16, #tpu.memory_space<vmem>>, vector<16x32xbf16>
      tpu.vector_store %arg9[%c0_29, %c0_30], %50 {strides = array<i32>} : memref<16x32xbf16, #tpu.memory_space<vmem>>, vector<16x32xbf16>,
    } else {
    }
    return
  }
  func.func @transform_0(%arg0: i32, %arg1: i32) -> (i32, i32) {
    %c0_i32 = arith.constant 0 : i32
    %c0_i32_0 = arith.constant 0 : i32
    return %arg0, %c0_i32 : i32, i32
  }
  func.func @transform_1(%arg0: i32, %arg1: i32) -> (i32, i32) {
    %c0_i32 = arith.constant 0 : i32
    %c0_i32_0 = arith.constant 0 : i32
    return %c0_i32, %arg1 : i32, i32
  }
  func.func @transform_2(%arg0: i32, %arg1: i32) -> (i32, i32) {
    %c0_i32 = arith.constant 0 : i32
    %c0_i32_0 = arith.constant 0 : i32
    return %c0_i32, %arg1 : i32, i32
  }
  func.func @transform_3(%arg0: i32, %arg1: i32) -> (i32, i32) {
    %c0_i32 = arith.constant 0 : i32
    %c0_i32_0 = arith.constant 0 : i32
    return %arg1, %c0_i32 : i32, i32
  }
  func.func @transform_4(%arg0: i32, %arg1: i32) -> (i32, i32) {
    %c0_i32 = arith.constant 0 : i32
    %c0_i32_0 = arith.constant 0 : i32
    %c0_i32_1 = arith.constant 0 : i32
    return %c0_i32, %c0_i32_0 : i32, i32
  }
  func.func @transform_5(%arg0: i32, %arg1: i32) -> (i32, i32) {
    %c0_i32 = arith.constant 0 : i32
    %c0_i32_0 = arith.constant 0 : i32
    %c0_i32_1 = arith.constant 0 : i32
    return %c0_i32, %c0_i32_0 : i32, i32
  }
  func.func @transform_6(%arg0: i32, %arg1: i32) -> (i32, i32) {
    %c0_i32 = arith.constant 0 : i32
    %c0_i32_0 = arith.constant 0 : i32
    %c0_i32_1 = arith.constant 0 : i32
    return %c0_i32, %c0_i32_0 : i32, i32
  }
  func.func @transform_7(%arg0: i32, %arg1: i32) -> (i32, i32) {
    %c0_i32 = arith.constant 0 : i32
    %c0_i32_0 = arith.constant 0 : i32
    return %arg0, %c0_i32 : i32, i32
  }
}

module attributes {stable_mosaic.version = 11 : i64} {
  func.func @_self_attn_kernel(%arg0: i32, %arg1: i32, %arg2: memref<1x8x32xbf16, #tpu.memory_space<vmem>>, %arg3: memref<32x32xbf16, #tpu.memory_space<vmem>>, %arg4: memref<1x32xf32, #tpu.memory_space<vmem>>, %arg5: memref<32x64xbf16, #tpu.memory_space<vmem>>, %arg6: memref<1x64xf32, #tpu.memory_space<vmem>>, %arg7: memref<32x32xbf16, #tpu.memory_space<vmem>>, %arg8: memref<1x32xf32, #tpu.memory_space<vmem>>, %arg9: memref<1x32xf32, #tpu.memory_space<vmem>>, %arg10: memref<1x32xf32, #tpu.memory_space<vmem>>, %arg11: memref<1x8x32xbf16, #tpu.memory_space<vmem>>, %arg12: memref<8x32xf32, #tpu.memory_space<vmem>>) attributes {dimension_semantics = [#tpu.dimension_semantics<parallel>, #tpu.dimension_semantics<parallel>], iteration_bounds = array<i64: 2, 1>, scalar_prefetch = 0 : i64, scratch_operands = 1 : i64, tpu.core_type = #tpu.core_type<tc>, window_params = [{transform_indices = @transform_0, window_bounds = array<i64: 1, 8, 32>}, {pipeline_mode = #tpu.pipeline_mode<synchronous>, transform_indices = @transform_1, window_bounds = array<i64: 32, 32>}, {pipeline_mode = #tpu.pipeline_mode<synchronous>, transform_indices = @transform_2, window_bounds = array<i64: 1, 32>}, {pipeline_mode = #tpu.pipeline_mode<synchronous>, transform_indices = @transform_3, window_bounds = array<i64: 32, 64>}, {pipeline_mode = #tpu.pipeline_mode<synchronous>, transform_indices = @transform_4, window_bounds = array<i64: 1, 64>}, {pipeline_mode = #tpu.pipeline_mode<synchronous>, transform_indices = @transform_5, window_bounds = array<i64: 32, 32>}, {pipeline_mode = #tpu.pipeline_mode<synchronous>, transform_indices = @transform_6, window_bounds = array<i64: 1, 32>}, {pipeline_mode = #tpu.pipeline_mode<synchronous>, transform_indices = @transform_7, window_bounds = array<i64: 1, 32>}, {pipeline_mode = #tpu.pipeline_mode<synchronous>, transform_indices = @transform_8, window_bounds = array<i64: 1, 32>}, {transform_indices = @transform_9, window_bounds = array<i64: 1, 8, 32>}]} {
    %c0 = arith.constant 0 : index
    %c0_0 = arith.constant 0 : index
    %c0_1 = arith.constant 0 : index
    %0 = vector.load %arg2[%c0, %c0_0, %c0_1] : memref<1x8x32xbf16, #tpu.memory_space<vmem>>, vector<1x8x32xbf16>
    %1 = vector.shape_cast %0 : vector<1x8x32xbf16> to vector<8x32xbf16>
    %c0_2 = arith.constant 0 : index
    %c0_3 = arith.constant 0 : index
    %2 = vector.load %arg3[%c0_2, %c0_3] : memref<32x32xbf16, #tpu.memory_space<vmem>>, vector<32x32xbf16>
    %cst = arith.constant dense<0.000000e+00> : vector<8x32xf32>
    %3 = tpu.matmul %1, %2, %cst {dimension_numbers = #tpu.dot_dimension_numbers<[1], [0], [0], [1], [0, 0, 1, 1], [], []>} : vector<8x32xbf16>, vector<32x32xbf16>, vector<8x32xf32> -> vector<8x32xf32>
    %c0_4 = arith.constant 0 : index
    %c0_5 = arith.constant 0 : index
    %4 = vector.load %arg4[%c0_4, %c0_5] : memref<1x32xf32, #tpu.memory_space<vmem>>, vector<1x32xf32>
    %5 = vector.broadcast %4 : vector<1x32xf32> to vector<8x32xf32>
    %6 = arith.addf %3, %5 : vector<8x32xf32>
    %c0_6 = arith.constant 0 : index
    %c0_7 = arith.constant 0 : index
    %7 = vector.load %arg5[%c0_6, %c0_7] : memref<32x64xbf16, #tpu.memory_space<vmem>>, vector<32x64xbf16>
    %cst_8 = arith.constant dense<0.000000e+00> : vector<8x64xf32>
    %8 = tpu.matmul %1, %7, %cst_8 {dimension_numbers = #tpu.dot_dimension_numbers<[1], [0], [0], [1], [0, 0, 1, 1], [], []>} : vector<8x32xbf16>, vector<32x64xbf16>, vector<8x64xf32> -> vector<8x64xf32>
    %c0_9 = arith.constant 0 : index
    %c0_10 = arith.constant 0 : index
    %9 = vector.load %arg6[%c0_9, %c0_10] : memref<1x64xf32, #tpu.memory_space<vmem>>, vector<1x64xf32>
    %10 = vector.broadcast %9 : vector<1x64xf32> to vector<8x64xf32>
    %11 = arith.addf %8, %10 : vector<8x64xf32>
    %12 = arith.truncf %6 : vector<8x32xf32> to vector<8x32xbf16>
    %13 = vector.extract_strided_slice %11 {offsets = [0, 0], sizes = [8, 32], strides = [1, 1]} : vector<8x64xf32> to vector<8x32xf32>
    %14 = arith.truncf %13 : vector<8x32xf32> to vector<8x32xbf16>
    %15 = vector.extract_strided_slice %11 {offsets = [0, 32], sizes = [8, 32], strides = [1, 1]} : vector<8x64xf32> to vector<8x32xf32>
    %16 = arith.truncf %15 : vector<8x32xf32> to vector<8x32xbf16>
    %c8_i32 = arith.constant 8 : i32
    %17 = arith.muli %arg1, %c8_i32 : i32
    %18 = tpu.iota {dimensions = array<i32: 0>} : vector<8x8xi32>
    %19 = vector.broadcast %17 : i32 to vector<8x8xi32>
    %20 = arith.addi %19, %18 : vector<8x8xi32>
    %21 = tpu.iota {dimensions = array<i32: 1>} : vector<8x8xi32>
    %22 = arith.cmpi sle, %21, %20 : vector<8x8xi32>
    %23 = vector.extract_strided_slice %12 {offsets = [0, 0], sizes = [8, 8], strides = [1, 1]} : vector<8x32xbf16> to vector<8x8xbf16>
    %24 = vector.extract_strided_slice %14 {offsets = [0, 0], sizes = [8, 8], strides = [1, 1]} : vector<8x32xbf16> to vector<8x8xbf16>
    %25 = vector.extract_strided_slice %16 {offsets = [0, 0], sizes = [8, 8], strides = [1, 1]} : vector<8x32xbf16> to vector<8x8xbf16>
    %cst_11 = arith.constant dense<0.000000e+00> : vector<8x8xf32>
    %26 = tpu.matmul %23, %24, %cst_11 {dimension_numbers = #tpu.dot_dimension_numbers<[1], [1], [0], [0], [0, 0, 1, 0], [], []>} : vector<8x8xbf16>, vector<8x8xbf16>, vector<8x8xf32> -> vector<8x8xf32>
    %cst_12 = arith.constant 0.353553385 : f32
    %27 = vector.broadcast %cst_12 : f32 to vector<8x8xf32>
    %28 = arith.mulf %26, %27 : vector<8x8xf32>
    %cst_13 = arith.constant -1.000000e+30 : f32
    %29 = vector.broadcast %cst_13 : f32 to vector<8x8xf32>
    %30 = arith.select %22, %28, %29 : vector<8x8xi1>, vector<8x8xf32>
    %cst_14 = arith.constant dense<0xFF800000> : vector<8xf32>
    %31 = vector.multi_reduction <maximumf>, %30, %cst_14 [1] : vector<8x8xf32> to vector<8xf32>
    %32 = vector.shape_cast %31 : vector<8xf32> to vector<8x1xf32>
    %33 = vector.broadcast %32 : vector<8x1xf32> to vector<8x8xf32>
    %34 = arith.subf %30, %33 : vector<8x8xf32>
    %35 = math.exp %34 : vector<8x8xf32>
    %cst_15 = arith.constant dense<0.000000e+00> : vector<8xf32>
    %36 = vector.multi_reduction <add>, %35, %cst_15 [1] : vector<8x8xf32> to vector<8xf32>
    %37 = vector.shape_cast %36 : vector<8xf32> to vector<8x1xf32>
    %38 = tpu.reciprocal %37 {approx = true} : vector<8x1xf32> -> vector<8x1xf32>
    %39 = vector.broadcast %38 : vector<8x1xf32> to vector<8x8xf32>
    %40 = arith.mulf %35, %39 : vector<8x8xf32>
    %41 = arith.truncf %40 : vector<8x8xf32> to vector<8x8xbf16>
    %cst_16 = arith.constant dense<0.000000e+00> : vector<8x8xf32>
    %42 = tpu.matmul %41, %25, %cst_16 {dimension_numbers = #tpu.dot_dimension_numbers<[1], [0], [0], [1], [0, 0, 1, 1], [], []>} : vector<8x8xbf16>, vector<8x8xbf16>, vector<8x8xf32> -> vector<8x8xf32>
    %c0_17 = arith.constant 0 : index
    %c0_18 = arith.constant 0 : index
    %43 = vector.load %arg12[%c0_17, %c0_18] : memref<8x32xf32, #tpu.memory_space<vmem>>, vector<8x8xf32>
    tpu.vector_store %arg12[%c0_17, %c0_18], %42 {strides = array<i32>} : memref<8x32xf32, #tpu.memory_space<vmem>>, vector<8x8xf32>,
    %44 = vector.extract_strided_slice %12 {offsets = [0, 8], sizes = [8, 8], strides = [1, 1]} : vector<8x32xbf16> to vector<8x8xbf16>
    %45 = vector.extract_strided_slice %14 {offsets = [0, 8], sizes = [8, 8], strides = [1, 1]} : vector<8x32xbf16> to vector<8x8xbf16>
    %46 = vector.extract_strided_slice %16 {offsets = [0, 8], sizes = [8, 8], strides = [1, 1]} : vector<8x32xbf16> to vector<8x8xbf16>
    %cst_19 = arith.constant dense<0.000000e+00> : vector<8x8xf32>
    %47 = tpu.matmul %44, %45, %cst_19 {dimension_numbers = #tpu.dot_dimension_numbers<[1], [1], [0], [0], [0, 0, 1, 0], [], []>} : vector<8x8xbf16>, vector<8x8xbf16>, vector<8x8xf32> -> vector<8x8xf32>
    %cst_20 = arith.constant 0.353553385 : f32
    %48 = vector.broadcast %cst_20 : f32 to vector<8x8xf32>
    %49 = arith.mulf %47, %48 : vector<8x8xf32>
    %cst_21 = arith.constant -1.000000e+30 : f32
    %50 = vector.broadcast %cst_21 : f32 to vector<8x8xf32>
    %51 = arith.select %22, %49, %50 : vector<8x8xi1>, vector<8x8xf32>
    %cst_22 = arith.constant dense<0xFF800000> : vector<8xf32>
    %52 = vector.multi_reduction <maximumf>, %51, %cst_22 [1] : vector<8x8xf32> to vector<8xf32>
    %53 = vector.shape_cast %52 : vector<8xf32> to vector<8x1xf32>
    %54 = vector.broadcast %53 : vector<8x1xf32> to vector<8x8xf32>
    %55 = arith.subf %51, %54 : vector<8x8xf32>
    %56 = math.exp %55 : vector<8x8xf32>
    %cst_23 = arith.constant dense<0.000000e+00> : vector<8xf32>
    %57 = vector.multi_reduction <add>, %56, %cst_23 [1] : vector<8x8xf32> to vector<8xf32>
    %58 = vector.shape_cast %57 : vector<8xf32> to vector<8x1xf32>
    %59 = tpu.reciprocal %58 {approx = true} : vector<8x1xf32> -> vector<8x1xf32>
    %60 = vector.broadcast %59 : vector<8x1xf32> to vector<8x8xf32>
    %61 = arith.mulf %56, %60 : vector<8x8xf32>
    %62 = arith.truncf %61 : vector<8x8xf32> to vector<8x8xbf16>
    %cst_24 = arith.constant dense<0.000000e+00> : vector<8x8xf32>
    %63 = tpu.matmul %62, %46, %cst_24 {dimension_numbers = #tpu.dot_dimension_numbers<[1], [0], [0], [1], [0, 0, 1, 1], [], []>} : vector<8x8xbf16>, vector<8x8xbf16>, vector<8x8xf32> -> vector<8x8xf32>
    %c0_25 = arith.constant 0 : index
    %c8 = arith.constant 8 : index
    %64 = vector.load %arg12[%c0_25, %c8] : memref<8x32xf32, #tpu.memory_space<vmem>>, vector<8x8xf32>
    tpu.vector_store %arg12[%c0_25, %c8], %63 {strides = array<i32>} : memref<8x32xf32, #tpu.memory_space<vmem>>, vector<8x8xf32>,
    %65 = vector.extract_strided_slice %12 {offsets = [0, 16], sizes = [8, 8], strides = [1, 1]} : vector<8x32xbf16> to vector<8x8xbf16>
    %66 = vector.extract_strided_slice %14 {offsets = [0, 16], sizes = [8, 8], strides = [1, 1]} : vector<8x32xbf16> to vector<8x8xbf16>
    %67 = vector.extract_strided_slice %16 {offsets = [0, 16], sizes = [8, 8], strides = [1, 1]} : vector<8x32xbf16> to vector<8x8xbf16>
    %cst_26 = arith.constant dense<0.000000e+00> : vector<8x8xf32>
    %68 = tpu.matmul %65, %66, %cst_26 {dimension_numbers = #tpu.dot_dimension_numbers<[1], [1], [0], [0], [0, 0, 1, 0], [], []>} : vector<8x8xbf16>, vector<8x8xbf16>, vector<8x8xf32> -> vector<8x8xf32>
    %cst_27 = arith.constant 0.353553385 : f32
    %69 = vector.broadcast %cst_27 : f32 to vector<8x8xf32>
    %70 = arith.mulf %68, %69 : vector<8x8xf32>
    %cst_28 = arith.constant -1.000000e+30 : f32
    %71 = vector.broadcast %cst_28 : f32 to vector<8x8xf32>
    %72 = arith.select %22, %70, %71 : vector<8x8xi1>, vector<8x8xf32>
    %cst_29 = arith.constant dense<0xFF800000> : vector<8xf32>
    %73 = vector.multi_reduction <maximumf>, %72, %cst_29 [1] : vector<8x8xf32> to vector<8xf32>
    %74 = vector.shape_cast %73 : vector<8xf32> to vector<8x1xf32>
    %75 = vector.broadcast %74 : vector<8x1xf32> to vector<8x8xf32>
    %76 = arith.subf %72, %75 : vector<8x8xf32>
    %77 = math.exp %76 : vector<8x8xf32>
    %cst_30 = arith.constant dense<0.000000e+00> : vector<8xf32>
    %78 = vector.multi_reduction <add>, %77, %cst_30 [1] : vector<8x8xf32> to vector<8xf32>
    %79 = vector.shape_cast %78 : vector<8xf32> to vector<8x1xf32>
    %80 = tpu.reciprocal %79 {approx = true} : vector<8x1xf32> -> vector<8x1xf32>
    %81 = vector.broadcast %80 : vector<8x1xf32> to vector<8x8xf32>
    %82 = arith.mulf %77, %81 : vector<8x8xf32>
    %83 = arith.truncf %82 : vector<8x8xf32> to vector<8x8xbf16>
    %cst_31 = arith.constant dense<0.000000e+00> : vector<8x8xf32>
    %84 = tpu.matmul %83, %67, %cst_31 {dimension_numbers = #tpu.dot_dimension_numbers<[1], [0], [0], [1], [0, 0, 1, 1], [], []>} : vector<8x8xbf16>, vector<8x8xbf16>, vector<8x8xf32> -> vector<8x8xf32>
    %c0_32 = arith.constant 0 : index
    %c16 = arith.constant 16 : index
    %85 = vector.load %arg12[%c0_32, %c16] : memref<8x32xf32, #tpu.memory_space<vmem>>, vector<8x8xf32>
    tpu.vector_store %arg12[%c0_32, %c16], %84 {strides = array<i32>} : memref<8x32xf32, #tpu.memory_space<vmem>>, vector<8x8xf32>,
    %86 = vector.extract_strided_slice %12 {offsets = [0, 24], sizes = [8, 8], strides = [1, 1]} : vector<8x32xbf16> to vector<8x8xbf16>
    %87 = vector.extract_strided_slice %14 {offsets = [0, 24], sizes = [8, 8], strides = [1, 1]} : vector<8x32xbf16> to vector<8x8xbf16>
    %88 = vector.extract_strided_slice %16 {offsets = [0, 24], sizes = [8, 8], strides = [1, 1]} : vector<8x32xbf16> to vector<8x8xbf16>
    %cst_33 = arith.constant dense<0.000000e+00> : vector<8x8xf32>
    %89 = tpu.matmul %86, %87, %cst_33 {dimension_numbers = #tpu.dot_dimension_numbers<[1], [1], [0], [0], [0, 0, 1, 0], [], []>} : vector<8x8xbf16>, vector<8x8xbf16>, vector<8x8xf32> -> vector<8x8xf32>
    %cst_34 = arith.constant 0.353553385 : f32
    %90 = vector.broadcast %cst_34 : f32 to vector<8x8xf32>
    %91 = arith.mulf %89, %90 : vector<8x8xf32>
    %cst_35 = arith.constant -1.000000e+30 : f32
    %92 = vector.broadcast %cst_35 : f32 to vector<8x8xf32>
    %93 = arith.select %22, %91, %92 : vector<8x8xi1>, vector<8x8xf32>
    %cst_36 = arith.constant dense<0xFF800000> : vector<8xf32>
    %94 = vector.multi_reduction <maximumf>, %93, %cst_36 [1] : vector<8x8xf32> to vector<8xf32>
    %95 = vector.shape_cast %94 : vector<8xf32> to vector<8x1xf32>
    %96 = vector.broadcast %95 : vector<8x1xf32> to vector<8x8xf32>
    %97 = arith.subf %93, %96 : vector<8x8xf32>
    %98 = math.exp %97 : vector<8x8xf32>
    %cst_37 = arith.constant dense<0.000000e+00> : vector<8xf32>
    %99 = vector.multi_reduction <add>, %98, %cst_37 [1] : vector<8x8xf32> to vector<8xf32>
    %100 = vector.shape_cast %99 : vector<8xf32> to vector<8x1xf32>
    %101 = tpu.reciprocal %100 {approx = true} : vector<8x1xf32> -> vector<8x1xf32>
    %102 = vector.broadcast %101 : vector<8x1xf32> to vector<8x8xf32>
    %103 = arith.mulf %98, %102 : vector<8x8xf32>
    %104 = arith.truncf %103 : vector<8x8xf32> to vector<8x8xbf16>
    %cst_38 = arith.constant dense<0.000000e+00> : vector<8x8xf32>
    %105 = tpu.matmul %104, %88, %cst_38 {dimension_numbers = #tpu.dot_dimension_numbers<[1], [0], [0], [1], [0, 0, 1, 1], [], []>} : vector<8x8xbf16>, vector<8x8xbf16>, vector<8x8xf32> -> vector<8x8xf32>
    %c0_39 = arith.constant 0 : index
    %c24 = arith.constant 24 : index
    %106 = vector.load %arg12[%c0_39, %c24] : memref<8x32xf32, #tpu.memory_space<vmem>>, vector<8x8xf32>
    tpu.vector_store %arg12[%c0_39, %c24], %105 {strides = array<i32>} : memref<8x32xf32, #tpu.memory_space<vmem>>, vector<8x8xf32>,
    %c0_40 = arith.constant 0 : index
    %c0_41 = arith.constant 0 : index
    %107 = vector.load %arg12[%c0_40, %c0_41] : memref<8x32xf32, #tpu.memory_space<vmem>>, vector<8x32xf32>
    %108 = arith.truncf %107 : vector<8x32xf32> to vector<8x32xbf16>
    %c0_42 = arith.constant 0 : index
    %c0_43 = arith.constant 0 : index
    %109 = vector.load %arg7[%c0_42, %c0_43] : memref<32x32xbf16, #tpu.memory_space<vmem>>, vector<32x32xbf16>
    %cst_44 = arith.constant dense<0.000000e+00> : vector<8x32xf32>
    %110 = tpu.matmul %108, %109, %cst_44 {dimension_numbers = #tpu.dot_dimension_numbers<[1], [0], [0], [1], [0, 0, 1, 1], [], []>} : vector<8x32xbf16>, vector<32x32xbf16>, vector<8x32xf32> -> vector<8x32xf32>
    %c0_45 = arith.constant 0 : index
    %c0_46 = arith.constant 0 : index
    %111 = vector.load %arg8[%c0_45, %c0_46] : memref<1x32xf32, #tpu.memory_space<vmem>>, vector<1x32xf32>
    %112 = vector.broadcast %111 : vector<1x32xf32> to vector<8x32xf32>
    %113 = arith.addf %110, %112 : vector<8x32xf32>
    %114 = arith.extf %1 : vector<8x32xbf16> to vector<8x32xf32>
    %115 = arith.addf %114, %113 : vector<8x32xf32>
    %c0_47 = arith.constant 0 : index
    %c0_48 = arith.constant 0 : index
    %116 = vector.load %arg9[%c0_47, %c0_48] : memref<1x32xf32, #tpu.memory_space<vmem>>, vector<1x32xf32>
    %c0_49 = arith.constant 0 : index
    %c0_50 = arith.constant 0 : index
    %117 = vector.load %arg10[%c0_49, %c0_50] : memref<1x32xf32, #tpu.memory_space<vmem>>, vector<1x32xf32>
    %cst_51 = arith.constant dense<0.000000e+00> : vector<8xf32>
    %118 = vector.multi_reduction <add>, %115, %cst_51 [1] : vector<8x32xf32> to vector<8xf32>
    %119 = vector.shape_cast %118 : vector<8xf32> to vector<8x1xf32>
    %cst_52 = arith.constant 3.200000e+01 : f32
    %120 = vector.broadcast %cst_52 : f32 to vector<8x1xf32>
    %121 = arith.divf %119, %120 : vector<8x1xf32>
    %122 = vector.broadcast %121 : vector<8x1xf32> to vector<8x32xf32>
    %123 = arith.subf %115, %122 : vector<8x32xf32>
    %124 = arith.mulf %123, %123 : vector<8x32xf32>
    %cst_53 = arith.constant dense<0.000000e+00> : vector<8xf32>
    %125 = vector.multi_reduction <add>, %124, %cst_53 [1] : vector<8x32xf32> to vector<8xf32>
    %126 = vector.shape_cast %125 : vector<8xf32> to vector<8x1xf32>
    %cst_54 = arith.constant 3.200000e+01 : f32
    %127 = vector.broadcast %cst_54 : f32 to vector<8x1xf32>
    %128 = arith.divf %126, %127 : vector<8x1xf32>
    %129 = vector.broadcast %121 : vector<8x1xf32> to vector<8x32xf32>
    %130 = arith.subf %115, %129 : vector<8x32xf32>
    %cst_55 = arith.constant 9.99999974E-6 : f32
    %131 = vector.broadcast %cst_55 : f32 to vector<8x1xf32>
    %132 = arith.addf %128, %131 : vector<8x1xf32>
    %133 = math.rsqrt %132 : vector<8x1xf32>
    %134 = vector.broadcast %133 : vector<8x1xf32> to vector<8x32xf32>
    %135 = arith.mulf %130, %134 : vector<8x32xf32>
    %136 = vector.broadcast %116 : vector<1x32xf32> to vector<8x32xf32>
    %137 = arith.mulf %135, %136 : vector<8x32xf32>
    %138 = vector.broadcast %117 : vector<1x32xf32> to vector<8x32xf32>
    %139 = arith.addf %137, %138 : vector<8x32xf32>
    %140 = arith.truncf %139 : vector<8x32xf32> to vector<8x32xbf16>
    %c0_56 = arith.constant 0 : index
    %c0_57 = arith.constant 0 : index
    %c0_58 = arith.constant 0 : index
    %141 = vector.load %arg11[%c0_56, %c0_57, %c0_58] : memref<1x8x32xbf16, #tpu.memory_space<vmem>>, vector<1x8x32xbf16>
    %142 = vector.shape_cast %141 : vector<1x8x32xbf16> to vector<8x32xbf16>
    %143 = vector.shape_cast %140 : vector<8x32xbf16> to vector<1x8x32xbf16>
    tpu.vector_store %arg11[%c0_56, %c0_57, %c0_58], %143 {strides = array<i32>} : memref<1x8x32xbf16, #tpu.memory_space<vmem>>, vector<1x8x32xbf16>,
    return
  }
  func.func @transform_0(%arg0: i32, %arg1: i32) -> (i32, i32, i32) {
    %c0_i32 = arith.constant 0 : i32
    %c0_i32_0 = arith.constant 0 : i32
    %c0_i32_1 = arith.constant 0 : i32
    return %arg0, %c0_i32, %c0_i32_0 : i32, i32, i32
  }
  func.func @transform_1(%arg0: i32, %arg1: i32) -> (i32, i32) {
    %c0_i32 = arith.constant 0 : i32
    %c0_i32_0 = arith.constant 0 : i32
    %c0_i32_1 = arith.constant 0 : i32
    return %c0_i32, %c0_i32_0 : i32, i32
  }
  func.func @transform_2(%arg0: i32, %arg1: i32) -> (i32, i32) {
    %c0_i32 = arith.constant 0 : i32
    %c0_i32_0 = arith.constant 0 : i32
    %c0_i32_1 = arith.constant 0 : i32
    return %c0_i32, %c0_i32_0 : i32, i32
  }
  func.func @transform_3(%arg0: i32, %arg1: i32) -> (i32, i32) {
    %c0_i32 = arith.constant 0 : i32
    %c0_i32_0 = arith.constant 0 : i32
    %c0_i32_1 = arith.constant 0 : i32
    return %c0_i32, %c0_i32_0 : i32, i32
  }
  func.func @transform_4(%arg0: i32, %arg1: i32) -> (i32, i32) {
    %c0_i32 = arith.constant 0 : i32
    %c0_i32_0 = arith.constant 0 : i32
    %c0_i32_1 = arith.constant 0 : i32
    return %c0_i32, %c0_i32_0 : i32, i32
  }
  func.func @transform_5(%arg0: i32, %arg1: i32) -> (i32, i32) {
    %c0_i32 = arith.constant 0 : i32
    %c0_i32_0 = arith.constant 0 : i32
    %c0_i32_1 = arith.constant 0 : i32
    return %c0_i32, %c0_i32_0 : i32, i32
  }
  func.func @transform_6(%arg0: i32, %arg1: i32) -> (i32, i32) {
    %c0_i32 = arith.constant 0 : i32
    %c0_i32_0 = arith.constant 0 : i32
    %c0_i32_1 = arith.constant 0 : i32
    return %c0_i32, %c0_i32_0 : i32, i32
  }
  func.func @transform_7(%arg0: i32, %arg1: i32) -> (i32, i32) {
    %c0_i32 = arith.constant 0 : i32
    %c0_i32_0 = arith.constant 0 : i32
    %c0_i32_1 = arith.constant 0 : i32
    return %c0_i32, %c0_i32_0 : i32, i32
  }
  func.func @transform_8(%arg0: i32, %arg1: i32) -> (i32, i32) {
    %c0_i32 = arith.constant 0 : i32
    %c0_i32_0 = arith.constant 0 : i32
    %c0_i32_1 = arith.constant 0 : i32
    return %c0_i32, %c0_i32_0 : i32, i32
  }
  func.func @transform_9(%arg0: i32, %arg1: i32) -> (i32, i32, i32) {
    %c0_i32 = arith.constant 0 : i32
    %c0_i32_0 = arith.constant 0 : i32
    return %arg0, %arg1, %c0_i32 : i32, i32, i32
  }
}

module attributes {stable_mosaic.version = 11 : i64} {
  func.func @_attn_kernel(%arg0: i32, %arg1: i32, %arg2: memref<1x8x32xbf16, #tpu.memory_space<vmem>>, %arg3: memref<1x8x32xbf16, #tpu.memory_space<vmem>>, %arg4: memref<32x32xbf16, #tpu.memory_space<vmem>>, %arg5: memref<1x32xf32, #tpu.memory_space<vmem>>, %arg6: memref<32x64xbf16, #tpu.memory_space<vmem>>, %arg7: memref<1x64xf32, #tpu.memory_space<vmem>>, %arg8: memref<32x32xbf16, #tpu.memory_space<vmem>>, %arg9: memref<1x32xf32, #tpu.memory_space<vmem>>, %arg10: memref<1x32xf32, #tpu.memory_space<vmem>>, %arg11: memref<1x32xf32, #tpu.memory_space<vmem>>, %arg12: memref<1x8x32xbf16, #tpu.memory_space<vmem>>, %arg13: memref<8x32xf32, #tpu.memory_space<vmem>>) attributes {dimension_semantics = [#tpu.dimension_semantics<parallel>, #tpu.dimension_semantics<parallel>], iteration_bounds = array<i64: 2, 1>, scalar_prefetch = 0 : i64, scratch_operands = 1 : i64, tpu.core_type = #tpu.core_type<tc>, window_params = [{transform_indices = @transform_0, window_bounds = array<i64: 1, 8, 32>}, {transform_indices = @transform_1, window_bounds = array<i64: 1, 8, 32>}, {pipeline_mode = #tpu.pipeline_mode<synchronous>, transform_indices = @transform_2, window_bounds = array<i64: 32, 32>}, {pipeline_mode = #tpu.pipeline_mode<synchronous>, transform_indices = @transform_3, window_bounds = array<i64: 1, 32>}, {pipeline_mode = #tpu.pipeline_mode<synchronous>, transform_indices = @transform_4, window_bounds = array<i64: 32, 64>}, {pipeline_mode = #tpu.pipeline_mode<synchronous>, transform_indices = @transform_5, window_bounds = array<i64: 1, 64>}, {pipeline_mode = #tpu.pipeline_mode<synchronous>, transform_indices = @transform_6, window_bounds = array<i64: 32, 32>}, {pipeline_mode = #tpu.pipeline_mode<synchronous>, transform_indices = @transform_7, window_bounds = array<i64: 1, 32>}, {pipeline_mode = #tpu.pipeline_mode<synchronous>, transform_indices = @transform_8, window_bounds = array<i64: 1, 32>}, {pipeline_mode = #tpu.pipeline_mode<synchronous>, transform_indices = @transform_9, window_bounds = array<i64: 1, 32>}, {transform_indices = @transform_10, window_bounds = array<i64: 1, 8, 32>}]} {
    %c0 = arith.constant 0 : index
    %c0_0 = arith.constant 0 : index
    %c0_1 = arith.constant 0 : index
    %0 = vector.load %arg2[%c0, %c0_0, %c0_1] : memref<1x8x32xbf16, #tpu.memory_space<vmem>>, vector<1x8x32xbf16>
    %1 = vector.shape_cast %0 : vector<1x8x32xbf16> to vector<8x32xbf16>
    %c0_2 = arith.constant 0 : index
    %c0_3 = arith.constant 0 : index
    %c0_4 = arith.constant 0 : index
    %2 = vector.load %arg3[%c0_2, %c0_3, %c0_4] : memref<1x8x32xbf16, #tpu.memory_space<vmem>>, vector<1x8x32xbf16>
    %3 = vector.shape_cast %2 : vector<1x8x32xbf16> to vector<8x32xbf16>
    %c0_5 = arith.constant 0 : index
    %c0_6 = arith.constant 0 : index
    %4 = vector.load %arg4[%c0_5, %c0_6] : memref<32x32xbf16, #tpu.memory_space<vmem>>, vector<32x32xbf16>
    %cst = arith.constant dense<0.000000e+00> : vector<8x32xf32>
    %5 = tpu.matmul %1, %4, %cst {dimension_numbers = #tpu.dot_dimension_numbers<[1], [0], [0], [1], [0, 0, 1, 1], [], []>} : vector<8x32xbf16>, vector<32x32xbf16>, vector<8x32xf32> -> vector<8x32xf32>
    %c0_7 = arith.constant 0 : index
    %c0_8 = arith.constant 0 : index
    %6 = vector.load %arg5[%c0_7, %c0_8] : memref<1x32xf32, #tpu.memory_space<vmem>>, vector<1x32xf32>
    %7 = vector.broadcast %6 : vector<1x32xf32> to vector<8x32xf32>
    %8 = arith.addf %5, %7 : vector<8x32xf32>
    %c0_9 = arith.constant 0 : index
    %c0_10 = arith.constant 0 : index
    %9 = vector.load %arg6[%c0_9, %c0_10] : memref<32x64xbf16, #tpu.memory_space<vmem>>, vector<32x64xbf16>
    %cst_11 = arith.constant dense<0.000000e+00> : vector<8x64xf32>
    %10 = tpu.matmul %3, %9, %cst_11 {dimension_numbers = #tpu.dot_dimension_numbers<[1], [0], [0], [1], [0, 0, 1, 1], [], []>} : vector<8x32xbf16>, vector<32x64xbf16>, vector<8x64xf32> -> vector<8x64xf32>
    %c0_12 = arith.constant 0 : index
    %c0_13 = arith.constant 0 : index
    %11 = vector.load %arg7[%c0_12, %c0_13] : memref<1x64xf32, #tpu.memory_space<vmem>>, vector<1x64xf32>
    %12 = vector.broadcast %11 : vector<1x64xf32> to vector<8x64xf32>
    %13 = arith.addf %10, %12 : vector<8x64xf32>
    %14 = arith.truncf %8 : vector<8x32xf32> to vector<8x32xbf16>
    %15 = vector.extract_strided_slice %13 {offsets = [0, 0], sizes = [8, 32], strides = [1, 1]} : vector<8x64xf32> to vector<8x32xf32>
    %16 = arith.truncf %15 : vector<8x32xf32> to vector<8x32xbf16>
    %17 = vector.extract_strided_slice %13 {offsets = [0, 32], sizes = [8, 32], strides = [1, 1]} : vector<8x64xf32> to vector<8x32xf32>
    %18 = arith.truncf %17 : vector<8x32xf32> to vector<8x32xbf16>
    %19 = vector.extract_strided_slice %14 {offsets = [0, 0], sizes = [8, 8], strides = [1, 1]} : vector<8x32xbf16> to vector<8x8xbf16>
    %20 = vector.extract_strided_slice %16 {offsets = [0, 0], sizes = [8, 8], strides = [1, 1]} : vector<8x32xbf16> to vector<8x8xbf16>
    %21 = vector.extract_strided_slice %18 {offsets = [0, 0], sizes = [8, 8], strides = [1, 1]} : vector<8x32xbf16> to vector<8x8xbf16>
    %cst_14 = arith.constant dense<0.000000e+00> : vector<8x8xf32>
    %22 = tpu.matmul %19, %20, %cst_14 {dimension_numbers = #tpu.dot_dimension_numbers<[1], [1], [0], [0], [0, 0, 1, 0], [], []>} : vector<8x8xbf16>, vector<8x8xbf16>, vector<8x8xf32> -> vector<8x8xf32>
    %cst_15 = arith.constant 0.353553385 : f32
    %23 = vector.broadcast %cst_15 : f32 to vector<8x8xf32>
    %24 = arith.mulf %22, %23 : vector<8x8xf32>
    %cst_16 = arith.constant dense<0xFF800000> : vector<8xf32>
    %25 = vector.multi_reduction <maximumf>, %24, %cst_16 [1] : vector<8x8xf32> to vector<8xf32>
    %26 = vector.shape_cast %25 : vector<8xf32> to vector<8x1xf32>
    %27 = vector.broadcast %26 : vector<8x1xf32> to vector<8x8xf32>
    %28 = arith.subf %24, %27 : vector<8x8xf32>
    %29 = math.exp %28 : vector<8x8xf32>
    %cst_17 = arith.constant dense<0.000000e+00> : vector<8xf32>
    %30 = vector.multi_reduction <add>, %29, %cst_17 [1] : vector<8x8xf32> to vector<8xf32>
    %31 = vector.shape_cast %30 : vector<8xf32> to vector<8x1xf32>
    %32 = tpu.reciprocal %31 {approx = true} : vector<8x1xf32> -> vector<8x1xf32>
    %33 = vector.broadcast %32 : vector<8x1xf32> to vector<8x8xf32>
    %34 = arith.mulf %29, %33 : vector<8x8xf32>
    %35 = arith.truncf %34 : vector<8x8xf32> to vector<8x8xbf16>
    %cst_18 = arith.constant dense<0.000000e+00> : vector<8x8xf32>
    %36 = tpu.matmul %35, %21, %cst_18 {dimension_numbers = #tpu.dot_dimension_numbers<[1], [0], [0], [1], [0, 0, 1, 1], [], []>} : vector<8x8xbf16>, vector<8x8xbf16>, vector<8x8xf32> -> vector<8x8xf32>
    %c0_19 = arith.constant 0 : index
    %c0_20 = arith.constant 0 : index
    %37 = vector.load %arg13[%c0_19, %c0_20] : memref<8x32xf32, #tpu.memory_space<vmem>>, vector<8x8xf32>
    tpu.vector_store %arg13[%c0_19, %c0_20], %36 {strides = array<i32>} : memref<8x32xf32, #tpu.memory_space<vmem>>, vector<8x8xf32>,
    %38 = vector.extract_strided_slice %14 {offsets = [0, 8], sizes = [8, 8], strides = [1, 1]} : vector<8x32xbf16> to vector<8x8xbf16>
    %39 = vector.extract_strided_slice %16 {offsets = [0, 8], sizes = [8, 8], strides = [1, 1]} : vector<8x32xbf16> to vector<8x8xbf16>
    %40 = vector.extract_strided_slice %18 {offsets = [0, 8], sizes = [8, 8], strides = [1, 1]} : vector<8x32xbf16> to vector<8x8xbf16>
    %cst_21 = arith.constant dense<0.000000e+00> : vector<8x8xf32>
    %41 = tpu.matmul %38, %39, %cst_21 {dimension_numbers = #tpu.dot_dimension_numbers<[1], [1], [0], [0], [0, 0, 1, 0], [], []>} : vector<8x8xbf16>, vector<8x8xbf16>, vector<8x8xf32> -> vector<8x8xf32>
    %cst_22 = arith.constant 0.353553385 : f32
    %42 = vector.broadcast %cst_22 : f32 to vector<8x8xf32>
    %43 = arith.mulf %41, %42 : vector<8x8xf32>
    %cst_23 = arith.constant dense<0xFF800000> : vector<8xf32>
    %44 = vector.multi_reduction <maximumf>, %43, %cst_23 [1] : vector<8x8xf32> to vector<8xf32>
    %45 = vector.shape_cast %44 : vector<8xf32> to vector<8x1xf32>
    %46 = vector.broadcast %45 : vector<8x1xf32> to vector<8x8xf32>
    %47 = arith.subf %43, %46 : vector<8x8xf32>
    %48 = math.exp %47 : vector<8x8xf32>
    %cst_24 = arith.constant dense<0.000000e+00> : vector<8xf32>
    %49 = vector.multi_reduction <add>, %48, %cst_24 [1] : vector<8x8xf32> to vector<8xf32>
    %50 = vector.shape_cast %49 : vector<8xf32> to vector<8x1xf32>
    %51 = tpu.reciprocal %50 {approx = true} : vector<8x1xf32> -> vector<8x1xf32>
    %52 = vector.broadcast %51 : vector<8x1xf32> to vector<8x8xf32>
    %53 = arith.mulf %48, %52 : vector<8x8xf32>
    %54 = arith.truncf %53 : vector<8x8xf32> to vector<8x8xbf16>
    %cst_25 = arith.constant dense<0.000000e+00> : vector<8x8xf32>
    %55 = tpu.matmul %54, %40, %cst_25 {dimension_numbers = #tpu.dot_dimension_numbers<[1], [0], [0], [1], [0, 0, 1, 1], [], []>} : vector<8x8xbf16>, vector<8x8xbf16>, vector<8x8xf32> -> vector<8x8xf32>
    %c0_26 = arith.constant 0 : index
    %c8 = arith.constant 8 : index
    %56 = vector.load %arg13[%c0_26, %c8] : memref<8x32xf32, #tpu.memory_space<vmem>>, vector<8x8xf32>
    tpu.vector_store %arg13[%c0_26, %c8], %55 {strides = array<i32>} : memref<8x32xf32, #tpu.memory_space<vmem>>, vector<8x8xf32>,
    %57 = vector.extract_strided_slice %14 {offsets = [0, 16], sizes = [8, 8], strides = [1, 1]} : vector<8x32xbf16> to vector<8x8xbf16>
    %58 = vector.extract_strided_slice %16 {offsets = [0, 16], sizes = [8, 8], strides = [1, 1]} : vector<8x32xbf16> to vector<8x8xbf16>
    %59 = vector.extract_strided_slice %18 {offsets = [0, 16], sizes = [8, 8], strides = [1, 1]} : vector<8x32xbf16> to vector<8x8xbf16>
    %cst_27 = arith.constant dense<0.000000e+00> : vector<8x8xf32>
    %60 = tpu.matmul %57, %58, %cst_27 {dimension_numbers = #tpu.dot_dimension_numbers<[1], [1], [0], [0], [0, 0, 1, 0], [], []>} : vector<8x8xbf16>, vector<8x8xbf16>, vector<8x8xf32> -> vector<8x8xf32>
    %cst_28 = arith.constant 0.353553385 : f32
    %61 = vector.broadcast %cst_28 : f32 to vector<8x8xf32>
    %62 = arith.mulf %60, %61 : vector<8x8xf32>
    %cst_29 = arith.constant dense<0xFF800000> : vector<8xf32>
    %63 = vector.multi_reduction <maximumf>, %62, %cst_29 [1] : vector<8x8xf32> to vector<8xf32>
    %64 = vector.shape_cast %63 : vector<8xf32> to vector<8x1xf32>
    %65 = vector.broadcast %64 : vector<8x1xf32> to vector<8x8xf32>
    %66 = arith.subf %62, %65 : vector<8x8xf32>
    %67 = math.exp %66 : vector<8x8xf32>
    %cst_30 = arith.constant dense<0.000000e+00> : vector<8xf32>
    %68 = vector.multi_reduction <add>, %67, %cst_30 [1] : vector<8x8xf32> to vector<8xf32>
    %69 = vector.shape_cast %68 : vector<8xf32> to vector<8x1xf32>
    %70 = tpu.reciprocal %69 {approx = true} : vector<8x1xf32> -> vector<8x1xf32>
    %71 = vector.broadcast %70 : vector<8x1xf32> to vector<8x8xf32>
    %72 = arith.mulf %67, %71 : vector<8x8xf32>
    %73 = arith.truncf %72 : vector<8x8xf32> to vector<8x8xbf16>
    %cst_31 = arith.constant dense<0.000000e+00> : vector<8x8xf32>
    %74 = tpu.matmul %73, %59, %cst_31 {dimension_numbers = #tpu.dot_dimension_numbers<[1], [0], [0], [1], [0, 0, 1, 1], [], []>} : vector<8x8xbf16>, vector<8x8xbf16>, vector<8x8xf32> -> vector<8x8xf32>
    %c0_32 = arith.constant 0 : index
    %c16 = arith.constant 16 : index
    %75 = vector.load %arg13[%c0_32, %c16] : memref<8x32xf32, #tpu.memory_space<vmem>>, vector<8x8xf32>
    tpu.vector_store %arg13[%c0_32, %c16], %74 {strides = array<i32>} : memref<8x32xf32, #tpu.memory_space<vmem>>, vector<8x8xf32>,
    %76 = vector.extract_strided_slice %14 {offsets = [0, 24], sizes = [8, 8], strides = [1, 1]} : vector<8x32xbf16> to vector<8x8xbf16>
    %77 = vector.extract_strided_slice %16 {offsets = [0, 24], sizes = [8, 8], strides = [1, 1]} : vector<8x32xbf16> to vector<8x8xbf16>
    %78 = vector.extract_strided_slice %18 {offsets = [0, 24], sizes = [8, 8], strides = [1, 1]} : vector<8x32xbf16> to vector<8x8xbf16>
    %cst_33 = arith.constant dense<0.000000e+00> : vector<8x8xf32>
    %79 = tpu.matmul %76, %77, %cst_33 {dimension_numbers = #tpu.dot_dimension_numbers<[1], [1], [0], [0], [0, 0, 1, 0], [], []>} : vector<8x8xbf16>, vector<8x8xbf16>, vector<8x8xf32> -> vector<8x8xf32>
    %cst_34 = arith.constant 0.353553385 : f32
    %80 = vector.broadcast %cst_34 : f32 to vector<8x8xf32>
    %81 = arith.mulf %79, %80 : vector<8x8xf32>
    %cst_35 = arith.constant dense<0xFF800000> : vector<8xf32>
    %82 = vector.multi_reduction <maximumf>, %81, %cst_35 [1] : vector<8x8xf32> to vector<8xf32>
    %83 = vector.shape_cast %82 : vector<8xf32> to vector<8x1xf32>
    %84 = vector.broadcast %83 : vector<8x1xf32> to vector<8x8xf32>
    %85 = arith.subf %81, %84 : vector<8x8xf32>
    %86 = math.exp %85 : vector<8x8xf32>
    %cst_36 = arith.constant dense<0.000000e+00> : vector<8xf32>
    %87 = vector.multi_reduction <add>, %86, %cst_36 [1] : vector<8x8xf32> to vector<8xf32>
    %88 = vector.shape_cast %87 : vector<8xf32> to vector<8x1xf32>
    %89 = tpu.reciprocal %88 {approx = true} : vector<8x1xf32> -> vector<8x1xf32>
    %90 = vector.broadcast %89 : vector<8x1xf32> to vector<8x8xf32>
    %91 = arith.mulf %86, %90 : vector<8x8xf32>
    %92 = arith.truncf %91 : vector<8x8xf32> to vector<8x8xbf16>
    %cst_37 = arith.constant dense<0.000000e+00> : vector<8x8xf32>
    %93 = tpu.matmul %92, %78, %cst_37 {dimension_numbers = #tpu.dot_dimension_numbers<[1], [0], [0], [1], [0, 0, 1, 1], [], []>} : vector<8x8xbf16>, vector<8x8xbf16>, vector<8x8xf32> -> vector<8x8xf32>
    %c0_38 = arith.constant 0 : index
    %c24 = arith.constant 24 : index
    %94 = vector.load %arg13[%c0_38, %c24] : memref<8x32xf32, #tpu.memory_space<vmem>>, vector<8x8xf32>
    tpu.vector_store %arg13[%c0_38, %c24], %93 {strides = array<i32>} : memref<8x32xf32, #tpu.memory_space<vmem>>, vector<8x8xf32>,
    %c0_39 = arith.constant 0 : index
    %c0_40 = arith.constant 0 : index
    %95 = vector.load %arg13[%c0_39, %c0_40] : memref<8x32xf32, #tpu.memory_space<vmem>>, vector<8x32xf32>
    %96 = arith.truncf %95 : vector<8x32xf32> to vector<8x32xbf16>
    %c0_41 = arith.constant 0 : index
    %c0_42 = arith.constant 0 : index
    %97 = vector.load %arg8[%c0_41, %c0_42] : memref<32x32xbf16, #tpu.memory_space<vmem>>, vector<32x32xbf16>
    %cst_43 = arith.constant dense<0.000000e+00> : vector<8x32xf32>
    %98 = tpu.matmul %96, %97, %cst_43 {dimension_numbers = #tpu.dot_dimension_numbers<[1], [0], [0], [1], [0, 0, 1, 1], [], []>} : vector<8x32xbf16>, vector<32x32xbf16>, vector<8x32xf32> -> vector<8x32xf32>
    %c0_44 = arith.constant 0 : index
    %c0_45 = arith.constant 0 : index
    %99 = vector.load %arg9[%c0_44, %c0_45] : memref<1x32xf32, #tpu.memory_space<vmem>>, vector<1x32xf32>
    %100 = vector.broadcast %99 : vector<1x32xf32> to vector<8x32xf32>
    %101 = arith.addf %98, %100 : vector<8x32xf32>
    %102 = arith.extf %1 : vector<8x32xbf16> to vector<8x32xf32>
    %103 = arith.addf %102, %101 : vector<8x32xf32>
    %c0_46 = arith.constant 0 : index
    %c0_47 = arith.constant 0 : index
    %104 = vector.load %arg10[%c0_46, %c0_47] : memref<1x32xf32, #tpu.memory_space<vmem>>, vector<1x32xf32>
    %c0_48 = arith.constant 0 : index
    %c0_49 = arith.constant 0 : index
    %105 = vector.load %arg11[%c0_48, %c0_49] : memref<1x32xf32, #tpu.memory_space<vmem>>, vector<1x32xf32>
    %cst_50 = arith.constant dense<0.000000e+00> : vector<8xf32>
    %106 = vector.multi_reduction <add>, %103, %cst_50 [1] : vector<8x32xf32> to vector<8xf32>
    %107 = vector.shape_cast %106 : vector<8xf32> to vector<8x1xf32>
    %cst_51 = arith.constant 3.200000e+01 : f32
    %108 = vector.broadcast %cst_51 : f32 to vector<8x1xf32>
    %109 = arith.divf %107, %108 : vector<8x1xf32>
    %110 = vector.broadcast %109 : vector<8x1xf32> to vector<8x32xf32>
    %111 = arith.subf %103, %110 : vector<8x32xf32>
    %112 = arith.mulf %111, %111 : vector<8x32xf32>
    %cst_52 = arith.constant dense<0.000000e+00> : vector<8xf32>
    %113 = vector.multi_reduction <add>, %112, %cst_52 [1] : vector<8x32xf32> to vector<8xf32>
    %114 = vector.shape_cast %113 : vector<8xf32> to vector<8x1xf32>
    %cst_53 = arith.constant 3.200000e+01 : f32
    %115 = vector.broadcast %cst_53 : f32 to vector<8x1xf32>
    %116 = arith.divf %114, %115 : vector<8x1xf32>
    %117 = vector.broadcast %109 : vector<8x1xf32> to vector<8x32xf32>
    %118 = arith.subf %103, %117 : vector<8x32xf32>
    %cst_54 = arith.constant 9.99999974E-6 : f32
    %119 = vector.broadcast %cst_54 : f32 to vector<8x1xf32>
    %120 = arith.addf %116, %119 : vector<8x1xf32>
    %121 = math.rsqrt %120 : vector<8x1xf32>
    %122 = vector.broadcast %121 : vector<8x1xf32> to vector<8x32xf32>
    %123 = arith.mulf %118, %122 : vector<8x32xf32>
    %124 = vector.broadcast %104 : vector<1x32xf32> to vector<8x32xf32>
    %125 = arith.mulf %123, %124 : vector<8x32xf32>
    %126 = vector.broadcast %105 : vector<1x32xf32> to vector<8x32xf32>
    %127 = arith.addf %125, %126 : vector<8x32xf32>
    %128 = arith.truncf %127 : vector<8x32xf32> to vector<8x32xbf16>
    %c0_55 = arith.constant 0 : index
    %c0_56 = arith.constant 0 : index
    %c0_57 = arith.constant 0 : index
    %129 = vector.load %arg12[%c0_55, %c0_56, %c0_57] : memref<1x8x32xbf16, #tpu.memory_space<vmem>>, vector<1x8x32xbf16>
    %130 = vector.shape_cast %129 : vector<1x8x32xbf16> to vector<8x32xbf16>
    %131 = vector.shape_cast %128 : vector<8x32xbf16> to vector<1x8x32xbf16>
    tpu.vector_store %arg12[%c0_55, %c0_56, %c0_57], %131 {strides = array<i32>} : memref<1x8x32xbf16, #tpu.memory_space<vmem>>, vector<1x8x32xbf16>,
    return
  }
  func.func @transform_0(%arg0: i32, %arg1: i32) -> (i32, i32, i32) {
    %c0_i32 = arith.constant 0 : i32
    %c0_i32_0 = arith.constant 0 : i32
    return %arg0, %arg1, %c0_i32 : i32, i32, i32
  }
  func.func @transform_1(%arg0: i32, %arg1: i32) -> (i32, i32, i32) {
    %c0_i32 = arith.constant 0 : i32
    %c0_i32_0 = arith.constant 0 : i32
    %c0_i32_1 = arith.constant 0 : i32
    return %arg0, %c0_i32, %c0_i32_0 : i32, i32, i32
  }
  func.func @transform_2(%arg0: i32, %arg1: i32) -> (i32, i32) {
    %c0_i32 = arith.constant 0 : i32
    %c0_i32_0 = arith.constant 0 : i32
    %c0_i32_1 = arith.constant 0 : i32
    return %c0_i32, %c0_i32_0 : i32, i32
  }
  func.func @transform_3(%arg0: i32, %arg1: i32) -> (i32, i32) {
    %c0_i32 = arith.constant 0 : i32
    %c0_i32_0 = arith.constant 0 : i32
    %c0_i32_1 = arith.constant 0 : i32
    return %c0_i32, %c0_i32_0 : i32, i32
  }
  func.func @transform_4(%arg0: i32, %arg1: i32) -> (i32, i32) {
    %c0_i32 = arith.constant 0 : i32
    %c0_i32_0 = arith.constant 0 : i32
    %c0_i32_1 = arith.constant 0 : i32
    return %c0_i32, %c0_i32_0 : i32, i32
  }
  func.func @transform_5(%arg0: i32, %arg1: i32) -> (i32, i32) {
    %c0_i32 = arith.constant 0 : i32
    %c0_i32_0 = arith.constant 0 : i32
    %c0_i32_1 = arith.constant 0 : i32
    return %c0_i32, %c0_i32_0 : i32, i32
  }
  func.func @transform_6(%arg0: i32, %arg1: i32) -> (i32, i32) {
    %c0_i32 = arith.constant 0 : i32
    %c0_i32_0 = arith.constant 0 : i32
    %c0_i32_1 = arith.constant 0 : i32
    return %c0_i32, %c0_i32_0 : i32, i32
  }
  func.func @transform_7(%arg0: i32, %arg1: i32) -> (i32, i32) {
    %c0_i32 = arith.constant 0 : i32
    %c0_i32_0 = arith.constant 0 : i32
    %c0_i32_1 = arith.constant 0 : i32
    return %c0_i32, %c0_i32_0 : i32, i32
  }
  func.func @transform_8(%arg0: i32, %arg1: i32) -> (i32, i32) {
    %c0_i32 = arith.constant 0 : i32
    %c0_i32_0 = arith.constant 0 : i32
    %c0_i32_1 = arith.constant 0 : i32
    return %c0_i32, %c0_i32_0 : i32, i32
  }
  func.func @transform_9(%arg0: i32, %arg1: i32) -> (i32, i32) {
    %c0_i32 = arith.constant 0 : i32
    %c0_i32_0 = arith.constant 0 : i32
    %c0_i32_1 = arith.constant 0 : i32
    return %c0_i32, %c0_i32_0 : i32, i32
  }
  func.func @transform_10(%arg0: i32, %arg1: i32) -> (i32, i32, i32) {
    %c0_i32 = arith.constant 0 : i32
    %c0_i32_0 = arith.constant 0 : i32
    return %arg0, %arg1, %c0_i32 : i32, i32, i32
  }
}

module attributes {stable_mosaic.version = 11 : i64} {
  func.func @_attn_kernel(%arg0: i32, %arg1: i32, %arg2: memref<1x8x32xbf16, #tpu.memory_space<vmem>>, %arg3: memref<1x8x32xbf16, #tpu.memory_space<vmem>>, %arg4: memref<32x32xbf16, #tpu.memory_space<vmem>>, %arg5: memref<1x32xf32, #tpu.memory_space<vmem>>, %arg6: memref<32x64xbf16, #tpu.memory_space<vmem>>, %arg7: memref<1x64xf32, #tpu.memory_space<vmem>>, %arg8: memref<32x32xbf16, #tpu.memory_space<vmem>>, %arg9: memref<1x32xf32, #tpu.memory_space<vmem>>, %arg10: memref<1x32xf32, #tpu.memory_space<vmem>>, %arg11: memref<1x32xf32, #tpu.memory_space<vmem>>, %arg12: memref<1x8x32xbf16, #tpu.memory_space<vmem>>, %arg13: memref<8x32xf32, #tpu.memory_space<vmem>>) attributes {dimension_semantics = [#tpu.dimension_semantics<parallel>, #tpu.dimension_semantics<parallel>], iteration_bounds = array<i64: 2, 1>, scalar_prefetch = 0 : i64, scratch_operands = 1 : i64, tpu.core_type = #tpu.core_type<tc>, window_params = [{transform_indices = @transform_0, window_bounds = array<i64: 1, 8, 32>}, {transform_indices = @transform_1, window_bounds = array<i64: 1, 8, 32>}, {pipeline_mode = #tpu.pipeline_mode<synchronous>, transform_indices = @transform_2, window_bounds = array<i64: 32, 32>}, {pipeline_mode = #tpu.pipeline_mode<synchronous>, transform_indices = @transform_3, window_bounds = array<i64: 1, 32>}, {pipeline_mode = #tpu.pipeline_mode<synchronous>, transform_indices = @transform_4, window_bounds = array<i64: 32, 64>}, {pipeline_mode = #tpu.pipeline_mode<synchronous>, transform_indices = @transform_5, window_bounds = array<i64: 1, 64>}, {pipeline_mode = #tpu.pipeline_mode<synchronous>, transform_indices = @transform_6, window_bounds = array<i64: 32, 32>}, {pipeline_mode = #tpu.pipeline_mode<synchronous>, transform_indices = @transform_7, window_bounds = array<i64: 1, 32>}, {pipeline_mode = #tpu.pipeline_mode<synchronous>, transform_indices = @transform_8, window_bounds = array<i64: 1, 32>}, {pipeline_mode = #tpu.pipeline_mode<synchronous>, transform_indices = @transform_9, window_bounds = array<i64: 1, 32>}, {transform_indices = @transform_10, window_bounds = array<i64: 1, 8, 32>}]} {
    %c0 = arith.constant 0 : index
    %c0_0 = arith.constant 0 : index
    %c0_1 = arith.constant 0 : index
    %0 = vector.load %arg2[%c0, %c0_0, %c0_1] : memref<1x8x32xbf16, #tpu.memory_space<vmem>>, vector<1x8x32xbf16>
    %1 = vector.shape_cast %0 : vector<1x8x32xbf16> to vector<8x32xbf16>
    %c0_2 = arith.constant 0 : index
    %c0_3 = arith.constant 0 : index
    %c0_4 = arith.constant 0 : index
    %2 = vector.load %arg3[%c0_2, %c0_3, %c0_4] : memref<1x8x32xbf16, #tpu.memory_space<vmem>>, vector<1x8x32xbf16>
    %3 = vector.shape_cast %2 : vector<1x8x32xbf16> to vector<8x32xbf16>
    %c0_5 = arith.constant 0 : index
    %c0_6 = arith.constant 0 : index
    %4 = vector.load %arg4[%c0_5, %c0_6] : memref<32x32xbf16, #tpu.memory_space<vmem>>, vector<32x32xbf16>
    %cst = arith.constant dense<0.000000e+00> : vector<8x32xf32>
    %5 = tpu.matmul %1, %4, %cst {dimension_numbers = #tpu.dot_dimension_numbers<[1], [0], [0], [1], [0, 0, 1, 1], [], []>} : vector<8x32xbf16>, vector<32x32xbf16>, vector<8x32xf32> -> vector<8x32xf32>
    %c0_7 = arith.constant 0 : index
    %c0_8 = arith.constant 0 : index
    %6 = vector.load %arg5[%c0_7, %c0_8] : memref<1x32xf32, #tpu.memory_space<vmem>>, vector<1x32xf32>
    %7 = vector.broadcast %6 : vector<1x32xf32> to vector<8x32xf32>
    %8 = arith.addf %5, %7 : vector<8x32xf32>
    %c0_9 = arith.constant 0 : index
    %c0_10 = arith.constant 0 : index
    %9 = vector.load %arg6[%c0_9, %c0_10] : memref<32x64xbf16, #tpu.memory_space<vmem>>, vector<32x64xbf16>
    %cst_11 = arith.constant dense<0.000000e+00> : vector<8x64xf32>
    %10 = tpu.matmul %3, %9, %cst_11 {dimension_numbers = #tpu.dot_dimension_numbers<[1], [0], [0], [1], [0, 0, 1, 1], [], []>} : vector<8x32xbf16>, vector<32x64xbf16>, vector<8x64xf32> -> vector<8x64xf32>
    %c0_12 = arith.constant 0 : index
    %c0_13 = arith.constant 0 : index
    %11 = vector.load %arg7[%c0_12, %c0_13] : memref<1x64xf32, #tpu.memory_space<vmem>>, vector<1x64xf32>
    %12 = vector.broadcast %11 : vector<1x64xf32> to vector<8x64xf32>
    %13 = arith.addf %10, %12 : vector<8x64xf32>
    %14 = arith.truncf %8 : vector<8x32xf32> to vector<8x32xbf16>
    %15 = vector.extract_strided_slice %13 {offsets = [0, 0], sizes = [8, 32], strides = [1, 1]} : vector<8x64xf32> to vector<8x32xf32>
    %16 = arith.truncf %15 : vector<8x32xf32> to vector<8x32xbf16>
    %17 = vector.extract_strided_slice %13 {offsets = [0, 32], sizes = [8, 32], strides = [1, 1]} : vector<8x64xf32> to vector<8x32xf32>
    %18 = arith.truncf %17 : vector<8x32xf32> to vector<8x32xbf16>
    %19 = vector.extract_strided_slice %14 {offsets = [0, 0], sizes = [8, 8], strides = [1, 1]} : vector<8x32xbf16> to vector<8x8xbf16>
    %20 = vector.extract_strided_slice %16 {offsets = [0, 0], sizes = [8, 8], strides = [1, 1]} : vector<8x32xbf16> to vector<8x8xbf16>
    %21 = vector.extract_strided_slice %18 {offsets = [0, 0], sizes = [8, 8], strides = [1, 1]} : vector<8x32xbf16> to vector<8x8xbf16>
    %cst_14 = arith.constant dense<0.000000e+00> : vector<8x8xf32>
    %22 = tpu.matmul %19, %20, %cst_14 {dimension_numbers = #tpu.dot_dimension_numbers<[1], [1], [0], [0], [0, 0, 1, 0], [], []>} : vector<8x8xbf16>, vector<8x8xbf16>, vector<8x8xf32> -> vector<8x8xf32>
    %cst_15 = arith.constant 0.353553385 : f32
    %23 = vector.broadcast %cst_15 : f32 to vector<8x8xf32>
    %24 = arith.mulf %22, %23 : vector<8x8xf32>
    %cst_16 = arith.constant dense<0xFF800000> : vector<8xf32>
    %25 = vector.multi_reduction <maximumf>, %24, %cst_16 [1] : vector<8x8xf32> to vector<8xf32>
    %26 = vector.shape_cast %25 : vector<8xf32> to vector<8x1xf32>
    %27 = vector.broadcast %26 : vector<8x1xf32> to vector<8x8xf32>
    %28 = arith.subf %24, %27 : vector<8x8xf32>
    %29 = math.exp %28 : vector<8x8xf32>
    %cst_17 = arith.constant dense<0.000000e+00> : vector<8xf32>
    %30 = vector.multi_reduction <add>, %29, %cst_17 [1] : vector<8x8xf32> to vector<8xf32>
    %31 = vector.shape_cast %30 : vector<8xf32> to vector<8x1xf32>
    %32 = tpu.reciprocal %31 {approx = true} : vector<8x1xf32> -> vector<8x1xf32>
    %33 = vector.broadcast %32 : vector<8x1xf32> to vector<8x8xf32>
    %34 = arith.mulf %29, %33 : vector<8x8xf32>
    %35 = arith.truncf %34 : vector<8x8xf32> to vector<8x8xbf16>
    %cst_18 = arith.constant dense<0.000000e+00> : vector<8x8xf32>
    %36 = tpu.matmul %35, %21, %cst_18 {dimension_numbers = #tpu.dot_dimension_numbers<[1], [0], [0], [1], [0, 0, 1, 1], [], []>} : vector<8x8xbf16>, vector<8x8xbf16>, vector<8x8xf32> -> vector<8x8xf32>
    %c0_19 = arith.constant 0 : index
    %c0_20 = arith.constant 0 : index
    %37 = vector.load %arg13[%c0_19, %c0_20] : memref<8x32xf32, #tpu.memory_space<vmem>>, vector<8x8xf32>
    tpu.vector_store %arg13[%c0_19, %c0_20], %36 {strides = array<i32>} : memref<8x32xf32, #tpu.memory_space<vmem>>, vector<8x8xf32>,
    %38 = vector.extract_strided_slice %14 {offsets = [0, 8], sizes = [8, 8], strides = [1, 1]} : vector<8x32xbf16> to vector<8x8xbf16>
    %39 = vector.extract_strided_slice %16 {offsets = [0, 8], sizes = [8, 8], strides = [1, 1]} : vector<8x32xbf16> to vector<8x8xbf16>
    %40 = vector.extract_strided_slice %18 {offsets = [0, 8], sizes = [8, 8], strides = [1, 1]} : vector<8x32xbf16> to vector<8x8xbf16>
    %cst_21 = arith.constant dense<0.000000e+00> : vector<8x8xf32>
    %41 = tpu.matmul %38, %39, %cst_21 {dimension_numbers = #tpu.dot_dimension_numbers<[1], [1], [0], [0], [0, 0, 1, 0], [], []>} : vector<8x8xbf16>, vector<8x8xbf16>, vector<8x8xf32> -> vector<8x8xf32>
    %cst_22 = arith.constant 0.353553385 : f32
    %42 = vector.broadcast %cst_22 : f32 to vector<8x8xf32>
    %43 = arith.mulf %41, %42 : vector<8x8xf32>
    %cst_23 = arith.constant dense<0xFF800000> : vector<8xf32>
    %44 = vector.multi_reduction <maximumf>, %43, %cst_23 [1] : vector<8x8xf32> to vector<8xf32>
    %45 = vector.shape_cast %44 : vector<8xf32> to vector<8x1xf32>
    %46 = vector.broadcast %45 : vector<8x1xf32> to vector<8x8xf32>
    %47 = arith.subf %43, %46 : vector<8x8xf32>
    %48 = math.exp %47 : vector<8x8xf32>
    %cst_24 = arith.constant dense<0.000000e+00> : vector<8xf32>
    %49 = vector.multi_reduction <add>, %48, %cst_24 [1] : vector<8x8xf32> to vector<8xf32>
    %50 = vector.shape_cast %49 : vector<8xf32> to vector<8x1xf32>
    %51 = tpu.reciprocal %50 {approx = true} : vector<8x1xf32> -> vector<8x1xf32>
    %52 = vector.broadcast %51 : vector<8x1xf32> to vector<8x8xf32>
    %53 = arith.mulf %48, %52 : vector<8x8xf32>
    %54 = arith.truncf %53 : vector<8x8xf32> to vector<8x8xbf16>
    %cst_25 = arith.constant dense<0.000000e+00> : vector<8x8xf32>
    %55 = tpu.matmul %54, %40, %cst_25 {dimension_numbers = #tpu.dot_dimension_numbers<[1], [0], [0], [1], [0, 0, 1, 1], [], []>} : vector<8x8xbf16>, vector<8x8xbf16>, vector<8x8xf32> -> vector<8x8xf32>
    %c0_26 = arith.constant 0 : index
    %c8 = arith.constant 8 : index
    %56 = vector.load %arg13[%c0_26, %c8] : memref<8x32xf32, #tpu.memory_space<vmem>>, vector<8x8xf32>
    tpu.vector_store %arg13[%c0_26, %c8], %55 {strides = array<i32>} : memref<8x32xf32, #tpu.memory_space<vmem>>, vector<8x8xf32>,
    %57 = vector.extract_strided_slice %14 {offsets = [0, 16], sizes = [8, 8], strides = [1, 1]} : vector<8x32xbf16> to vector<8x8xbf16>
    %58 = vector.extract_strided_slice %16 {offsets = [0, 16], sizes = [8, 8], strides = [1, 1]} : vector<8x32xbf16> to vector<8x8xbf16>
    %59 = vector.extract_strided_slice %18 {offsets = [0, 16], sizes = [8, 8], strides = [1, 1]} : vector<8x32xbf16> to vector<8x8xbf16>
    %cst_27 = arith.constant dense<0.000000e+00> : vector<8x8xf32>
    %60 = tpu.matmul %57, %58, %cst_27 {dimension_numbers = #tpu.dot_dimension_numbers<[1], [1], [0], [0], [0, 0, 1, 0], [], []>} : vector<8x8xbf16>, vector<8x8xbf16>, vector<8x8xf32> -> vector<8x8xf32>
    %cst_28 = arith.constant 0.353553385 : f32
    %61 = vector.broadcast %cst_28 : f32 to vector<8x8xf32>
    %62 = arith.mulf %60, %61 : vector<8x8xf32>
    %cst_29 = arith.constant dense<0xFF800000> : vector<8xf32>
    %63 = vector.multi_reduction <maximumf>, %62, %cst_29 [1] : vector<8x8xf32> to vector<8xf32>
    %64 = vector.shape_cast %63 : vector<8xf32> to vector<8x1xf32>
    %65 = vector.broadcast %64 : vector<8x1xf32> to vector<8x8xf32>
    %66 = arith.subf %62, %65 : vector<8x8xf32>
    %67 = math.exp %66 : vector<8x8xf32>
    %cst_30 = arith.constant dense<0.000000e+00> : vector<8xf32>
    %68 = vector.multi_reduction <add>, %67, %cst_30 [1] : vector<8x8xf32> to vector<8xf32>
    %69 = vector.shape_cast %68 : vector<8xf32> to vector<8x1xf32>
    %70 = tpu.reciprocal %69 {approx = true} : vector<8x1xf32> -> vector<8x1xf32>
    %71 = vector.broadcast %70 : vector<8x1xf32> to vector<8x8xf32>
    %72 = arith.mulf %67, %71 : vector<8x8xf32>
    %73 = arith.truncf %72 : vector<8x8xf32> to vector<8x8xbf16>
    %cst_31 = arith.constant dense<0.000000e+00> : vector<8x8xf32>
    %74 = tpu.matmul %73, %59, %cst_31 {dimension_numbers = #tpu.dot_dimension_numbers<[1], [0], [0], [1], [0, 0, 1, 1], [], []>} : vector<8x8xbf16>, vector<8x8xbf16>, vector<8x8xf32> -> vector<8x8xf32>
    %c0_32 = arith.constant 0 : index
    %c16 = arith.constant 16 : index
    %75 = vector.load %arg13[%c0_32, %c16] : memref<8x32xf32, #tpu.memory_space<vmem>>, vector<8x8xf32>
    tpu.vector_store %arg13[%c0_32, %c16], %74 {strides = array<i32>} : memref<8x32xf32, #tpu.memory_space<vmem>>, vector<8x8xf32>,
    %76 = vector.extract_strided_slice %14 {offsets = [0, 24], sizes = [8, 8], strides = [1, 1]} : vector<8x32xbf16> to vector<8x8xbf16>
    %77 = vector.extract_strided_slice %16 {offsets = [0, 24], sizes = [8, 8], strides = [1, 1]} : vector<8x32xbf16> to vector<8x8xbf16>
    %78 = vector.extract_strided_slice %18 {offsets = [0, 24], sizes = [8, 8], strides = [1, 1]} : vector<8x32xbf16> to vector<8x8xbf16>
    %cst_33 = arith.constant dense<0.000000e+00> : vector<8x8xf32>
    %79 = tpu.matmul %76, %77, %cst_33 {dimension_numbers = #tpu.dot_dimension_numbers<[1], [1], [0], [0], [0, 0, 1, 0], [], []>} : vector<8x8xbf16>, vector<8x8xbf16>, vector<8x8xf32> -> vector<8x8xf32>
    %cst_34 = arith.constant 0.353553385 : f32
    %80 = vector.broadcast %cst_34 : f32 to vector<8x8xf32>
    %81 = arith.mulf %79, %80 : vector<8x8xf32>
    %cst_35 = arith.constant dense<0xFF800000> : vector<8xf32>
    %82 = vector.multi_reduction <maximumf>, %81, %cst_35 [1] : vector<8x8xf32> to vector<8xf32>
    %83 = vector.shape_cast %82 : vector<8xf32> to vector<8x1xf32>
    %84 = vector.broadcast %83 : vector<8x1xf32> to vector<8x8xf32>
    %85 = arith.subf %81, %84 : vector<8x8xf32>
    %86 = math.exp %85 : vector<8x8xf32>
    %cst_36 = arith.constant dense<0.000000e+00> : vector<8xf32>
    %87 = vector.multi_reduction <add>, %86, %cst_36 [1] : vector<8x8xf32> to vector<8xf32>
    %88 = vector.shape_cast %87 : vector<8xf32> to vector<8x1xf32>
    %89 = tpu.reciprocal %88 {approx = true} : vector<8x1xf32> -> vector<8x1xf32>
    %90 = vector.broadcast %89 : vector<8x1xf32> to vector<8x8xf32>
    %91 = arith.mulf %86, %90 : vector<8x8xf32>
    %92 = arith.truncf %91 : vector<8x8xf32> to vector<8x8xbf16>
    %cst_37 = arith.constant dense<0.000000e+00> : vector<8x8xf32>
    %93 = tpu.matmul %92, %78, %cst_37 {dimension_numbers = #tpu.dot_dimension_numbers<[1], [0], [0], [1], [0, 0, 1, 1], [], []>} : vector<8x8xbf16>, vector<8x8xbf16>, vector<8x8xf32> -> vector<8x8xf32>
    %c0_38 = arith.constant 0 : index
    %c24 = arith.constant 24 : index
    %94 = vector.load %arg13[%c0_38, %c24] : memref<8x32xf32, #tpu.memory_space<vmem>>, vector<8x8xf32>
    tpu.vector_store %arg13[%c0_38, %c24], %93 {strides = array<i32>} : memref<8x32xf32, #tpu.memory_space<vmem>>, vector<8x8xf32>,
    %c0_39 = arith.constant 0 : index
    %c0_40 = arith.constant 0 : index
    %95 = vector.load %arg13[%c0_39, %c0_40] : memref<8x32xf32, #tpu.memory_space<vmem>>, vector<8x32xf32>
    %96 = arith.truncf %95 : vector<8x32xf32> to vector<8x32xbf16>
    %c0_41 = arith.constant 0 : index
    %c0_42 = arith.constant 0 : index
    %97 = vector.load %arg8[%c0_41, %c0_42] : memref<32x32xbf16, #tpu.memory_space<vmem>>, vector<32x32xbf16>
    %cst_43 = arith.constant dense<0.000000e+00> : vector<8x32xf32>
    %98 = tpu.matmul %96, %97, %cst_43 {dimension_numbers = #tpu.dot_dimension_numbers<[1], [0], [0], [1], [0, 0, 1, 1], [], []>} : vector<8x32xbf16>, vector<32x32xbf16>, vector<8x32xf32> -> vector<8x32xf32>
    %c0_44 = arith.constant 0 : index
    %c0_45 = arith.constant 0 : index
    %99 = vector.load %arg9[%c0_44, %c0_45] : memref<1x32xf32, #tpu.memory_space<vmem>>, vector<1x32xf32>
    %100 = vector.broadcast %99 : vector<1x32xf32> to vector<8x32xf32>
    %101 = arith.addf %98, %100 : vector<8x32xf32>
    %102 = arith.extf %1 : vector<8x32xbf16> to vector<8x32xf32>
    %103 = arith.addf %102, %101 : vector<8x32xf32>
    %c0_46 = arith.constant 0 : index
    %c0_47 = arith.constant 0 : index
    %104 = vector.load %arg10[%c0_46, %c0_47] : memref<1x32xf32, #tpu.memory_space<vmem>>, vector<1x32xf32>
    %c0_48 = arith.constant 0 : index
    %c0_49 = arith.constant 0 : index
    %105 = vector.load %arg11[%c0_48, %c0_49] : memref<1x32xf32, #tpu.memory_space<vmem>>, vector<1x32xf32>
    %cst_50 = arith.constant dense<0.000000e+00> : vector<8xf32>
    %106 = vector.multi_reduction <add>, %103, %cst_50 [1] : vector<8x32xf32> to vector<8xf32>
    %107 = vector.shape_cast %106 : vector<8xf32> to vector<8x1xf32>
    %cst_51 = arith.constant 3.200000e+01 : f32
    %108 = vector.broadcast %cst_51 : f32 to vector<8x1xf32>
    %109 = arith.divf %107, %108 : vector<8x1xf32>
    %110 = vector.broadcast %109 : vector<8x1xf32> to vector<8x32xf32>
    %111 = arith.subf %103, %110 : vector<8x32xf32>
    %112 = arith.mulf %111, %111 : vector<8x32xf32>
    %cst_52 = arith.constant dense<0.000000e+00> : vector<8xf32>
    %113 = vector.multi_reduction <add>, %112, %cst_52 [1] : vector<8x32xf32> to vector<8xf32>
    %114 = vector.shape_cast %113 : vector<8xf32> to vector<8x1xf32>
    %cst_53 = arith.constant 3.200000e+01 : f32
    %115 = vector.broadcast %cst_53 : f32 to vector<8x1xf32>
    %116 = arith.divf %114, %115 : vector<8x1xf32>
    %117 = vector.broadcast %109 : vector<8x1xf32> to vector<8x32xf32>
    %118 = arith.subf %103, %117 : vector<8x32xf32>
    %cst_54 = arith.constant 9.99999974E-6 : f32
    %119 = vector.broadcast %cst_54 : f32 to vector<8x1xf32>
    %120 = arith.addf %116, %119 : vector<8x1xf32>
    %121 = math.rsqrt %120 : vector<8x1xf32>
    %122 = vector.broadcast %121 : vector<8x1xf32> to vector<8x32xf32>
    %123 = arith.mulf %118, %122 : vector<8x32xf32>
    %124 = vector.broadcast %104 : vector<1x32xf32> to vector<8x32xf32>
    %125 = arith.mulf %123, %124 : vector<8x32xf32>
    %126 = vector.broadcast %105 : vector<1x32xf32> to vector<8x32xf32>
    %127 = arith.addf %125, %126 : vector<8x32xf32>
    %128 = arith.truncf %127 : vector<8x32xf32> to vector<8x32xbf16>
    %c0_55 = arith.constant 0 : index
    %c0_56 = arith.constant 0 : index
    %c0_57 = arith.constant 0 : index
    %129 = vector.load %arg12[%c0_55, %c0_56, %c0_57] : memref<1x8x32xbf16, #tpu.memory_space<vmem>>, vector<1x8x32xbf16>
    %130 = vector.shape_cast %129 : vector<1x8x32xbf16> to vector<8x32xbf16>
    %131 = vector.shape_cast %128 : vector<8x32xbf16> to vector<1x8x32xbf16>
    tpu.vector_store %arg12[%c0_55, %c0_56, %c0_57], %131 {strides = array<i32>} : memref<1x8x32xbf16, #tpu.memory_space<vmem>>, vector<1x8x32xbf16>,
    return
  }
  func.func @transform_0(%arg0: i32, %arg1: i32) -> (i32, i32, i32) {
    %c0_i32 = arith.constant 0 : i32
    %c0_i32_0 = arith.constant 0 : i32
    return %arg0, %arg1, %c0_i32 : i32, i32, i32
  }
  func.func @transform_1(%arg0: i32, %arg1: i32) -> (i32, i32, i32) {
    %c0_i32 = arith.constant 0 : i32
    %c0_i32_0 = arith.constant 0 : i32
    %c0_i32_1 = arith.constant 0 : i32
    return %arg0, %c0_i32, %c0_i32_0 : i32, i32, i32
  }
  func.func @transform_2(%arg0: i32, %arg1: i32) -> (i32, i32) {
    %c0_i32 = arith.constant 0 : i32
    %c0_i32_0 = arith.constant 0 : i32
    %c0_i32_1 = arith.constant 0 : i32
    return %c0_i32, %c0_i32_0 : i32, i32
  }
  func.func @transform_3(%arg0: i32, %arg1: i32) -> (i32, i32) {
    %c0_i32 = arith.constant 0 : i32
    %c0_i32_0 = arith.constant 0 : i32
    %c0_i32_1 = arith.constant 0 : i32
    return %c0_i32, %c0_i32_0 : i32, i32
  }
  func.func @transform_4(%arg0: i32, %arg1: i32) -> (i32, i32) {
    %c0_i32 = arith.constant 0 : i32
    %c0_i32_0 = arith.constant 0 : i32
    %c0_i32_1 = arith.constant 0 : i32
    return %c0_i32, %c0_i32_0 : i32, i32
  }
  func.func @transform_5(%arg0: i32, %arg1: i32) -> (i32, i32) {
    %c0_i32 = arith.constant 0 : i32
    %c0_i32_0 = arith.constant 0 : i32
    %c0_i32_1 = arith.constant 0 : i32
    return %c0_i32, %c0_i32_0 : i32, i32
  }
  func.func @transform_6(%arg0: i32, %arg1: i32) -> (i32, i32) {
    %c0_i32 = arith.constant 0 : i32
    %c0_i32_0 = arith.constant 0 : i32
    %c0_i32_1 = arith.constant 0 : i32
    return %c0_i32, %c0_i32_0 : i32, i32
  }
  func.func @transform_7(%arg0: i32, %arg1: i32) -> (i32, i32) {
    %c0_i32 = arith.constant 0 : i32
    %c0_i32_0 = arith.constant 0 : i32
    %c0_i32_1 = arith.constant 0 : i32
    return %c0_i32, %c0_i32_0 : i32, i32
  }
  func.func @transform_8(%arg0: i32, %arg1: i32) -> (i32, i32) {
    %c0_i32 = arith.constant 0 : i32
    %c0_i32_0 = arith.constant 0 : i32
    %c0_i32_1 = arith.constant 0 : i32
    return %c0_i32, %c0_i32_0 : i32, i32
  }
  func.func @transform_9(%arg0: i32, %arg1: i32) -> (i32, i32) {
    %c0_i32 = arith.constant 0 : i32
    %c0_i32_0 = arith.constant 0 : i32
    %c0_i32_1 = arith.constant 0 : i32
    return %c0_i32, %c0_i32_0 : i32, i32
  }
  func.func @transform_10(%arg0: i32, %arg1: i32) -> (i32, i32, i32) {
    %c0_i32 = arith.constant 0 : i32
    %c0_i32_0 = arith.constant 0 : i32
    return %arg0, %arg1, %c0_i32 : i32, i32, i32
  }
}

module attributes {stable_mosaic.version = 11 : i64} {
  func.func @_layernorm_kernel(%arg0: i32, %arg1: memref<16x32xbf16, #tpu.memory_space<vmem>>, %arg2: memref<1x32xf32, #tpu.memory_space<vmem>>, %arg3: memref<1x32xf32, #tpu.memory_space<vmem>>, %arg4: memref<16x32xbf16, #tpu.memory_space<vmem>>) attributes {dimension_semantics = [#tpu.dimension_semantics<parallel>], iteration_bounds = array<i64: 1>, scalar_prefetch = 0 : i64, scratch_operands = 0 : i64, tpu.core_type = #tpu.core_type<tc>, window_params = [{transform_indices = @transform_0, window_bounds = array<i64: 16, 32>}, {pipeline_mode = #tpu.pipeline_mode<synchronous>, transform_indices = @transform_1, window_bounds = array<i64: 1, 32>}, {pipeline_mode = #tpu.pipeline_mode<synchronous>, transform_indices = @transform_2, window_bounds = array<i64: 1, 32>}, {transform_indices = @transform_3, window_bounds = array<i64: 16, 32>}]} {
    %c0 = arith.constant 0 : index
    %c0_0 = arith.constant 0 : index
    %0 = vector.load %arg1[%c0, %c0_0] : memref<16x32xbf16, #tpu.memory_space<vmem>>, vector<16x32xbf16>
    %1 = arith.extf %0 : vector<16x32xbf16> to vector<16x32xf32>
    %c0_1 = arith.constant 0 : index
    %c0_2 = arith.constant 0 : index
    %2 = vector.load %arg2[%c0_1, %c0_2] : memref<1x32xf32, #tpu.memory_space<vmem>>, vector<1x32xf32>
    %c0_3 = arith.constant 0 : index
    %c0_4 = arith.constant 0 : index
    %3 = vector.load %arg3[%c0_3, %c0_4] : memref<1x32xf32, #tpu.memory_space<vmem>>, vector<1x32xf32>
    %cst = arith.constant dense<0.000000e+00> : vector<16xf32>
    %4 = vector.multi_reduction <add>, %1, %cst [1] : vector<16x32xf32> to vector<16xf32>
    %5 = vector.shape_cast %4 : vector<16xf32> to vector<16x1xf32>
    %cst_5 = arith.constant 3.200000e+01 : f32
    %6 = vector.broadcast %cst_5 : f32 to vector<16x1xf32>
    %7 = arith.divf %5, %6 : vector<16x1xf32>
    %8 = vector.broadcast %7 : vector<16x1xf32> to vector<16x32xf32>
    %9 = arith.subf %1, %8 : vector<16x32xf32>
    %10 = arith.mulf %9, %9 : vector<16x32xf32>
    %cst_6 = arith.constant dense<0.000000e+00> : vector<16xf32>
    %11 = vector.multi_reduction <add>, %10, %cst_6 [1] : vector<16x32xf32> to vector<16xf32>
    %12 = vector.shape_cast %11 : vector<16xf32> to vector<16x1xf32>
    %cst_7 = arith.constant 3.200000e+01 : f32
    %13 = vector.broadcast %cst_7 : f32 to vector<16x1xf32>
    %14 = arith.divf %12, %13 : vector<16x1xf32>
    %15 = vector.broadcast %7 : vector<16x1xf32> to vector<16x32xf32>
    %16 = arith.subf %1, %15 : vector<16x32xf32>
    %cst_8 = arith.constant 9.99999974E-6 : f32
    %17 = vector.broadcast %cst_8 : f32 to vector<16x1xf32>
    %18 = arith.addf %14, %17 : vector<16x1xf32>
    %19 = math.rsqrt %18 : vector<16x1xf32>
    %20 = vector.broadcast %19 : vector<16x1xf32> to vector<16x32xf32>
    %21 = arith.mulf %16, %20 : vector<16x32xf32>
    %22 = vector.broadcast %2 : vector<1x32xf32> to vector<16x32xf32>
    %23 = arith.mulf %21, %22 : vector<16x32xf32>
    %24 = vector.broadcast %3 : vector<1x32xf32> to vector<16x32xf32>
    %25 = arith.addf %23, %24 : vector<16x32xf32>
    %26 = arith.truncf %25 : vector<16x32xf32> to vector<16x32xbf16>
    %c0_9 = arith.constant 0 : index
    %c0_10 = arith.constant 0 : index
    %27 = vector.load %arg4[%c0_9, %c0_10] : memref<16x32xbf16, #tpu.memory_space<vmem>>, vector<16x32xbf16>
    tpu.vector_store %arg4[%c0_9, %c0_10], %26 {strides = array<i32>} : memref<16x32xbf16, #tpu.memory_space<vmem>>, vector<16x32xbf16>,
    return
  }
  func.func @transform_0(%arg0: i32) -> (i32, i32) {
    %c0_i32 = arith.constant 0 : i32
    %c0_i32_0 = arith.constant 0 : i32
    return %arg0, %c0_i32 : i32, i32
  }
  func.func @transform_1(%arg0: i32) -> (i32, i32) {
    %c0_i32 = arith.constant 0 : i32
    %c0_i32_0 = arith.constant 0 : i32
    %c0_i32_1 = arith.constant 0 : i32
    return %c0_i32, %c0_i32_0 : i32, i32
  }
  func.func @transform_2(%arg0: i32) -> (i32, i32) {
    %c0_i32 = arith.constant 0 : i32
    %c0_i32_0 = arith.constant 0 : i32
    %c0_i32_1 = arith.constant 0 : i32
    return %c0_i32, %c0_i32_0 : i32, i32
  }
  func.func @transform_3(%arg0: i32) -> (i32, i32) {
    %c0_i32 = arith.constant 0 : i32
    %c0_i32_0 = arith.constant 0 : i32
    return %arg0, %c0_i32 : i32, i32
  }
}

module attributes {stable_mosaic.version = 11 : i64} {
  func.func @_linear_kernel(%arg0: i32, %arg1: i32, %arg2: memref<16x32xbf16, #tpu.memory_space<vmem>>, %arg3: memref<32x96xbf16, #tpu.memory_space<vmem>>, %arg4: memref<1x96xf32, #tpu.memory_space<vmem>>, %arg5: memref<16x96xf32, #tpu.memory_space<vmem>>) attributes {dimension_semantics = [#tpu.dimension_semantics<parallel>, #tpu.dimension_semantics<parallel>], iteration_bounds = array<i64: 1, 1>, scalar_prefetch = 0 : i64, scratch_operands = 0 : i64, tpu.core_type = #tpu.core_type<tc>, window_params = [{transform_indices = @transform_0, window_bounds = array<i64: 16, 32>}, {transform_indices = @transform_1, window_bounds = array<i64: 32, 96>}, {transform_indices = @transform_2, window_bounds = array<i64: 1, 96>}, {transform_indices = @transform_3, window_bounds = array<i64: 16, 96>}]} {
    %c0 = arith.constant 0 : index
    %c0_0 = arith.constant 0 : index
    %0 = vector.load %arg2[%c0, %c0_0] : memref<16x32xbf16, #tpu.memory_space<vmem>>, vector<16x32xbf16>
    %c0_1 = arith.constant 0 : index
    %c0_2 = arith.constant 0 : index
    %1 = vector.load %arg3[%c0_1, %c0_2] : memref<32x96xbf16, #tpu.memory_space<vmem>>, vector<32x96xbf16>
    %cst = arith.constant dense<0.000000e+00> : vector<16x96xf32>
    %2 = tpu.matmul %0, %1, %cst {dimension_numbers = #tpu.dot_dimension_numbers<[1], [0], [0], [1], [0, 0, 1, 1], [], []>} : vector<16x32xbf16>, vector<32x96xbf16>, vector<16x96xf32> -> vector<16x96xf32>
    %c0_3 = arith.constant 0 : index
    %c0_4 = arith.constant 0 : index
    %3 = vector.load %arg4[%c0_3, %c0_4] : memref<1x96xf32, #tpu.memory_space<vmem>>, vector<1x96xf32>
    %4 = vector.broadcast %3 : vector<1x96xf32> to vector<16x96xf32>
    %5 = arith.addf %2, %4 : vector<16x96xf32>
    %c0_5 = arith.constant 0 : index
    %c0_6 = arith.constant 0 : index
    %6 = vector.load %arg5[%c0_5, %c0_6] : memref<16x96xf32, #tpu.memory_space<vmem>>, vector<16x96xf32>
    tpu.vector_store %arg5[%c0_5, %c0_6], %5 {strides = array<i32>} : memref<16x96xf32, #tpu.memory_space<vmem>>, vector<16x96xf32>,
    return
  }
  func.func @transform_0(%arg0: i32, %arg1: i32) -> (i32, i32) {
    %c0_i32 = arith.constant 0 : i32
    %c0_i32_0 = arith.constant 0 : i32
    return %arg1, %c0_i32 : i32, i32
  }
  func.func @transform_1(%arg0: i32, %arg1: i32) -> (i32, i32) {
    %c0_i32 = arith.constant 0 : i32
    %c0_i32_0 = arith.constant 0 : i32
    return %c0_i32, %arg0 : i32, i32
  }
  func.func @transform_2(%arg0: i32, %arg1: i32) -> (i32, i32) {
    %c0_i32 = arith.constant 0 : i32
    %c0_i32_0 = arith.constant 0 : i32
    return %c0_i32, %arg0 : i32, i32
  }
  func.func @transform_3(%arg0: i32, %arg1: i32) -> (i32, i32) {
    %c0_i32 = arith.constant 0 : i32
    return %arg1, %arg0 : i32, i32
  }
}

</mosaic_0001>

<bundles_post_ra>
// kernel: transformer_decoder_forward.8
= control target key start
LH: loop header
LB: loop body
LE: loop exit
PB: predicated region body
PF: predicated region fallthrough
CT: control target
= control target key end

     0   :  { %s1033_s30 = smov 0   ;;  %s1035_s10 = smov 0   ;;  %s1156_s0 = inlined_call_operand.vmem [shape: bf16[2,8,32], index: 0, kind: input, shape index: {}]   ;;  %s1157_s1 = inlined_call_operand.vmem [shape: bf16[32,32], index: 1, kind: input, shape index: {}]   ;;  %s1158_s2 = inlined_call_operand.vmem [shape: f32[1,32], index: 2, kind: input, shape index: {}]   ;;  %s1159_s3 = inlined_call_operand.vmem [shape: bf16[32,64], index: 3, kind: input, shape index: {}]   ;;  %s1160_s4 = inlined_call_operand.vmem [shape: f32[1,64], index: 4, kind: input, shape index: {}]   ;;  %s1161_s5 = inlined_call_operand.vmem [shape: bf16[32,32], index: 5, kind: input, shape index: {}]   ;;  %s1162_s6 = inlined_call_operand.vmem [shape: f32[1,32], index: 6, kind: input, shape index: {}]   ;;  %s1163_s7 = inlined_call_operand.vmem [shape: f32[1,32], index: 7, kind: input, shape index: {}]   ;;  %s1164_s8 = inlined_call_operand.vmem [shape: f32[1,32], index: 8, kind: input, shape index: {}]   ;;  %s1165_s9 = inlined_call_operand.vmem [shape: bf16[2,8,32], index: 9, kind: output, shape index: {}]  }
   0x1   :  { %s1037_s11 = smov 0  }
   0x2 LB: > { %s31_s12 = sadd.s32 1, %s966_s10  ;;  %p842_p0 = scmp.ge.s32.totalorder %s970_s11, 1  ;;  %s970_s11 = sphi %s1037_s11, %s19_s11   ;;  %s966_s10 = sphi %s1035_s10, %s1167_s10   ;;  %s962_s30 = sphi %s1033_s30, %s1166_s30  }
   0x3   : > { %p33_p1 = scmp.ge.s32.totalorder %s31_s12, 2  ;;  %p300_p2 = scmp.lt.s32.totalorder %s970_s11, 3 }
   0x5   : > { %s1169_s12 = smov (%p33_p1, %s31_s12), 0  ;;  %p301_p3 = pnand %p842_p0, %p300_p2 }
   0x6   : > { %p337_p4 = scmp.lt.s32.totalorder (!%p301_p3), %s962_s30, 1  ;;  %s972_s29 = smov (!%p301_p3), 96  }
   0x7   : > { %304 = sbr.rel (%p301_p3) target bundleno = 1618 (0x652), region = 56  ;;  %s973_s13 = smov (!%p301_p3), 120  }
   0x8   : > { %s974_s14 = smov (!%p301_p3), 112   ;;  %s975_s15 = smov (!%p301_p3), 104  }
   0x9   : > { %s976_s16 = smov (!%p301_p3), 88   ;;  %s977_s17 = smov (!%p301_p3), 80  }
   0xa   : > { %s978_s18 = smov (!%p301_p3), 72   ;;  %s979_s19 = smov (!%p301_p3), 8  }
   0xb   : > { %s980_s20 = smov (!%p301_p3), 16   ;;  %s981_s22 = smov (!%p301_p3), 24  }
   0xc   : > { %v883_v0 = vld [vmem:[%s1157_s1 + $0x8] sm:$0xff]  ;;  %v882_v2 = vld [vmem:[%s1157_s1] sm:$0xff]  ;;  %s1171_s30 = smov (!%p337_p4, %s962_s30), 1  ;;  %vm370_vm0 = vcmask 261120   ;;  %vm430_vm1 = vcmask 64512   ;;  %vm472_vm2 = vcmask 1043456   ;;  %v423_v27 = vlaneseq }
   0xd   : > { %v885_v1 = vld [vmem:[%s1159_s3 + $0x8] sm:$0xff]  ;;  %380 = vmatpush.bf16.msra.mxu0 %v883_v0  ;;  %v884_v3 = vld [vmem:[%s1159_s3] sm:$0xff]  ;;  %s843_s21 = sshll.u32 %s1171_s30, 2  ;;  %vm555_vm4 = vcmask 130112   ;;  %vm619_vm5 = vcmask 195712   ;;  %vm683_vm6 = vcmask 261312  }
   0xe   : > { %413 = vmatpush.bf16.msra.mxu1 %v885_v1  ;;  %s340_s24 = scalar_lea.vmem %s1156_s0, %s843_s21  ;;  %v923_v5 = vld [vmem:[%s1158_s2] ss:$0 sm:$0xff]  ;;  %v424_v29 = vshrl.u32 %v423_v27, 7  ;;  %v428_v30 = vand.u32 127, %v423_v27  ;;  %vm765_vm11 = vcmask 257024  }
   0xf   : > { %v1071_v4 = vld [vmem:[%s340_s24] sm:$0xf] }
  0x10   : > { %v924_v6 = vld [vmem:[%s1160_s4] ss:$0 sm:$0xff]  ;;  %vm429_vm3 = vcmp.le.s32.totalorder %v428_v30, %v424_v29 }
  0x11   : > { %381 = vmatpush.bf16.msra.mxu0 %v882_v2 }
  0x12   : > { %414 = vmatpush.bf16.msra.mxu1 %v884_v3 }
  0x14   : > { %853 = vmatmul.msk.bf16.vlgmr.msra.gmra.mxu0 %vm370_vm0, %v1071_v4 }
  0x15   : > { %862 = vmatmul.msk.bf16.vlgmr.msra.gmra.mxu1 %vm370_vm0, %v1071_v4 }
  0x91   : > { %v383_v7 = vpop.f32.mrf.mxu0 }
  0x92   : > { %v416_v8 = vpop.f32.mrf.mxu1  ;;  %v384_v9 = vadd.f32 %v923_v5, %v383_v7 }
  0x93   : > { %v417_v10 = vadd.f32 %v924_v6, %v416_v8 }
  0x94   : > { %v420_v11 = vpack.c.bf16 %v384_v9, %v384_v9 }
  0x95   : > { %v421_v12 = vpack.c.bf16 %v417_v10, %v417_v10 }
  0x96   : > { %v491_v13 = vunpack.c.l.b16 %v420_v11 }
  0x97   : > { %v465_v14 = vunpack.c.l.b16 %v421_v12  ;;  %v435_v15 = vsel %vm430_vm1, %v421_v12, 0 }
  0x98   : > { %444 = vmatpush.bf16.xpose.msra.mxu2 %v435_v15  ;;  %v492_v16 = vpack.c.b16 %v491_v13, %v491_v13 }
  0x99   : > { %v1084_v17 = vpack.c.b16 %v465_v14, %v465_v14  ;;  %v385_v18 = vpop.f32.mrf.mxu0 }
  0x9a   : > { %v418_v19 = vpop.f32.mrf.mxu1  ;;  %493 = vrot.lane.b32.xlu2 %v492_v16, %s973_s13 }
  0x9b   : > { %467 = vrot.lane.b32.xlu1 %v1084_v17, %s972_s29 }
  0x9f   : > { %863 = vmatmul.msk.bf16.vlgmr.msra.gmra.mxu2 %vm430_vm1, %v420_v11 }
  0xa2   : > { %559 = vrot.lane.b32.xlu2 %v1084_v17, %s974_s14 }
  0xa3   : > { %495 = vrot.lane.b32.xlu1 %v1084_v17, %s973_s13 }
  0xaa   : > { %621 = vrot.lane.b32.xlu2 %v492_v16, %s975_s15 }
  0xab   : > { %557 = vrot.lane.b32.xlu1 %v492_v16, %s974_s14 }
  0xf4   : > { %v494_v20 = vpop.permute.xlu2 %493 }
  0xfc   : > { %v560_v21 = vpop.permute.xlu2 %559 }
  0xfd   : > { %v565_v22 = vsel %vm430_vm1, %v560_v21, 0 }
  0xfe   : > { %574 = vmatpush.bf16.xpose.msrb.mxu1 %v565_v22 }
 0x104   : > { %v622_v46 = vpop.permute.xlu2 %621 }
 0x10d   : > { %v468_v23 = vpop.permute.xlu1 %467 }
 0x10e   : > { %v474_v24 = vsel %vm472_vm2, %v468_v23, 0 }
 0x10f   : > { %483 = vmatpush.bf16.msra.mxu3 %v474_v24 }
 0x115   : > { %v496_v25 = vpop.permute.xlu1 %495 }
 0x116   : > { %v501_v26 = vsel %vm430_vm1, %v496_v25, 0 }
 0x117   : > { %510 = vmatpush.bf16.xpose.msrb.mxu3 %v501_v26 }
 0x11d   : > { %v558_v28 = vpop.permute.xlu1 %557 }
 0x11e   : > { %867 = vmatmul.msk.bf16.vlgmr.msrb.gmra.mxu1 %vm430_vm1, %v558_v28 }
 0x122   : > { %v446_v31 = vpop.f32.mrf.mxu2 }
 0x123   : > { %v450_v32 = vmul.f32 0.35355338, %v446_v31 }
 0x125   : > { %v451_v33 = vsel %vm429_vm3, %v450_v32, -1e+30 }
 0x126   : > { %v452_v34 = vsel %vm430_vm1, %v451_v33, -inf }
 0x127   : > { %453 = vmax.xlane.f32.xlu0 %v452_v34 }
 0x12a   : > { %v448_v35 = vpop.f32.mrf.mxu2 }
 0x19a   : > { %v454_v36 = vpop.xlane.xlu0 %453 }
 0x19b   : > { %v455_v37 = vsub.f32 %v451_v33, %v454_v36  ;;  %v576_v38 = vpop.f32.mrf.mxu1 }
 0x19c   : > { %v580_v39 = vmul.f32 0.35355338, %v576_v38 }
 0x19d   : > { %v456_v40 = vmul.f32 1.442695, %v455_v37 }
 0x19e   : > { %v581_v41 = vsel %vm429_vm3, %v580_v39, -1e+30 }
 0x19f   : > { %928 = vpow2.f32 %v456_v40  ;;  %v582_v42 = vsel %vm430_vm1, %v581_v41, -inf }
 0x1a0   : > { %583 = vmax.xlane.f32.xlu2 %v582_v42  ;;  %v886_v42 = vld [vmem:[%s1161_s5] sm:$0xff] }
 0x1a3   : > { %v578_v43 = vpop.f32.mrf.mxu1 }
 0x1a5   : > { %v929_v44 = vpop.eup %928 }
 0x1a6   : > { %v458_v45 = vsel %vm430_vm1, %v929_v44, 0.0 }
 0x1a7   : > { %459 = vadd.xlane.f32.xlu0 %v458_v45 }
 0x1bb   : > { %623 = vrot.lane.b32.xlu0 %v1084_v17, %s975_s15 }
 0x213   : > { %v584_v47 = vpop.xlane.xlu2 %583 }
 0x214   : > { %v585_v48 = vsub.f32 %v581_v41, %v584_v47  ;;  %v887_v41 = vld [vmem:[%s1161_s5 + $0x8] sm:$0xff] }
 0x215   : > { %716 = vmatpush.bf16.msra.mxu1 %v887_v41 }
 0x216   : > { %v586_v49 = vmul.f32 1.442695, %v585_v48  ;;  %v925_v48 = vld [vmem:[%s1162_s6] ss:$0 sm:$0xff] }
 0x218   : > { %930 = vpow2.f32 %v586_v49  ;;  %v723_v49 = vunpack.c.l.bf16 %v1071_v4 }
 0x219   : > { %717 = vmatpush.bf16.msra.mxu1 %v886_v42 }
 0x21a   : > { %v460_v50 = vpop.xlane.xlu0 %459 }
 0x21b   : > { %932 = vrcp.f32 %v460_v50 }
 0x21e   : > { %v931_v51 = vpop.eup %930 }
 0x21f   : > { %v588_v52 = vsel %vm430_vm1, %v931_v51, 0.0 }
 0x220   : > { %589 = vadd.xlane.f32.xlu2 %v588_v52 }
 0x221   : > { %v933_v53 = vpop.eup %932 }
 0x222   : > { %v462_v54 = vmul.f32 %v933_v53, %v929_v44 }
 0x224   : > { %v463_v55 = vpack.c.bf16 %v462_v54, %v462_v54 }
 0x226   : > { %864 = vmatmul.msk.bf16.vlgmr.msra.gmra.mxu3 %vm430_vm1, %v463_v55  ;;  %v982_v55 = vmov 32.0  }
 0x22d   : > { %v624_v56 = vpop.permute.xlu0 %623 }
 0x22e   : > { %v629_v57 = vsel %vm430_vm1, %v624_v56, 0 }
 0x22f   : > { %638 = vmatpush.bf16.xpose.msra.mxu3 %v629_v57 }
 0x236   : > { %865 = vmatmul.msk.bf16.vlgmr.msrb.gmra.mxu3 %vm430_vm1, %v494_v20 }
 0x246   : > { %869 = vmatmul.msk.bf16.vlgmr.msra.gmra.mxu3 %vm430_vm1, %v622_v46 }
 0x293   : > { %v590_v20 = vpop.xlane.xlu2 %589 }
 0x2a9   : > { %v485_v58 = vpop.f32.mrf.mxu3 }
 0x2aa   : > { %489 = vst.msk [vmem:[#allocation2] sm:$0xff] %vm430_vm1, %v485_v58 }
 0x2b1   : > { %v487_v59 = vpop.f32.mrf.mxu3 }
 0x2b9   : > { %v512_v60 = vpop.f32.mrf.mxu3 }
 0x2ba   : > { %v516_v61 = vmul.f32 0.35355338, %v512_v60 }
 0x2bc   : > { %v517_v62 = vsel %vm429_vm3, %v516_v61, -1e+30 }
 0x2bd   : > { %v518_v63 = vsel %vm430_vm1, %v517_v62, -inf }
 0x2be   : > { %519 = vmax.xlane.f32.xlu1 %v518_v63 }
 0x2c1   : > { %v514_v0 = vpop.f32.mrf.mxu3 }
 0x2c9   : > { %v640_v1 = vpop.f32.mrf.mxu3 }
 0x2ca   : > { %v644_v2 = vmul.f32 0.35355338, %v640_v1 }
 0x2cc   : > { %v645_v3 = vsel %vm429_vm3, %v644_v2, -1e+30 }
 0x2cd   : > { %v646_v5 = vsel %vm430_vm1, %v645_v3, -inf }
 0x2ce   : > { %647 = vmax.xlane.f32.xlu0 %v646_v5 }
 0x2d1   : > { %v642_v6 = vpop.f32.mrf.mxu3 }
 0x2d7   : > { %530 = vrot.lane.b32.xlu1 %v1084_v17, %s976_s16 }
 0x331   : > { %v520_v7 = vpop.xlane.xlu1 %519 }
 0x332   : > { %v521_v8 = vsub.f32 %v517_v62, %v520_v7 }
 0x334   : > { %v522_v9 = vmul.f32 1.442695, %v521_v8 }
 0x336   : > { %934 = vpow2.f32 %v522_v9 }
 0x33c   : > { %v935_v10 = vpop.eup %934 }
 0x33d   : > { %v524_v11 = vsel %vm430_vm1, %v935_v10, 0.0 }
 0x33e   : > { %525 = vadd.xlane.f32.xlu2 %v524_v11 }
 0x341   : > { %v648_v12 = vpop.xlane.xlu0 %647 }
 0x342   : > { %v649_v13 = vsub.f32 %v645_v3, %v648_v12  ;;  %v926_v12 = vld [vmem:[%s1163_s7] ss:$0 sm:$0xff] }
 0x344   : > { %v650_v14 = vmul.f32 1.442695, %v649_v13 }
 0x346   : > { %936 = vpow2.f32 %v650_v14  ;;  %v927_v14 = vld [vmem:[%s1164_s8] ss:$0 sm:$0xff] }
 0x347   : > { %938 = vrcp.f32 %v590_v20 }
 0x349   : > { %v531_v15 = vpop.permute.xlu1 %530 }
 0x34a   : > { %v536_v16 = vsel %vm472_vm2, %v531_v15, 0 }
 0x34b   : > { %545 = vmatpush.bf16.msrb.mxu0 %v536_v16 }
 0x34c   : > { %v937_v18 = vpop.eup %936 }
 0x34d   : > { %v652_v19 = vsel %vm430_vm1, %v937_v18, 0.0  ;;  %v939_v22 = vpop.eup %938 }
 0x34e   : > { %653 = vadd.xlane.f32.xlu0 %v652_v19  ;;  %v592_v24 = vmul.f32 %v939_v22, %v931_v51 }
 0x350   : > { %v593_v29 = vpack.c.bf16 %v592_v24, %v592_v24 }
 0x356   : > { %594 = vrot.lane.b32.xlu2 %v1084_v17, %s977_s17 }
 0x362   : > { %658 = vrot.lane.b32.xlu0 %v1084_v17, %s978_s18  ;;  %s347_s18 = scalar_lea.vmem %s1165_s9, %s843_s21 }
 0x3b1   : > { %v526_v21 = vpop.xlane.xlu2 %525 }
 0x3b2   : > { %940 = vrcp.f32 %v526_v21 }
 0x3b8   : > { %v941_v23 = vpop.eup %940 }
 0x3b9   : > { %v528_v25 = vmul.f32 %v941_v23, %v935_v10  ;;  %v595_v26 = vpop.permute.xlu2 %594 }
 0x3ba   : > { %v600_v27 = vsel %vm472_vm2, %v595_v26, 0 }
 0x3bb   : > { %609 = vmatpush.bf16.msrb.mxu2 %v600_v27  ;;  %v529_v28 = vpack.c.bf16 %v528_v25, %v528_v25 }
 0x3bd   : > { %866 = vmatmul.msk.bf16.vlgmr.msrb.gmra.mxu0 %vm430_vm1, %v529_v28 }
 0x3be   : > { %868 = vmatmul.msk.bf16.vlgmr.msrb.gmra.mxu2 %vm430_vm1, %v593_v29 }
 0x3c1   : > { %v654_v30 = vpop.xlane.xlu0 %653 }
 0x3c2   : > { %942 = vrcp.f32 %v654_v30 }
 0x3c3   : > { %944 = vrcp.f32 %v982_v55 }
 0x3c8   : > { %v943_v17 = vpop.eup %942 }
 0x3c9   : > { %v656_v31 = vmul.f32 %v943_v17, %v937_v18  ;;  %v945_v56 = vpop.eup %944 }
 0x3ca   : > { %v731_v57 = vmul.f32 32.0, %v945_v56  ;;  %vm735_vm7 = vweird.f32 %v945_v56 }
 0x3cb   : > { %v657_v34 = vpack.c.bf16 %v656_v31, %v656_v31 }
 0x3cc   : > { %v732_v58 = vsub.f32 1.0, %v731_v57 }
 0x3ce   : > { %v733_v59 = vmul.f32 %v945_v56, %v732_v58 }
 0x3d0   : > { %v734_v60 = vadd.f32 %v945_v56, %v733_v59 }
 0x3d2   : > { %v736_v61 = vsel %vm735_vm7, %v945_v56, %v734_v60 }
 0x3d4   : > { %v659_v32 = vpop.permute.xlu0 %658 }
 0x3d5   : > { %v664_v33 = vsel %vm472_vm2, %v659_v32, 0 }
 0x3d6   : > { %673 = vmatpush.bf16.msra.mxu0 %v664_v33 }
 0x3d9   : > { %870 = vmatmul.msk.bf16.vlgmr.msra.gmra.mxu0 %vm430_vm1, %v657_v34 }
 0x43a   : > { %v547_v35 = vpop.f32.mrf.mxu0 }
 0x43b   : > { %552 = vrot.lane.b32.xlu1 %v547_v35, %s979_s19 }
 0x441   : > { %v611_v36 = vpop.f32.mrf.mxu2 }
 0x442   : > { %v549_v37 = vpop.f32.mrf.mxu0 }
 0x443   : > { %616 = vrot.lane.b32.xlu1 %v611_v36, %s980_s20 }
 0x449   : > { %v613_v38 = vpop.f32.mrf.mxu2 }
 0x456   : > { %v675_v39 = vpop.f32.mrf.mxu0 }
 0x457   : > { %680 = vrot.lane.b32.xlu2 %v675_v39, %s981_s22 }
 0x45e   : > { %v677_v40 = vpop.f32.mrf.mxu0 }
 0x4ad   : > { %v553_v43 = vpop.permute.xlu1 %552 }
 0x4ae   : > { %556 = vst.msk [vmem:[#allocation2] sm:$0xff] %vm555_vm4, %v553_v43 }
 0x4b1   : > { %v681_v45 = vpop.permute.xlu2 %680 }
 0x4b5   : > { %v617_v44 = vpop.permute.xlu1 %616 }
 0x4b6   : > { %620 = vst.msk [vmem:[#allocation2] sm:$0xff] %vm619_vm5, %v617_v44 }
 0x4b7   : > { %684 = vst.msk [vmem:[#allocation2] sm:$0xff] %vm683_vm6, %v681_v45 }
 0x4be   : > { %v685_v46 = vld [vmem:[#allocation2] sm:$0xff] }
 0x4bf   : > { %v686_v47 = vpack.c.bf16 %v685_v46, %v685_v46 }
 0x4c1   : > { %879 = vmatmul.msk.bf16.vlgmr.msra.gmra.mxu1 %vm370_vm0, %v686_v47 }
 0x53e   : > { %v719_v50 = vpop.f32.mrf.mxu1 }
 0x53f   : > { %v720_v51 = vadd.f32 %v925_v48, %v719_v50 }
 0x541   : > { %v724_v52 = vadd.f32 %v723_v49, %v720_v51 }
 0x543   : > { %v727_v53 = vsel %vm370_vm0, %v724_v52, 0.0 }
 0x544   : > { %728 = vadd.xlane.f32.xlu0 %v727_v53 }
 0x546   : > { %v721_v54 = vpop.f32.mrf.mxu1 }
 0x5b7   : > { %v729_v62 = vpop.xlane.xlu0 %728 }
 0x5b8   : > { %v737_v63 = vmul.f32 %v736_v61, %v729_v62 }
 0x5ba   : > { %v738_v0 = vsub.f32 %v724_v52, %v737_v63 }
 0x5bc   : > { %v739_v4 = vmul.f32 %v738_v0, %v738_v0 }
 0x5be   : > { %v740_v1 = vsel %vm370_vm0, %v739_v4, 0.0 }
 0x5bf   : > { %741 = vadd.xlane.f32.xlu1 %v740_v1 }
 0x632   : > { %v742_v2 = vpop.xlane.xlu1 %741 }
 0x633   : > { %v743_v3 = vmul.f32 %v742_v2, %v736_v61 }
 0x635   : > { %v744_v5 = vadd.f32 1e-05, %v743_v3 }
 0x637   : > { %946 = vrsqrt.f32 %v744_v5  ;;  %vm751_vm9 = vweird.f32 %v744_v5 }
 0x63d   : > { %v947_v6 = vpop.eup %946 }
 0x63e   : > { %v746_v7 = vmul.f32 %v947_v6, %v744_v5  ;;  %vm752_vm8 = vweird.f32 %v947_v6 }
 0x63f   : > { %vm753_vm10 = vmor %vm751_vm9, %vm752_vm8 }
 0x640   : > { %v747_v8 = vmul.f32 %v947_v6, %v746_v7 }
 0x642   : > { %v748_v9 = vmul.f32 0.5, %v747_v8 }
 0x644   : > { %v749_v10 = vsub.f32 1.5, %v748_v9 }
 0x646   : > { %v750_v11 = vmul.f32 %v947_v6, %v749_v10 }
 0x648   : > { %v754_v13 = vsel %vm753_vm10, %v947_v6, %v750_v11 }
 0x649   : > { %v755_v15 = vmul.f32 %v754_v13, %v738_v0 }
 0x64b   : > { %v759_v16 = vmul.f32 %v926_v12, %v755_v15 }
 0x64d   : > { %v763_v18 = vadd.f32 %v927_v14, %v759_v16 }
 0x64f   : > { %v764_v19 = vpack.c.bf16 %v763_v18, %v763_v18 }
 0x651   : > { %766 = vst.msk [vmem:[%s347_s18] sm:$0xf] %vm765_vm11, %v764_v19 }
 0x652 PF: > { %s19_s11 = sadd.s32 1, %s970_s11   ;;  %s1166_s30 = smov %s966_s10 }
 0x653   : > { %p16_p5 = scmp.ge.s32.totalorder %s19_s11, 4   ;;  %s1167_s10 = smov %s1169_s12 }
 0x655   :  { %18 = sbr.rel (!%p16_p5) target bundleno = 2 (0x2), region = 86 }

// kernel: transformer_decoder_forward.12
= control target key start
LH: loop header
LB: loop body
LE: loop exit
PB: predicated region body
PF: predicated region fallthrough
CT: control target
= control target key end

     0   :  { %15 = vsyncpa [#allocation4], 0  ;;  %s1177_s13 = smov 0   ;;  %s1179_s14 = smov 0   ;;  %s1297_s0 = inlined_call_operand.vmem [shape: bf16[2,8,32], index: 0, kind: input, shape index: {}]   ;;  %s1298_s1 = inlined_call_operand.vmem [shape: bf16[2,8,32], index: 1, kind: input, shape index: {}]   ;;  %s1299_s2 = inlined_call_operand.vmem [shape: bf16[32,32], index: 2, kind: input, shape index: {}]   ;;  %s1300_s3 = inlined_call_operand.vmem [shape: f32[1,32], index: 3, kind: input, shape index: {}]   ;;  %s1301_s4 = inlined_call_operand.vmem [shape: bf16[32,64], index: 4, kind: input, shape index: {}]   ;;  %s1302_s5 = inlined_call_operand.vmem [shape: f32[1,64], index: 5, kind: input, shape index: {}]   ;;  %s1303_s6 = inlined_call_operand.vmem [shape: bf16[32,32], index: 6, kind: input, shape index: {}]   ;;  %s1304_s7 = inlined_call_operand.vmem [shape: f32[1,32], index: 7, kind: input, shape index: {}]   ;;  %s1305_s8 = inlined_call_operand.vmem [shape: f32[1,32], index: 8, kind: input, shape index: {}]   ;;  %s1306_s9 = inlined_call_operand.hbm [shape: f32[1,32], index: 9, kind: input, shape index: {}]   ;;  %s1307_s10 = inlined_call_operand.vmem [shape: bf16[2,8,32], index: 10, kind: output, shape index: {}]  }
   0x1   :  { %s1181_s15 = smov 0  }
   0x2 LB: > { %s928_s16 = sadd.s32 4294967295, %s1108_s15   ;;  %s33_s17 = sadd.s32 1, %s1104_s14  ;;  %s1108_s15 = sphi %s1181_s15, %s21_s15   ;;  %s1104_s14 = sphi %s1179_s14, %s1309_s14   ;;  %s1100_s13 = sphi %s1177_s13, %s1308_s13  }
   0x3   : > { %p35_p0 = scmp.ge.s32.totalorder %s33_s17, 2  ;;  %p930_p1 = scmp.ge.s32.totalorder %s1108_s15, 1 }
   0x4   : > { %p288_p2 = scmp.lt.s32.totalorder %s1108_s15, 3  ;;  %p989_p4 = scmp.eq.s32.totalorder %s928_s16, 0 }
   0x5   : > { %s1311_s17 = smov (%p35_p0, %s33_s17), 0  ;;  %s321_s20 = sshll.u32 %s1306_s9, 4  ;;  %s322_s20 = int_to_ptr.hbm [resolvable:$true] %s321_s20 }
   0x6   : > { %p289_p3 = pnand %p930_p1, %p288_p2  ;;  %s1110_s21 = smov [#allocation3]  }
   0x7   : > { %s323_s22 = sshll.u32 %s1110_s21, 4  ;;  %s324_s22 = int_to_ptr.vmem [resolvable:$true] %s323_s22 }
   0x8   : > { %p985_p5 = pneg %p289_p3  ;;  %353 = sbr.rel (%p289_p3) target bundleno = 1618 (0x652), region = 60 }
   0xa   : > { %p986_p6 = pnand %p989_p4, %p985_p5 }
   0xc   : > { %988 = dma.hbm_to_vmem [thread:$0]  (!%p986_p6), %s322_s20, 16, %s324_s22, [#allocation4]  }
   0xd   : > { %1095 = dma.done.wait (%p989_p4), [#allocation4], 16  }
   0xe   : > { %1097 = vsyncadd (%p989_p4), [#allocation4], 4294967280  ;;  %p400_p7 = scmp.lt.s32.totalorder %s1100_s13, 1  ;;  %v976_v0 = vld [vmem:[%s1299_s2 + $0x8] sm:$0xff]  ;;  %v975_v2 = vld [vmem:[%s1299_s2] sm:$0xff]  ;;  %vm441_vm0 = vcmask 261120  }
   0xf   : > { %v978_v1 = vld [vmem:[%s1301_s4 + $0x8] sm:$0xff]  ;;  %451 = vmatpush.bf16.msra.mxu0 %v976_v0  ;;  %v977_v3 = vld [vmem:[%s1301_s4] sm:$0xff]  ;;  %vm496_vm1 = vcmask 64512   ;;  %s1111_s25 = smov 96   ;;  %s1112_s26 = smov 120   ;;  %vm537_vm2 = vcmask 1043456  }
  0x10   : > { %s1313_s13 = smov (!%p400_p7, %s1100_s13), 1  ;;  %487 = vmatpush.bf16.msra.mxu1 %v978_v1  ;;  %v1027_v6 = vld [vmem:[%s1300_s3] ss:$0 sm:$0xff]  ;;  %s1113_s28 = smov 112   ;;  %vm619_vm3 = vcmask 130112   ;;  %vm682_vm4 = vcmask 195712  }
  0x11   : > { %s1205_s27 = sshll.u32 %s1313_s13, 2  ;;  %v1028_v7 = vld [vmem:[%s1302_s5] ss:$0 sm:$0xff]  ;;  %s1114_s29 = smov 104   ;;  %vm745_vm5 = vcmask 261312   ;;  %vm827_vm10 = vcmask 257024  }
  0x12   : > { %s406_s18 = scalar_lea.vmem %s1297_s0, %s1205_s27  ;;  %s410_s13 = scalar_lea.vmem %s1298_s1, %s1205_s27 }
  0x13   : > { %452 = vmatpush.bf16.msra.mxu0 %v975_v2  ;;  %v1221_v4 = vld [vmem:[%s406_s18] sm:$0xf]  ;;  %s1115_s30 = smov 88   ;;  %s1116_s11 = smov 80  }
  0x14   : > { %488 = vmatpush.bf16.msra.mxu1 %v977_v3  ;;  %v420_v5 = vld [vmem:[%s410_s13] sm:$0xf]  ;;  %s1117_s12 = smov 72   ;;  %s1118_s16 = smov 8  }
  0x15   : > { %s1119_s18 = smov 16   ;;  %s1120_s19 = smov 24  }
  0x16   : > { %946 = vmatmul.msk.bf16.vlgmr.msra.gmra.mxu0 %vm441_vm0, %v1221_v4 }
  0x17   : > { %955 = vmatmul.msk.bf16.vlgmr.msra.gmra.mxu1 %vm441_vm0, %v420_v5 }
  0x93   : > { %v454_v8 = vpop.f32.mrf.mxu0 }
  0x94   : > { %v490_v9 = vpop.f32.mrf.mxu1  ;;  %v455_v10 = vadd.f32 %v1027_v6, %v454_v8 }
  0x95   : > { %v491_v11 = vadd.f32 %v1028_v7, %v490_v9 }
  0x96   : > { %v494_v12 = vpack.c.bf16 %v455_v10, %v455_v10 }
  0x97   : > { %v495_v13 = vpack.c.bf16 %v491_v11, %v491_v11 }
  0x98   : > { %v556_v14 = vunpack.c.l.b16 %v494_v12 }
  0x99   : > { %v530_v15 = vunpack.c.l.b16 %v495_v13  ;;  %v501_v16 = vsel %vm496_vm1, %v495_v13, 0 }
  0x9a   : > { %510 = vmatpush.bf16.xpose.msra.mxu2 %v501_v16  ;;  %v557_v17 = vpack.c.b16 %v556_v14, %v556_v14 }
  0x9b   : > { %v1233_v18 = vpack.c.b16 %v530_v15, %v530_v15  ;;  %v456_v19 = vpop.f32.mrf.mxu0 }
  0x9c   : > { %v492_v20 = vpop.f32.mrf.mxu1  ;;  %558 = vrot.lane.b32.xlu2 %v557_v17, %s1112_s26 }
  0x9d   : > { %532 = vrot.lane.b32.xlu1 %v1233_v18, %s1111_s25 }
  0xa1   : > { %956 = vmatmul.msk.bf16.vlgmr.msra.gmra.mxu2 %vm496_vm1, %v494_v12 }
  0xa4   : > { %623 = vrot.lane.b32.xlu2 %v1233_v18, %s1113_s28 }
  0xa5   : > { %560 = vrot.lane.b32.xlu1 %v1233_v18, %s1112_s26 }
  0xac   : > { %684 = vrot.lane.b32.xlu2 %v557_v17, %s1114_s29 }
  0xad   : > { %621 = vrot.lane.b32.xlu1 %v557_v17, %s1113_s28 }
  0xf6   : > { %v559_v21 = vpop.permute.xlu2 %558 }
  0xfe   : > { %v624_v22 = vpop.permute.xlu2 %623 }
  0xff   : > { %v629_v23 = vsel %vm496_vm1, %v624_v22, 0 }
 0x100   : > { %638 = vmatpush.bf16.xpose.msrb.mxu1 %v629_v23 }
 0x106   : > { %v685_v42 = vpop.permute.xlu2 %684 }
 0x10f   : > { %v533_v24 = vpop.permute.xlu1 %532 }
 0x110   : > { %v539_v25 = vsel %vm537_vm2, %v533_v24, 0 }
 0x111   : > { %548 = vmatpush.bf16.msra.mxu3 %v539_v25 }
 0x117   : > { %v561_v26 = vpop.permute.xlu1 %560 }
 0x118   : > { %v566_v27 = vsel %vm496_vm1, %v561_v26, 0 }
 0x119   : > { %575 = vmatpush.bf16.xpose.msrb.mxu3 %v566_v27 }
 0x11f   : > { %v622_v28 = vpop.permute.xlu1 %621 }
 0x120   : > { %960 = vmatmul.msk.bf16.vlgmr.msrb.gmra.mxu1 %vm496_vm1, %v622_v28 }
 0x124   : > { %v512_v29 = vpop.f32.mrf.mxu2 }
 0x125   : > { %v516_v30 = vmul.f32 0.35355338, %v512_v29 }
 0x127   : > { %v517_v31 = vsel %vm496_vm1, %v516_v30, -inf }
 0x128   : > { %518 = vmax.xlane.f32.xlu0 %v517_v31 }
 0x12c   : > { %v514_v32 = vpop.f32.mrf.mxu2 }
 0x19b   : > { %v519_v33 = vpop.xlane.xlu0 %518 }
 0x19c   : > { %v520_v34 = vsub.f32 %v516_v30, %v519_v33 }
 0x19d   : > { %v640_v35 = vpop.f32.mrf.mxu1 }
 0x19e   : > { %v521_v36 = vmul.f32 1.442695, %v520_v34  ;;  %v644_v37 = vmul.f32 0.35355338, %v640_v35  ;;  %v980_v35 = vld [vmem:[%s1303_s6 + $0x8] sm:$0xff] }
 0x19f   : > { %778 = vmatpush.bf16.msra.mxu1 %v980_v35 }
 0x1a0   : > { %1032 = vpow2.f32 %v521_v36  ;;  %v645_v38 = vsel %vm496_vm1, %v644_v37, -inf  ;;  %v979_v36 = vld [vmem:[%s1303_s6] sm:$0xff] }
 0x1a1   : > { %646 = vmax.xlane.f32.xlu2 %v645_v38 }
 0x1a3   : > { %779 = vmatpush.bf16.msra.mxu1 %v979_v36 }
 0x1a5   : > { %v642_v39 = vpop.f32.mrf.mxu1 }
 0x1a6   : > { %v1033_v40 = vpop.eup %1032 }
 0x1a7   : > { %v523_v41 = vsel %vm496_vm1, %v1033_v40, 0.0 }
 0x1a8   : > { %524 = vadd.xlane.f32.xlu0 %v523_v41 }
 0x1bc   : > { %686 = vrot.lane.b32.xlu0 %v1233_v18, %s1114_s29 }
 0x214   : > { %v647_v43 = vpop.xlane.xlu2 %646 }
 0x215   : > { %v648_v44 = vsub.f32 %v644_v37, %v647_v43  ;;  %v785_v43 = vunpack.c.l.bf16 %v1221_v4 }
 0x217   : > { %v649_v45 = vmul.f32 1.442695, %v648_v44 }
 0x219   : > { %1034 = vpow2.f32 %v649_v45 }
 0x21b   : > { %v525_v46 = vpop.xlane.xlu0 %524 }
 0x21c   : > { %1036 = vrcp.f32 %v525_v46 }
 0x21f   : > { %v1035_v47 = vpop.eup %1034 }
 0x220   : > { %v651_v48 = vsel %vm496_vm1, %v1035_v47, 0.0 }
 0x221   : > { %652 = vadd.xlane.f32.xlu2 %v651_v48 }
 0x222   : > { %v1037_v49 = vpop.eup %1036 }
 0x223   : > { %v527_v50 = vmul.f32 %v1037_v49, %v1033_v40  ;;  %v1121_v49 = vmov 32.0  }
 0x225   : > { %v528_v51 = vpack.c.bf16 %v527_v50, %v527_v50 }
 0x227   : > { %957 = vmatmul.msk.bf16.vlgmr.msra.gmra.mxu3 %vm496_vm1, %v528_v51 }
 0x22e   : > { %v687_v52 = vpop.permute.xlu0 %686 }
 0x22f   : > { %v692_v53 = vsel %vm496_vm1, %v687_v52, 0 }
 0x230   : > { %701 = vmatpush.bf16.xpose.msra.mxu3 %v692_v53 }
 0x237   : > { %958 = vmatmul.msk.bf16.vlgmr.msrb.gmra.mxu3 %vm496_vm1, %v559_v21 }
 0x247   : > { %962 = vmatmul.msk.bf16.vlgmr.msra.gmra.mxu3 %vm496_vm1, %v685_v42  ;;  %v1029_v42 = vld [vmem:[%s1304_s7] ss:$0 sm:$0xff] }
 0x294   : > { %v653_v13 = vpop.xlane.xlu2 %652 }
 0x2aa   : > { %v550_v54 = vpop.f32.mrf.mxu3 }
 0x2ab   : > { %554 = vst.msk [vmem:[#allocation2] sm:$0xff] %vm496_vm1, %v550_v54 }
 0x2b2   : > { %v552_v55 = vpop.f32.mrf.mxu3 }
 0x2ba   : > { %v577_v56 = vpop.f32.mrf.mxu3 }
 0x2bb   : > { %v581_v57 = vmul.f32 0.35355338, %v577_v56 }
 0x2bd   : > { %v582_v58 = vsel %vm496_vm1, %v581_v57, -inf }
 0x2be   : > { %583 = vmax.xlane.f32.xlu1 %v582_v58 }
 0x2c2   : > { %v579_v59 = vpop.f32.mrf.mxu3 }
 0x2ca   : > { %v703_v60 = vpop.f32.mrf.mxu3 }
 0x2cb   : > { %v707_v61 = vmul.f32 0.35355338, %v703_v60 }
 0x2cd   : > { %v708_v62 = vsel %vm496_vm1, %v707_v61, -inf }
 0x2ce   : > { %709 = vmax.xlane.f32.xlu0 %v708_v62 }
 0x2d2   : > { %v705_v63 = vpop.f32.mrf.mxu3 }
 0x2d7   : > { %594 = vrot.lane.b32.xlu1 %v1233_v18, %s1115_s30  ;;  %s417_s30 = scalar_lea.vmem %s1307_s10, %s1205_s27 }
 0x331   : > { %v584_v0 = vpop.xlane.xlu1 %583 }
 0x332   : > { %v585_v1 = vsub.f32 %v581_v57, %v584_v0 }
 0x334   : > { %v586_v2 = vmul.f32 1.442695, %v585_v1 }
 0x336   : > { %1038 = vpow2.f32 %v586_v2 }
 0x33c   : > { %v1039_v3 = vpop.eup %1038 }
 0x33d   : > { %v588_v5 = vsel %vm496_vm1, %v1039_v3, 0.0 }
 0x33e   : > { %589 = vadd.xlane.f32.xlu2 %v588_v5 }
 0x341   : > { %v710_v6 = vpop.xlane.xlu0 %709 }
 0x342   : > { %v711_v7 = vsub.f32 %v707_v61, %v710_v6  ;;  %v1030_v6 = vld [vmem:[%s1305_s8] ss:$0 sm:$0xff] }
 0x344   : > { %v712_v8 = vmul.f32 1.442695, %v711_v7 }
 0x346   : > { %1040 = vpow2.f32 %v712_v8  ;;  %v1031_v8 = vld [vmem:[#allocation3] ss:$0 sm:$0xff] }
 0x347   : > { %1042 = vrcp.f32 %v653_v13 }
 0x349   : > { %v595_v9 = vpop.permute.xlu1 %594 }
 0x34a   : > { %v600_v10 = vsel %vm537_vm2, %v595_v9, 0 }
 0x34b   : > { %609 = vmatpush.bf16.msrb.mxu0 %v600_v10 }
 0x34c   : > { %v1041_v11 = vpop.eup %1040 }
 0x34d   : > { %v714_v12 = vsel %vm496_vm1, %v1041_v11, 0.0  ;;  %v1043_v15 = vpop.eup %1042 }
 0x34e   : > { %715 = vadd.xlane.f32.xlu0 %v714_v12  ;;  %v655_v17 = vmul.f32 %v1043_v15, %v1035_v47 }
 0x350   : > { %v656_v23 = vpack.c.bf16 %v655_v17, %v655_v17 }
 0x356   : > { %657 = vrot.lane.b32.xlu2 %v1233_v18, %s1116_s11 }
 0x362   : > { %720 = vrot.lane.b32.xlu0 %v1233_v18, %s1117_s12 }
 0x3b1   : > { %v590_v14 = vpop.xlane.xlu2 %589 }
 0x3b2   : > { %1044 = vrcp.f32 %v590_v14 }
 0x3b8   : > { %v1045_v16 = vpop.eup %1044 }
 0x3b9   : > { %v592_v19 = vmul.f32 %v1045_v16, %v1039_v3  ;;  %v658_v20 = vpop.permute.xlu2 %657 }
 0x3ba   : > { %v663_v21 = vsel %vm537_vm2, %v658_v20, 0 }
 0x3bb   : > { %672 = vmatpush.bf16.msrb.mxu2 %v663_v21  ;;  %v593_v22 = vpack.c.bf16 %v592_v19, %v592_v19 }
 0x3bd   : > { %959 = vmatmul.msk.bf16.vlgmr.msrb.gmra.mxu0 %vm496_vm1, %v593_v22 }
 0x3be   : > { %961 = vmatmul.msk.bf16.vlgmr.msrb.gmra.mxu2 %vm496_vm1, %v656_v23 }
 0x3c1   : > { %v716_v24 = vpop.xlane.xlu0 %715 }
 0x3c2   : > { %1046 = vrcp.f32 %v716_v24 }
 0x3c3   : > { %1048 = vrcp.f32 %v1121_v49 }
 0x3c8   : > { %v1047_v18 = vpop.eup %1046 }
 0x3c9   : > { %v718_v25 = vmul.f32 %v1047_v18, %v1041_v11  ;;  %v1049_v50 = vpop.eup %1048 }
 0x3ca   : > { %v793_v51 = vmul.f32 32.0, %v1049_v50  ;;  %vm797_vm6 = vweird.f32 %v1049_v50 }
 0x3cb   : > { %v719_v28 = vpack.c.bf16 %v718_v25, %v718_v25 }
 0x3cc   : > { %v794_v52 = vsub.f32 1.0, %v793_v51 }
 0x3ce   : > { %v795_v53 = vmul.f32 %v1049_v50, %v794_v52 }
 0x3d0   : > { %v796_v54 = vadd.f32 %v1049_v50, %v795_v53 }
 0x3d2   : > { %v798_v55 = vsel %vm797_vm6, %v1049_v50, %v796_v54 }
 0x3d4   : > { %v721_v26 = vpop.permute.xlu0 %720 }
 0x3d5   : > { %v726_v27 = vsel %vm537_vm2, %v721_v26, 0 }
 0x3d6   : > { %735 = vmatpush.bf16.msra.mxu0 %v726_v27 }
 0x3d9   : > { %963 = vmatmul.msk.bf16.vlgmr.msra.gmra.mxu0 %vm496_vm1, %v719_v28 }
 0x43a   : > { %v611_v29 = vpop.f32.mrf.mxu0 }
 0x43b   : > { %616 = vrot.lane.b32.xlu1 %v611_v29, %s1118_s16 }
 0x441   : > { %v674_v30 = vpop.f32.mrf.mxu2 }
 0x442   : > { %v613_v31 = vpop.f32.mrf.mxu0 }
 0x443   : > { %679 = vrot.lane.b32.xlu1 %v674_v30, %s1119_s18 }
 0x449   : > { %v676_v32 = vpop.f32.mrf.mxu2 }
 0x456   : > { %v737_v33 = vpop.f32.mrf.mxu0 }
 0x457   : > { %742 = vrot.lane.b32.xlu2 %v737_v33, %s1120_s19 }
 0x45e   : > { %v739_v34 = vpop.f32.mrf.mxu0 }
 0x4ad   : > { %v617_v37 = vpop.permute.xlu1 %616 }
 0x4ae   : > { %620 = vst.msk [vmem:[#allocation2] sm:$0xff] %vm619_vm3, %v617_v37 }
 0x4b1   : > { %v743_v39 = vpop.permute.xlu2 %742 }
 0x4b5   : > { %v680_v38 = vpop.permute.xlu1 %679 }
 0x4b6   : > { %683 = vst.msk [vmem:[#allocation2] sm:$0xff] %vm682_vm4, %v680_v38 }
 0x4b7   : > { %746 = vst.msk [vmem:[#allocation2] sm:$0xff] %vm745_vm5, %v743_v39 }
 0x4be   : > { %v747_v40 = vld [vmem:[#allocation2] sm:$0xff] }
 0x4bf   : > { %v748_v41 = vpack.c.bf16 %v747_v40, %v747_v40 }
 0x4c1   : > { %972 = vmatmul.msk.bf16.vlgmr.msra.gmra.mxu1 %vm441_vm0, %v748_v41 }
 0x53e   : > { %v781_v44 = vpop.f32.mrf.mxu1 }
 0x53f   : > { %v782_v45 = vadd.f32 %v1029_v42, %v781_v44 }
 0x541   : > { %v786_v46 = vadd.f32 %v785_v43, %v782_v45 }
 0x543   : > { %v789_v47 = vsel %vm441_vm0, %v786_v46, 0.0 }
 0x544   : > { %790 = vadd.xlane.f32.xlu0 %v789_v47 }
 0x546   : > { %v783_v48 = vpop.f32.mrf.mxu1 }
 0x5b7   : > { %v791_v56 = vpop.xlane.xlu0 %790 }
 0x5b8   : > { %v799_v57 = vmul.f32 %v798_v55, %v791_v56 }
 0x5ba   : > { %v800_v58 = vsub.f32 %v786_v46, %v799_v57 }
 0x5bc   : > { %v801_v4 = vmul.f32 %v800_v58, %v800_v58 }
 0x5be   : > { %v802_v59 = vsel %vm441_vm0, %v801_v4, 0.0 }
 0x5bf   : > { %803 = vadd.xlane.f32.xlu1 %v802_v59 }
 0x632   : > { %v804_v60 = vpop.xlane.xlu1 %803 }
 0x633   : > { %v805_v61 = vmul.f32 %v804_v60, %v798_v55 }
 0x635   : > { %v806_v62 = vadd.f32 1e-05, %v805_v61 }
 0x637   : > { %1050 = vrsqrt.f32 %v806_v62  ;;  %vm813_vm8 = vweird.f32 %v806_v62 }
 0x63d   : > { %v1051_v63 = vpop.eup %1050 }
 0x63e   : > { %v808_v0 = vmul.f32 %v1051_v63, %v806_v62  ;;  %vm814_vm7 = vweird.f32 %v1051_v63 }
 0x63f   : > { %vm815_vm9 = vmor %vm813_vm8, %vm814_vm7 }
 0x640   : > { %v809_v1 = vmul.f32 %v1051_v63, %v808_v0 }
 0x642   : > { %v810_v2 = vmul.f32 0.5, %v809_v1 }
 0x644   : > { %v811_v3 = vsub.f32 1.5, %v810_v2 }
 0x646   : > { %v812_v5 = vmul.f32 %v1051_v63, %v811_v3 }
 0x648   : > { %v816_v7 = vsel %vm815_vm9, %v1051_v63, %v812_v5 }
 0x649   : > { %v817_v9 = vmul.f32 %v816_v7, %v800_v58 }
 0x64b   : > { %v821_v10 = vmul.f32 %v1030_v6, %v817_v9 }
 0x64d   : > { %v825_v11 = vadd.f32 %v1031_v8, %v821_v10 }
 0x64f   : > { %v826_v12 = vpack.c.bf16 %v825_v11, %v825_v11 }
 0x651   : > { %828 = vst.msk [vmem:[%s417_s30] sm:$0xf] %vm827_vm10, %v826_v12 }
 0x652 PF: > { %s21_s15 = sadd.s32 1, %s1108_s15   ;;  %s1308_s13 = smov %s1104_s14 }
 0x653   : > { %p18_p8 = scmp.ge.s32.totalorder %s21_s15, 4   ;;  %s1309_s14 = smov %s1311_s17 }
 0x655   :  { %20 = sbr.rel (!%p18_p8) target bundleno = 2 (0x2), region = 98 }
 0x65a   :  { %854 = vsyncpa [#allocation4], 1 }
 0x65b   :  { %856 = vsyncpa [#allocation4 + $0x1], 1 }

// kernel: transformer_decoder_forward.10
= control target key start
LH: loop header
LB: loop body
LE: loop exit
PB: predicated region body
PF: predicated region fallthrough
CT: control target
= control target key end

     0   :  { %vm31_vm0 = vcmask 261120   ;;  %v274_v7 = vmov 0.0   ;;  %vm116_vm1 = vcmask 523264   ;;  %v275_v34 = vmov 32.0   ;;  %s367_s1 = inlined_call_operand.vmem [shape: bf16[32,64], index: 1, kind: input, shape index: {}]   ;;  %s368_s2 = inlined_call_operand.vmem [shape: f32[1,64], index: 2, kind: input, shape index: {}]   ;;  %s369_s0 = inlined_call_operand.vmem [shape: bf16[16,32], index: 0, kind: input, shape index: {}]   ;;  %s370_s3 = inlined_call_operand.vmem [shape: bf16[64,32], index: 3, kind: input, shape index: {}]   ;;  %s371_s4 = inlined_call_operand.vmem [shape: f32[1,32], index: 4, kind: input, shape index: {}]   ;;  %s372_s5 = inlined_call_operand.vmem [shape: f32[1,32], index: 5, kind: input, shape index: {}]   ;;  %s373_s6 = inlined_call_operand.vmem [shape: f32[1,32], index: 6, kind: input, shape index: {}]   ;;  %s374_s7 = inlined_call_operand.vmem [shape: bf16[16,32], index: 7, kind: output, shape index: {}]  }
   0x1   :  { %v257_v0 = vld [vmem:[%s367_s1 + $0x8] sm:$0xff]  ;;  %v256_v1 = vld [vmem:[%s367_s1] sm:$0xff]  ;;  %v261_v3 = vld [vmem:[%s370_s3 + $0x18] sm:$0xff]  ;;  %32 = vst.msk [vmem:[#allocation2] sm:$0xff] %vm31_vm0, %v274_v7  ;;  %268 = vrcp.f32 %v275_v34  ;;  %vm218_vm7 = vcmask 257024  }
   0x2   :  { %71 = vmatpush.bf16.msra.mxu0 %v257_v0  ;;  %v255_v2 = vld [vmem:[%s369_s0] sm:$0xff]  ;;  %124 = vmatpush.bf16.msra.mxu1 %v261_v3  ;;  %v260_v4 = vld [vmem:[%s370_s3 + $0x10] sm:$0xff]  ;;  %v259_v5 = vld [vmem:[%s370_s3 + $0x8] sm:$0xff]  ;;  %33 = vst.msk [vmem:[#allocation2 + $0x8] sm:$0xff] %vm31_vm0, %v274_v7 }
   0x3   :  { %v258_v6 = vld [vmem:[%s370_s3] sm:$0xff] }
   0x4   :  { %v264_v9 = vld [vmem:[%s368_s2] ss:$0 sm:$0xff] }
   0x5   :  { %v34_v20 = vld [vmem:[%s369_s0] sm:$0xff]  }
   0x6   :  { %72 = vmatpush.bf16.msra.mxu0 %v256_v1  ;;  %125 = vmatpush.bf16.msra.mxu1 %v260_v4  ;;  %v265_v21 = vld [vmem:[%s371_s4] ss:$0 sm:$0xff]  ;;  %v149_v24 = vunpack.c.l.bf16 %v34_v20  ;;  %v150_v29 = vunpack.c.h.bf16 %v34_v20 }
   0x7   :  { %v269_v35 = vpop.eup %268  ;;  %v266_v1 = vld [vmem:[%s372_s5] ss:$0 sm:$0xff] }
   0x8   :  { %v81_v16 = vld [vmem:[#allocation2] sm:$0xff]  ;;  %v162_v36 = vmul.f32 32.0, %v269_v35  ;;  %vm166_vm2 = vweird.f32 %v269_v35 }
   0x9   :  { %237 = vmatmul.msk.bf16.vlgmr.msra.gmra.mxu0 %vm31_vm0, %v255_v2  ;;  %v82_v19 = vld [vmem:[#allocation2 + $0x8] sm:$0xff]  ;;  %v267_v4 = vld [vmem:[%s373_s6] ss:$0 sm:$0xff] }
   0xa   :  { %126 = vmatpush.bf16.msra.mxu1 %v259_v5  ;;  %v163_v37 = vsub.f32 1.0, %v162_v36 }
   0xc   :  { %v164_v38 = vmul.f32 %v269_v35, %v163_v37 }
   0xe   :  { %127 = vmatpush.bf16.msra.mxu1 %v258_v6  ;;  %v165_v39 = vadd.f32 %v269_v35, %v164_v38 }
  0x10   :  { %v167_v40 = vsel %vm166_vm2, %v269_v35, %v165_v39 }
  0x86   :  { %v74_v8 = vpop.f32.mrf.mxu0 }
  0x87   :  { %v75_v10 = vadd.f32 %v264_v9, %v74_v8 }
  0x89   :  { %v79_v13 = vmax.f32 %v75_v10, 0.0 }
  0x8e   :  { %v76_v11 = vpop.f32.mrf.mxu0 }
  0x8f   :  { %v77_v12 = vadd.f32 %v264_v9, %v76_v11 }
  0x91   :  { %v80_v14 = vmax.f32 %v77_v12, 0.0 }
  0x93   :  { %v83_v15 = vpack.c.bf16 %v80_v14, %v79_v13 }
  0x95   :  { %254 = vmatmul.msk.bf16.vlgmr.msra.gmra.mxu1 %vm116_vm1, %v83_v15 }
 0x112   :  { %v129_v17 = vpop.f32.mrf.mxu1 }
 0x113   :  { %v134_v18 = vadd.f32 %v129_v17, %v81_v16 }
 0x115   :  { %136 = vst.msk [vmem:[#allocation2] sm:$0xff] %vm31_vm0, %v134_v18 }
 0x11a   :  { %v131_v22 = vpop.f32.mrf.mxu1 }
 0x11b   :  { %v135_v23 = vadd.f32 %v131_v22, %v82_v19 }
 0x11c   :  { %v141_v25 = vld [vmem:[#allocation2] sm:$0xff] }
 0x11d   :  { %137 = vst.msk [vmem:[#allocation2 + $0x8] sm:$0xff] %vm31_vm0, %v135_v23  ;;  %v147_v26 = vadd.f32 %v265_v21, %v141_v25 }
 0x11f   :  { %v151_v27 = vadd.f32 %v149_v24, %v147_v26 }
 0x121   :  { %v155_v28 = vsel %vm31_vm0, %v151_v27, 0.0 }
 0x122   :  { %156 = vadd.xlane.f32.xlu0 %v155_v28 }
 0x124   :  { %v142_v30 = vld [vmem:[#allocation2 + $0x8] sm:$0xff] }
 0x125   :  { %v148_v31 = vadd.f32 %v265_v21, %v142_v30 }
 0x127   :  { %v152_v32 = vadd.f32 %v150_v29, %v148_v31 }
 0x129   :  { %v158_v33 = vsel %vm31_vm0, %v152_v32, 0.0 }
 0x12a   :  { %159 = vadd.xlane.f32.xlu0 %v158_v33 }
 0x195   :  { %v157_v41 = vpop.xlane.xlu0 %156 }
 0x196   :  { %v168_v42 = vmul.f32 %v167_v40, %v157_v41 }
 0x198   :  { %v170_v43 = vsub.f32 %v151_v27, %v168_v42 }
 0x19a   :  { %v172_v44 = vmul.f32 %v170_v43, %v170_v43 }
 0x19c   :  { %v174_v45 = vsel %vm31_vm0, %v172_v44, 0.0 }
 0x19d   :  { %175 = vadd.xlane.f32.xlu1 %v174_v45  ;;  %v160_v46 = vpop.xlane.xlu0 %159 }
 0x19e   :  { %v169_v47 = vmul.f32 %v167_v40, %v160_v46 }
 0x1a0   :  { %v171_v48 = vsub.f32 %v152_v32, %v169_v47 }
 0x1a2   :  { %v173_v49 = vmul.f32 %v171_v48, %v171_v48 }
 0x1a4   :  { %v177_v50 = vsel %vm31_vm0, %v173_v49, 0.0 }
 0x1a5   :  { %178 = vadd.xlane.f32.xlu1 %v177_v50 }
 0x210   :  { %v176_v51 = vpop.xlane.xlu1 %175 }
 0x211   :  { %v180_v52 = vmul.f32 %v176_v51, %v167_v40 }
 0x213   :  { %v182_v53 = vadd.f32 1e-05, %v180_v52 }
 0x215   :  { %270 = vrsqrt.f32 %v182_v53  ;;  %vm190_vm4 = vweird.f32 %v182_v53 }
 0x218   :  { %v179_v54 = vpop.xlane.xlu1 %178 }
 0x219   :  { %v181_v55 = vmul.f32 %v179_v54, %v167_v40 }
 0x21b   :  { %v271_v56 = vpop.eup %270  ;;  %v183_v57 = vadd.f32 1e-05, %v181_v55 }
 0x21c   :  { %v185_v58 = vmul.f32 %v271_v56, %v182_v53  ;;  %vm191_vm3 = vweird.f32 %v271_v56 }
 0x21d   :  { %272 = vrsqrt.f32 %v183_v57  ;;  %vm192_vm5 = vmor %vm190_vm4, %vm191_vm3  ;;  %vm200_vm8 = vweird.f32 %v183_v57 }
 0x21e   :  { %v186_v59 = vmul.f32 %v271_v56, %v185_v58 }
 0x220   :  { %v187_v60 = vmul.f32 0.5, %v186_v59 }
 0x222   :  { %v188_v61 = vsub.f32 1.5, %v187_v60 }
 0x223   :  { %v273_v62 = vpop.eup %272 }
 0x224   :  { %v189_v63 = vmul.f32 %v271_v56, %v188_v61  ;;  %v195_v0 = vmul.f32 %v273_v62, %v183_v57  ;;  %vm201_vm6 = vweird.f32 %v273_v62 }
 0x225   :  { %vm202_vm9 = vmor %vm200_vm8, %vm201_vm6 }
 0x226   :  { %v193_v2 = vsel %vm192_vm5, %v271_v56, %v189_v63  ;;  %v196_v3 = vmul.f32 %v273_v62, %v195_v0 }
 0x227   :  { %v204_v5 = vmul.f32 %v193_v2, %v170_v43 }
 0x228   :  { %v197_v6 = vmul.f32 0.5, %v196_v3 }
 0x229   :  { %v209_v7 = vmul.f32 %v266_v1, %v204_v5 }
 0x22a   :  { %v198_v8 = vsub.f32 1.5, %v197_v6 }
 0x22b   :  { %v214_v9 = vadd.f32 %v267_v4, %v209_v7 }
 0x22c   :  { %v199_v10 = vmul.f32 %v273_v62, %v198_v8 }
 0x22d   :  { %v216_v11 = vpack.c.bf16 %v214_v9, %v214_v9 }
 0x22e   :  { %v203_v12 = vsel %vm202_vm9, %v273_v62, %v199_v10 }
 0x22f   :  { %219 = vst.msk [vmem:[%s374_s7] sm:$0xf] %vm218_vm7, %v216_v11  ;;  %v205_v13 = vmul.f32 %v203_v12, %v171_v48 }
 0x231   :  { %v210_v14 = vmul.f32 %v266_v1, %v205_v13 }
 0x233   :  { %v215_v15 = vadd.f32 %v267_v4, %v210_v14 }
 0x235   :  { %v217_v16 = vpack.c.bf16 %v215_v15, %v215_v15 }
 0x237   :  { %220 = vst.msk [vmem:[%s374_s7 + $0x4] sm:$0xf] %vm218_vm7, %v217_v16 }

// kernel: transformer_decoder_forward.9
= control target key start
LH: loop header
LB: loop body
LE: loop exit
PB: predicated region body
PF: predicated region fallthrough
CT: control target
= control target key end

     0   :  { %s1101_s13 = smov 0   ;;  %s1103_s14 = smov 0   ;;  %s1220_s0 = inlined_call_operand.vmem [shape: bf16[2,8,32], index: 0, kind: input, shape index: {}]   ;;  %s1221_s1 = inlined_call_operand.vmem [shape: bf16[2,8,32], index: 1, kind: input, shape index: {}]   ;;  %s1222_s2 = inlined_call_operand.vmem [shape: bf16[32,32], index: 2, kind: input, shape index: {}]   ;;  %s1223_s3 = inlined_call_operand.vmem [shape: f32[1,32], index: 3, kind: input, shape index: {}]   ;;  %s1224_s4 = inlined_call_operand.vmem [shape: bf16[32,64], index: 4, kind: input, shape index: {}]   ;;  %s1225_s5 = inlined_call_operand.vmem [shape: f32[1,64], index: 5, kind: input, shape index: {}]   ;;  %s1226_s6 = inlined_call_operand.vmem [shape: bf16[32,32], index: 6, kind: input, shape index: {}]   ;;  %s1227_s7 = inlined_call_operand.vmem [shape: f32[1,32], index: 7, kind: input, shape index: {}]   ;;  %s1228_s8 = inlined_call_operand.vmem [shape: f32[1,32], index: 8, kind: input, shape index: {}]   ;;  %s1229_s9 = inlined_call_operand.vmem [shape: f32[1,32], index: 9, kind: input, shape index: {}]   ;;  %s1230_s10 = inlined_call_operand.vmem [shape: bf16[2,8,32], index: 10, kind: output, shape index: {}]  }
   0x1   :  { %s1105_s15 = smov 0  }
   0x2 LB: > { %s32_s16 = sadd.s32 1, %s1029_s14  ;;  %p904_p0 = scmp.ge.s32.totalorder %s1033_s15, 1  ;;  %s1033_s15 = sphi %s1105_s15, %s20_s15   ;;  %s1029_s14 = sphi %s1103_s14, %s1232_s14   ;;  %s1025_s13 = sphi %s1101_s13, %s1231_s13  }
   0x3   : > { %p34_p1 = scmp.ge.s32.totalorder %s32_s16, 2  ;;  %p339_p2 = scmp.lt.s32.totalorder %s1033_s15, 3 }
   0x5   : > { %s1234_s16 = smov (%p34_p1, %s32_s16), 0  ;;  %p340_p3 = pnand %p904_p0, %p339_p2 }
   0x6   : > { %p385_p4 = scmp.lt.s32.totalorder (!%p340_p3), %s1025_s13, 1  ;;  %s1035_s19 = smov (!%p340_p3), 96  }
   0x7   : > { %343 = sbr.rel (%p340_p3) target bundleno = 1616 (0x650), region = 60  ;;  %s1036_s20 = smov (!%p340_p3), 120  }
   0x8   : > { %s1037_s21 = smov (!%p340_p3), 112   ;;  %s1038_s22 = smov (!%p340_p3), 104  }
   0x9   : > { %s1039_s23 = smov (!%p340_p3), 88   ;;  %s1040_s24 = smov (!%p340_p3), 80  }
   0xa   : > { %s1041_s26 = smov (!%p340_p3), 72   ;;  %s1042_s27 = smov (!%p340_p3), 8  }
   0xb   : > { %s1044_s29 = smov (!%p340_p3), 24  }
   0xc   : > { %v946_v0 = vld [vmem:[%s1222_s2 + $0x8] sm:$0xff]  ;;  %v945_v2 = vld [vmem:[%s1222_s2] sm:$0xff]  ;;  %s1236_s13 = smov (!%p385_p4, %s1025_s13), 1  ;;  %vm426_vm0 = vcmask 261120   ;;  %vm481_vm1 = vcmask 64512   ;;  %vm522_vm2 = vcmask 1043456  }
   0xd   : > { %v948_v1 = vld [vmem:[%s1224_s4 + $0x8] sm:$0xff]  ;;  %436 = vmatpush.bf16.msra.mxu0 %v946_v0  ;;  %v947_v3 = vld [vmem:[%s1224_s4] sm:$0xff]  ;;  %s1131_s25 = sshll.u32 %s1236_s13, 2  ;;  %vm604_vm3 = vcmask 130112   ;;  %vm667_vm4 = vcmask 195712   ;;  %vm730_vm5 = vcmask 261312  }
   0xe   : > { %472 = vmatpush.bf16.msra.mxu1 %v948_v1  ;;  %s391_s28 = scalar_lea.vmem %s1220_s0, %s1131_s25  ;;  %s395_s11 = scalar_lea.vmem %s1221_s1, %s1131_s25  ;;  %v986_v6 = vld [vmem:[%s1223_s3] ss:$0 sm:$0xff]  ;;  %vm812_vm10 = vcmask 257024  }
   0xf   : > { %v1137_v4 = vld [vmem:[%s391_s28] sm:$0xf]  ;;  %s1043_s28 = smov 16  }
  0x10   : > { %v405_v5 = vld [vmem:[%s395_s11] sm:$0xf] }
  0x11   : > { %437 = vmatpush.bf16.msra.mxu0 %v945_v2  ;;  %v987_v7 = vld [vmem:[%s1225_s5] ss:$0 sm:$0xff] }
  0x12   : > { %473 = vmatpush.bf16.msra.mxu1 %v947_v3 }
  0x14   : > { %916 = vmatmul.msk.bf16.vlgmr.msra.gmra.mxu0 %vm426_vm0, %v1137_v4 }
  0x15   : > { %925 = vmatmul.msk.bf16.vlgmr.msra.gmra.mxu1 %vm426_vm0, %v405_v5 }
  0x91   : > { %v439_v8 = vpop.f32.mrf.mxu0 }
  0x92   : > { %v475_v9 = vpop.f32.mrf.mxu1  ;;  %v440_v10 = vadd.f32 %v986_v6, %v439_v8 }
  0x93   : > { %v476_v11 = vadd.f32 %v987_v7, %v475_v9 }
  0x94   : > { %v479_v12 = vpack.c.bf16 %v440_v10, %v440_v10 }
  0x95   : > { %v480_v13 = vpack.c.bf16 %v476_v11, %v476_v11 }
  0x96   : > { %v541_v14 = vunpack.c.l.b16 %v479_v12 }
  0x97   : > { %v515_v15 = vunpack.c.l.b16 %v480_v13  ;;  %v486_v16 = vsel %vm481_vm1, %v480_v13, 0 }
  0x98   : > { %495 = vmatpush.bf16.xpose.msra.mxu2 %v486_v16  ;;  %v542_v17 = vpack.c.b16 %v541_v14, %v541_v14 }
  0x99   : > { %v1153_v18 = vpack.c.b16 %v515_v15, %v515_v15  ;;  %v441_v19 = vpop.f32.mrf.mxu0 }
  0x9a   : > { %v477_v20 = vpop.f32.mrf.mxu1  ;;  %543 = vrot.lane.b32.xlu2 %v542_v17, %s1036_s20 }
  0x9b   : > { %517 = vrot.lane.b32.xlu1 %v1153_v18, %s1035_s19 }
  0x9f   : > { %926 = vmatmul.msk.bf16.vlgmr.msra.gmra.mxu2 %vm481_vm1, %v479_v12 }
  0xa2   : > { %608 = vrot.lane.b32.xlu2 %v1153_v18, %s1037_s21 }
  0xa3   : > { %545 = vrot.lane.b32.xlu1 %v1153_v18, %s1036_s20 }
  0xaa   : > { %669 = vrot.lane.b32.xlu2 %v542_v17, %s1038_s22 }
  0xab   : > { %606 = vrot.lane.b32.xlu1 %v542_v17, %s1037_s21 }
  0xf4   : > { %v544_v21 = vpop.permute.xlu2 %543 }
  0xfc   : > { %v609_v22 = vpop.permute.xlu2 %608 }
  0xfd   : > { %v614_v23 = vsel %vm481_vm1, %v609_v22, 0 }
  0xfe   : > { %623 = vmatpush.bf16.xpose.msrb.mxu1 %v614_v23 }
 0x104   : > { %v670_v42 = vpop.permute.xlu2 %669 }
 0x10d   : > { %v518_v24 = vpop.permute.xlu1 %517 }
 0x10e   : > { %v524_v25 = vsel %vm522_vm2, %v518_v24, 0 }
 0x10f   : > { %533 = vmatpush.bf16.msra.mxu3 %v524_v25 }
 0x115   : > { %v546_v26 = vpop.permute.xlu1 %545 }
 0x116   : > { %v551_v27 = vsel %vm481_vm1, %v546_v26, 0 }
 0x117   : > { %560 = vmatpush.bf16.xpose.msrb.mxu3 %v551_v27 }
 0x11d   : > { %v607_v28 = vpop.permute.xlu1 %606 }
 0x11e   : > { %930 = vmatmul.msk.bf16.vlgmr.msrb.gmra.mxu1 %vm481_vm1, %v607_v28 }
 0x122   : > { %v497_v29 = vpop.f32.mrf.mxu2 }
 0x123   : > { %v501_v30 = vmul.f32 0.35355338, %v497_v29 }
 0x125   : > { %v502_v31 = vsel %vm481_vm1, %v501_v30, -inf }
 0x126   : > { %503 = vmax.xlane.f32.xlu0 %v502_v31 }
 0x12a   : > { %v499_v32 = vpop.f32.mrf.mxu2 }
 0x199   : > { %v504_v33 = vpop.xlane.xlu0 %503 }
 0x19a   : > { %v505_v34 = vsub.f32 %v501_v30, %v504_v33 }
 0x19b   : > { %v625_v35 = vpop.f32.mrf.mxu1 }
 0x19c   : > { %v506_v36 = vmul.f32 1.442695, %v505_v34  ;;  %v629_v37 = vmul.f32 0.35355338, %v625_v35  ;;  %v950_v35 = vld [vmem:[%s1226_s6 + $0x8] sm:$0xff] }
 0x19d   : > { %763 = vmatpush.bf16.msra.mxu1 %v950_v35 }
 0x19e   : > { %991 = vpow2.f32 %v506_v36  ;;  %v630_v38 = vsel %vm481_vm1, %v629_v37, -inf  ;;  %v949_v36 = vld [vmem:[%s1226_s6] sm:$0xff] }
 0x19f   : > { %631 = vmax.xlane.f32.xlu2 %v630_v38 }
 0x1a1   : > { %764 = vmatpush.bf16.msra.mxu1 %v949_v36 }
 0x1a3   : > { %v627_v39 = vpop.f32.mrf.mxu1 }
 0x1a4   : > { %v992_v40 = vpop.eup %991 }
 0x1a5   : > { %v508_v41 = vsel %vm481_vm1, %v992_v40, 0.0 }
 0x1a6   : > { %509 = vadd.xlane.f32.xlu0 %v508_v41 }
 0x1ba   : > { %671 = vrot.lane.b32.xlu0 %v1153_v18, %s1038_s22 }
 0x212   : > { %v632_v43 = vpop.xlane.xlu2 %631 }
 0x213   : > { %v633_v44 = vsub.f32 %v629_v37, %v632_v43  ;;  %v770_v43 = vunpack.c.l.bf16 %v1137_v4 }
 0x215   : > { %v634_v45 = vmul.f32 1.442695, %v633_v44 }
 0x217   : > { %993 = vpow2.f32 %v634_v45 }
 0x219   : > { %v510_v46 = vpop.xlane.xlu0 %509 }
 0x21a   : > { %995 = vrcp.f32 %v510_v46 }
 0x21d   : > { %v994_v47 = vpop.eup %993 }
 0x21e   : > { %v636_v48 = vsel %vm481_vm1, %v994_v47, 0.0 }
 0x21f   : > { %637 = vadd.xlane.f32.xlu2 %v636_v48 }
 0x220   : > { %v996_v49 = vpop.eup %995 }
 0x221   : > { %v512_v50 = vmul.f32 %v996_v49, %v992_v40  ;;  %v1045_v49 = vmov 32.0  }
 0x223   : > { %v513_v51 = vpack.c.bf16 %v512_v50, %v512_v50 }
 0x225   : > { %927 = vmatmul.msk.bf16.vlgmr.msra.gmra.mxu3 %vm481_vm1, %v513_v51 }
 0x22c   : > { %v672_v52 = vpop.permute.xlu0 %671 }
 0x22d   : > { %v677_v53 = vsel %vm481_vm1, %v672_v52, 0 }
 0x22e   : > { %686 = vmatpush.bf16.xpose.msra.mxu3 %v677_v53 }
 0x235   : > { %928 = vmatmul.msk.bf16.vlgmr.msrb.gmra.mxu3 %vm481_vm1, %v544_v21 }
 0x245   : > { %932 = vmatmul.msk.bf16.vlgmr.msra.gmra.mxu3 %vm481_vm1, %v670_v42  ;;  %v988_v42 = vld [vmem:[%s1227_s7] ss:$0 sm:$0xff] }
 0x292   : > { %v638_v13 = vpop.xlane.xlu2 %637 }
 0x2a8   : > { %v535_v54 = vpop.f32.mrf.mxu3 }
 0x2a9   : > { %539 = vst.msk [vmem:[#allocation2] sm:$0xff] %vm481_vm1, %v535_v54 }
 0x2b0   : > { %v537_v55 = vpop.f32.mrf.mxu3 }
 0x2b8   : > { %v562_v56 = vpop.f32.mrf.mxu3 }
 0x2b9   : > { %v566_v57 = vmul.f32 0.35355338, %v562_v56 }
 0x2bb   : > { %v567_v58 = vsel %vm481_vm1, %v566_v57, -inf }
 0x2bc   : > { %568 = vmax.xlane.f32.xlu1 %v567_v58 }
 0x2c0   : > { %v564_v59 = vpop.f32.mrf.mxu3 }
 0x2c8   : > { %v688_v60 = vpop.f32.mrf.mxu3 }
 0x2c9   : > { %v692_v61 = vmul.f32 0.35355338, %v688_v60 }
 0x2cb   : > { %v693_v62 = vsel %vm481_vm1, %v692_v61, -inf }
 0x2cc   : > { %694 = vmax.xlane.f32.xlu0 %v693_v62 }
 0x2d0   : > { %v690_v63 = vpop.f32.mrf.mxu3 }
 0x2d5   : > { %579 = vrot.lane.b32.xlu1 %v1153_v18, %s1039_s23 }
 0x32f   : > { %v569_v0 = vpop.xlane.xlu1 %568 }
 0x330   : > { %v570_v1 = vsub.f32 %v566_v57, %v569_v0 }
 0x332   : > { %v571_v2 = vmul.f32 1.442695, %v570_v1 }
 0x334   : > { %997 = vpow2.f32 %v571_v2 }
 0x33a   : > { %v998_v3 = vpop.eup %997 }
 0x33b   : > { %v573_v5 = vsel %vm481_vm1, %v998_v3, 0.0 }
 0x33c   : > { %574 = vadd.xlane.f32.xlu2 %v573_v5 }
 0x33f   : > { %v695_v6 = vpop.xlane.xlu0 %694 }
 0x340   : > { %v696_v7 = vsub.f32 %v692_v61, %v695_v6  ;;  %v989_v6 = vld [vmem:[%s1228_s8] ss:$0 sm:$0xff] }
 0x342   : > { %v697_v8 = vmul.f32 1.442695, %v696_v7 }
 0x344   : > { %999 = vpow2.f32 %v697_v8  ;;  %v990_v8 = vld [vmem:[%s1229_s9] ss:$0 sm:$0xff] }
 0x345   : > { %1001 = vrcp.f32 %v638_v13 }
 0x347   : > { %v580_v9 = vpop.permute.xlu1 %579 }
 0x348   : > { %v585_v10 = vsel %vm522_vm2, %v580_v9, 0 }
 0x349   : > { %594 = vmatpush.bf16.msrb.mxu0 %v585_v10 }
 0x34a   : > { %v1000_v11 = vpop.eup %999 }
 0x34b   : > { %v699_v12 = vsel %vm481_vm1, %v1000_v11, 0.0  ;;  %v1002_v15 = vpop.eup %1001 }
 0x34c   : > { %700 = vadd.xlane.f32.xlu0 %v699_v12  ;;  %v640_v17 = vmul.f32 %v1002_v15, %v994_v47 }
 0x34e   : > { %v641_v23 = vpack.c.bf16 %v640_v17, %v640_v17 }
 0x354   : > { %642 = vrot.lane.b32.xlu2 %v1153_v18, %s1040_s24 }
 0x360   : > { %705 = vrot.lane.b32.xlu0 %v1153_v18, %s1041_s26  ;;  %s402_s26 = scalar_lea.vmem %s1230_s10, %s1131_s25 }
 0x3af   : > { %v575_v14 = vpop.xlane.xlu2 %574 }
 0x3b0   : > { %1003 = vrcp.f32 %v575_v14 }
 0x3b6   : > { %v1004_v16 = vpop.eup %1003 }
 0x3b7   : > { %v577_v19 = vmul.f32 %v1004_v16, %v998_v3  ;;  %v643_v20 = vpop.permute.xlu2 %642 }
 0x3b8   : > { %v648_v21 = vsel %vm522_vm2, %v643_v20, 0 }
 0x3b9   : > { %657 = vmatpush.bf16.msrb.mxu2 %v648_v21  ;;  %v578_v22 = vpack.c.bf16 %v577_v19, %v577_v19 }
 0x3bb   : > { %929 = vmatmul.msk.bf16.vlgmr.msrb.gmra.mxu0 %vm481_vm1, %v578_v22 }
 0x3bc   : > { %931 = vmatmul.msk.bf16.vlgmr.msrb.gmra.mxu2 %vm481_vm1, %v641_v23 }
 0x3bf   : > { %v701_v24 = vpop.xlane.xlu0 %700 }
 0x3c0   : > { %1005 = vrcp.f32 %v701_v24 }
 0x3c1   : > { %1007 = vrcp.f32 %v1045_v49 }
 0x3c6   : > { %v1006_v18 = vpop.eup %1005 }
 0x3c7   : > { %v703_v25 = vmul.f32 %v1006_v18, %v1000_v11  ;;  %v1008_v50 = vpop.eup %1007 }
 0x3c8   : > { %v778_v51 = vmul.f32 32.0, %v1008_v50  ;;  %vm782_vm6 = vweird.f32 %v1008_v50 }
 0x3c9   : > { %v704_v28 = vpack.c.bf16 %v703_v25, %v703_v25 }
 0x3ca   : > { %v779_v52 = vsub.f32 1.0, %v778_v51 }
 0x3cc   : > { %v780_v53 = vmul.f32 %v1008_v50, %v779_v52 }
 0x3ce   : > { %v781_v54 = vadd.f32 %v1008_v50, %v780_v53 }
 0x3d0   : > { %v783_v55 = vsel %vm782_vm6, %v1008_v50, %v781_v54 }
 0x3d2   : > { %v706_v26 = vpop.permute.xlu0 %705 }
 0x3d3   : > { %v711_v27 = vsel %vm522_vm2, %v706_v26, 0 }
 0x3d4   : > { %720 = vmatpush.bf16.msra.mxu0 %v711_v27 }
 0x3d7   : > { %933 = vmatmul.msk.bf16.vlgmr.msra.gmra.mxu0 %vm481_vm1, %v704_v28 }
 0x438   : > { %v596_v29 = vpop.f32.mrf.mxu0 }
 0x439   : > { %601 = vrot.lane.b32.xlu1 %v596_v29, %s1042_s27 }
 0x43f   : > { %v659_v30 = vpop.f32.mrf.mxu2 }
 0x440   : > { %v598_v31 = vpop.f32.mrf.mxu0 }
 0x441   : > { %664 = vrot.lane.b32.xlu1 %v659_v30, %s1043_s28 }
 0x447   : > { %v661_v32 = vpop.f32.mrf.mxu2 }
 0x454   : > { %v722_v33 = vpop.f32.mrf.mxu0 }
 0x455   : > { %727 = vrot.lane.b32.xlu2 %v722_v33, %s1044_s29 }
 0x45c   : > { %v724_v34 = vpop.f32.mrf.mxu0 }
 0x4ab   : > { %v602_v37 = vpop.permute.xlu1 %601 }
 0x4ac   : > { %605 = vst.msk [vmem:[#allocation2] sm:$0xff] %vm604_vm3, %v602_v37 }
 0x4af   : > { %v728_v39 = vpop.permute.xlu2 %727 }
 0x4b3   : > { %v665_v38 = vpop.permute.xlu1 %664 }
 0x4b4   : > { %668 = vst.msk [vmem:[#allocation2] sm:$0xff] %vm667_vm4, %v665_v38 }
 0x4b5   : > { %731 = vst.msk [vmem:[#allocation2] sm:$0xff] %vm730_vm5, %v728_v39 }
 0x4bc   : > { %v732_v40 = vld [vmem:[#allocation2] sm:$0xff] }
 0x4bd   : > { %v733_v41 = vpack.c.bf16 %v732_v40, %v732_v40 }
 0x4bf   : > { %942 = vmatmul.msk.bf16.vlgmr.msra.gmra.mxu1 %vm426_vm0, %v733_v41 }
 0x53c   : > { %v766_v44 = vpop.f32.mrf.mxu1 }
 0x53d   : > { %v767_v45 = vadd.f32 %v988_v42, %v766_v44 }
 0x53f   : > { %v771_v46 = vadd.f32 %v770_v43, %v767_v45 }
 0x541   : > { %v774_v47 = vsel %vm426_vm0, %v771_v46, 0.0 }
 0x542   : > { %775 = vadd.xlane.f32.xlu0 %v774_v47 }
 0x544   : > { %v768_v48 = vpop.f32.mrf.mxu1 }
 0x5b5   : > { %v776_v56 = vpop.xlane.xlu0 %775 }
 0x5b6   : > { %v784_v57 = vmul.f32 %v783_v55, %v776_v56 }
 0x5b8   : > { %v785_v58 = vsub.f32 %v771_v46, %v784_v57 }
 0x5ba   : > { %v786_v4 = vmul.f32 %v785_v58, %v785_v58 }
 0x5bc   : > { %v787_v59 = vsel %vm426_vm0, %v786_v4, 0.0 }
 0x5bd   : > { %788 = vadd.xlane.f32.xlu1 %v787_v59 }
 0x630   : > { %v789_v60 = vpop.xlane.xlu1 %788 }
 0x631   : > { %v790_v61 = vmul.f32 %v789_v60, %v783_v55 }
 0x633   : > { %v791_v62 = vadd.f32 1e-05, %v790_v61 }
 0x635   : > { %1009 = vrsqrt.f32 %v791_v62  ;;  %vm798_vm8 = vweird.f32 %v791_v62 }
 0x63b   : > { %v1010_v63 = vpop.eup %1009 }
 0x63c   : > { %v793_v0 = vmul.f32 %v1010_v63, %v791_v62  ;;  %vm799_vm7 = vweird.f32 %v1010_v63 }
 0x63d   : > { %vm800_vm9 = vmor %vm798_vm8, %vm799_vm7 }
 0x63e   : > { %v794_v1 = vmul.f32 %v1010_v63, %v793_v0 }
 0x640   : > { %v795_v2 = vmul.f32 0.5, %v794_v1 }
 0x642   : > { %v796_v3 = vsub.f32 1.5, %v795_v2 }
 0x644   : > { %v797_v5 = vmul.f32 %v1010_v63, %v796_v3 }
 0x646   : > { %v801_v7 = vsel %vm800_vm9, %v1010_v63, %v797_v5 }
 0x647   : > { %v802_v9 = vmul.f32 %v801_v7, %v785_v58 }
 0x649   : > { %v806_v10 = vmul.f32 %v989_v6, %v802_v9 }
 0x64b   : > { %v810_v11 = vadd.f32 %v990_v8, %v806_v10 }
 0x64d   : > { %v811_v12 = vpack.c.bf16 %v810_v11, %v810_v11 }
 0x64f   : > { %813 = vst.msk [vmem:[%s402_s26] sm:$0xf] %vm812_vm10, %v811_v12 }
 0x650 PF: > { %s20_s15 = sadd.s32 1, %s1033_s15   ;;  %s1231_s13 = smov %s1029_s14 }
 0x651   : > { %p17_p5 = scmp.ge.s32.totalorder %s20_s15, 4   ;;  %s1232_s14 = smov %s1234_s16 }
 0x653   :  { %19 = sbr.rel (!%p17_p5) target bundleno = 2 (0x2), region = 93 }

// kernel: transformer_decoder_forward.14
= control target key start
LH: loop header
LB: loop body
LE: loop exit
PB: predicated region body
PF: predicated region fallthrough
CT: control target
= control target key end

     0   :  { %vm20_vm0 = vcmask 261120   ;;  %v104_v5 = vmov 32.0   ;;  %vm84_vm6 = vcmask 257024   ;;  %s144_s0 = inlined_call_operand.vmem [shape: bf16[16,32], index: 0, kind: input, shape index: {}]   ;;  %s145_s1 = inlined_call_operand.vmem [shape: f32[1,32], index: 1, kind: input, shape index: {}]   ;;  %s146_s2 = inlined_call_operand.vmem [shape: f32[1,32], index: 2, kind: input, shape index: {}]   ;;  %s147_s3 = inlined_call_operand.vmem [shape: bf16[16,32], index: 3, kind: output, shape index: {}]  }
   0x1   :  { %v92_v0 = vld [vmem:[%s144_s0] sm:$0xff]   ;;  %98 = vrcp.f32 %v104_v5 }
   0x2   :  { %v93_v1 = vunpack.c.l.bf16 %v92_v0  ;;  %v94_v3 = vunpack.c.h.bf16 %v92_v0  ;;  %v96_v36 = vld [vmem:[%s145_s1] ss:$0 sm:$0xff] }
   0x3   :  { %v97_v39 = vld [vmem:[%s146_s2] ss:$0 sm:$0xff] }
   0x4   :  { %v21_v2 = vsel %vm20_vm0, %v93_v1, 0.0  ;;  %v24_v4 = vsel %vm20_vm0, %v94_v3, 0.0 }
   0x5   :  { %22 = vadd.xlane.f32.xlu0 %v21_v2 }
   0x7   :  { %v99_v6 = vpop.eup %98 }
   0x8   :  { %v28_v7 = vmul.f32 32.0, %v99_v6  ;;  %vm32_vm1 = vweird.f32 %v99_v6 }
   0xa   :  { %v29_v8 = vsub.f32 1.0, %v28_v7 }
   0xc   :  { %v30_v9 = vmul.f32 %v99_v6, %v29_v8 }
   0xd   :  { %25 = vadd.xlane.f32.xlu0 %v24_v4 }
   0xe   :  { %v31_v10 = vadd.f32 %v99_v6, %v30_v9 }
  0x10   :  { %v33_v11 = vsel %vm32_vm1, %v99_v6, %v31_v10 }
  0x78   :  { %v23_v12 = vpop.xlane.xlu0 %22 }
  0x79   :  { %v34_v13 = vmul.f32 %v33_v11, %v23_v12 }
  0x7b   :  { %v36_v14 = vsub.f32 %v93_v1, %v34_v13 }
  0x7d   :  { %v38_v15 = vmul.f32 %v36_v14, %v36_v14 }
  0x7f   :  { %v40_v16 = vsel %vm20_vm0, %v38_v15, 0.0 }
  0x80   :  { %41 = vadd.xlane.f32.xlu1 %v40_v16  ;;  %v26_v17 = vpop.xlane.xlu0 %25 }
  0x81   :  { %v35_v18 = vmul.f32 %v33_v11, %v26_v17 }
  0x83   :  { %v37_v19 = vsub.f32 %v94_v3, %v35_v18 }
  0x85   :  { %v39_v20 = vmul.f32 %v37_v19, %v37_v19 }
  0x87   :  { %v43_v21 = vsel %vm20_vm0, %v39_v20, 0.0 }
  0x88   :  { %44 = vadd.xlane.f32.xlu1 %v43_v21 }
  0xf3   :  { %v42_v22 = vpop.xlane.xlu1 %41 }
  0xf4   :  { %v46_v23 = vmul.f32 %v42_v22, %v33_v11 }
  0xf6   :  { %v48_v24 = vadd.f32 1e-05, %v46_v23 }
  0xf8   :  { %100 = vrsqrt.f32 %v48_v24  ;;  %vm56_vm3 = vweird.f32 %v48_v24 }
  0xfb   :  { %v45_v25 = vpop.xlane.xlu1 %44 }
  0xfc   :  { %v47_v26 = vmul.f32 %v45_v25, %v33_v11 }
  0xfe   :  { %v101_v27 = vpop.eup %100  ;;  %v49_v28 = vadd.f32 1e-05, %v47_v26 }
  0xff   :  { %v51_v29 = vmul.f32 %v101_v27, %v48_v24  ;;  %vm57_vm2 = vweird.f32 %v101_v27 }
 0x100   :  { %102 = vrsqrt.f32 %v49_v28  ;;  %vm58_vm4 = vmor %vm56_vm3, %vm57_vm2  ;;  %vm66_vm7 = vweird.f32 %v49_v28 }
 0x101   :  { %v52_v30 = vmul.f32 %v101_v27, %v51_v29 }
 0x103   :  { %v53_v31 = vmul.f32 0.5, %v52_v30 }
 0x105   :  { %v54_v32 = vsub.f32 1.5, %v53_v31 }
 0x106   :  { %v103_v33 = vpop.eup %102 }
 0x107   :  { %v55_v34 = vmul.f32 %v101_v27, %v54_v32  ;;  %v61_v35 = vmul.f32 %v103_v33, %v49_v28  ;;  %vm67_vm5 = vweird.f32 %v103_v33 }
 0x108   :  { %vm68_vm8 = vmor %vm66_vm7, %vm67_vm5 }
 0x109   :  { %v59_v37 = vsel %vm58_vm4, %v101_v27, %v55_v34  ;;  %v62_v38 = vmul.f32 %v103_v33, %v61_v35 }
 0x10a   :  { %v70_v40 = vmul.f32 %v59_v37, %v36_v14 }
 0x10b   :  { %v63_v41 = vmul.f32 0.5, %v62_v38 }
 0x10c   :  { %v75_v42 = vmul.f32 %v96_v36, %v70_v40 }
 0x10d   :  { %v64_v43 = vsub.f32 1.5, %v63_v41 }
 0x10e   :  { %v80_v44 = vadd.f32 %v97_v39, %v75_v42 }
 0x10f   :  { %v65_v45 = vmul.f32 %v103_v33, %v64_v43 }
 0x110   :  { %v82_v46 = vpack.c.bf16 %v80_v44, %v80_v44 }
 0x111   :  { %v69_v47 = vsel %vm68_vm8, %v103_v33, %v65_v45 }
 0x112   :  { %85 = vst.msk [vmem:[%s147_s3] sm:$0xf] %vm84_vm6, %v82_v46  ;;  %v71_v48 = vmul.f32 %v69_v47, %v37_v19 }
 0x114   :  { %v76_v49 = vmul.f32 %v96_v36, %v71_v48 }
 0x116   :  { %v81_v50 = vadd.f32 %v97_v39, %v76_v49 }
 0x118   :  { %v83_v51 = vpack.c.bf16 %v81_v50, %v81_v50 }
 0x11a   :  { %86 = vst.msk [vmem:[%s147_s3 + $0x4] sm:$0xf] %vm84_vm6, %v83_v51 }

// kernel: transformer_decoder_forward.15
= control target key start
LH: loop header
LB: loop body
LE: loop exit
PB: predicated region body
PF: predicated region fallthrough
CT: control target
= control target key end

     0   :  { %s166_s0 = inlined_call_operand.vmem [shape: bf16[16,32], index: 0, kind: input, shape index: {}]   ;;  %s167_s1 = inlined_call_operand.vmem [shape: bf16[32,96], index: 1, kind: input, shape index: {}]   ;;  %s168_s2 = inlined_call_operand.vmem [shape: f32[1,96], index: 2, kind: input, shape index: {}]   ;;  %s169_s3 = inlined_call_operand.hbm [shape: f32[16,96], index: 3, kind: output, shape index: {}]  }
   0x1   :  { %v97_v0 = vld [vmem:[%s167_s1 + $0x8] sm:$0xff] }
   0x2   :  { %8 = vsyncpa [#allocation3], 0  ;;  %53 = vmatpush.bf16.msra.mxu0 %v97_v0  ;;  %v96_v1 = vld [vmem:[%s167_s1] sm:$0xff]  ;;  %vm43_vm0 = vcmask 261120   ;;  %vm61_vm1 = vcmask 785408   ;;  %s128_s20 = smov [#allocation2]  }
   0x3   :  { %v95_v2 = vld [vmem:[%s166_s0] sm:$0xff]  ;;  %s68_s21 = sshll.u32 %s128_s20, 4  ;;  %s70_s1 = sshll.u32 %s169_s3, 4  ;;  %s69_s21 = int_to_ptr.vmem [resolvable:$true] %s68_s21  ;;  %s71_s1 = int_to_ptr.hbm [resolvable:$true] %s70_s1 }
   0x4   :  { %v101_v3 = vld [vmem:[%s168_s2] ss:$0 sm:$0xff]  ;;  %s129_s0 = smov 128   ;;  %s130_s24 = smov 8  }
   0x6   :  { %54 = vmatpush.bf16.msra.mxu0 %v96_v1 }
   0x9   :  { %94 = vmatmul.msk.bf16.vlgmr.msra.gmra.mxu0 %vm43_vm0, %v95_v2 }
  0x86   :  { %v56_v4 = vpop.f32.mrf.mxu0 }
  0x87   :  { %v57_v5 = vadd.f32 %v101_v3, %v56_v4 }
  0x89   :  { %62 = vst.msk [vmem:[#allocation2] sm:$0xff] %vm61_vm1, %v57_v5 }
  0x8e   :  { %v58_v6 = vpop.f32.mrf.mxu0 }
  0x8f   :  { %v59_v7 = vadd.f32 %v101_v3, %v58_v6 }
  0x91   :  { %63 = vst.msk [vmem:[#allocation2 + $0x8] sm:$0xff] %vm61_vm1, %v59_v7 }
  0x92   :  { %76 = dma.vmem_to_hbm [thread:$0]  %s69_s21, 256, %s71_s1, [#allocation3], %s129_s0, %s129_s0, %s130_s24  }
  0x93   :  { %126 = dma.done.wait [#allocation3], 256  }
  0x94   :  { %127 = vsyncadd [#allocation3], 4294967040 }
  0x95   :  { %81 = vsyncpa [#allocation3], 1 }

</bundles_post_ra>
